<compile_context>
chip_gen: v5e
topology: v5e:2x2
jax: 0.10.0
libtpu: 0.0.40
codegen_flags: <defaults>
</compile_context>

<pallas_src>
import functools
import math

import jax
import jax.numpy as jnp
from jax import lax
from jax.experimental import pallas as pl
from jax.experimental.pallas import tpu as pltpu

PAD = 0
BOS = 1


# ---------------------------------------------------------------------------
# Stage A (parallel over T): hoisted input projection
#   emb_proj[t] = emb[t] @ W_emb + (b_ih + b_hh)
# ---------------------------------------------------------------------------
def _input_proj_kernel(emb_ref, w_emb_ref, b_ref, out_ref):
    t_tile, bsz, hsz = emb_ref.shape
    gsz = w_emb_ref.shape[-1]
    x = emb_ref[...].reshape(t_tile * bsz, hsz)          # bf16 rows
    y = (jnp.dot(x, w_emb_ref[...], preferred_element_type=jnp.float32)
         + b_ref[...])                                   # f32 (t_tile*B, 4H)
    out_ref[...] = y.reshape(t_tile, bsz, gsz)


# ---------------------------------------------------------------------------
# Stage B (sequential over T): LSTM recurrence only.
#   gates = emb_proj_t + h_{t-1} @ W_h   (input projection + bias precomputed)
# h carried as bf16 between steps (matches the bf16 cast the MXU needs anyway),
# c carried as f32.  h_seq emitted as bf16.
# ---------------------------------------------------------------------------
def _lstm_recurrence_kernel(emb_proj_ref, h0_ref, c0_ref, w_h_ref,
                            h_out_ref, h_sc, c_sc, h_tile_sc):
    @pl.when(pl.program_id(0) == 0)
    def _():
        h_sc[...] = h0_ref[...].astype(jnp.bfloat16)
        c_sc[...] = c0_ref[...].astype(jnp.float32)

    t_tile = emb_proj_ref.shape[0]
    hsz = c_sc.shape[-1]
    w_h = w_h_ref[...]                                   # (H, 4H) bf16, loop-invariant

    def step(tt, carry):
        h_prev, c_prev = carry                           # bf16 (B,H), f32 (B,H)
        gates = (jnp.dot(h_prev, w_h, preferred_element_type=jnp.float32)
                 + emb_proj_ref[tt])                     # f32 (B, 4H)
        i_g = jax.nn.sigmoid(gates[:, 0 * hsz:1 * hsz])
        f_g = jax.nn.sigmoid(gates[:, 1 * hsz:2 * hsz])
        g_g = jnp.tanh(gates[:, 2 * hsz:3 * hsz])
        o_g = jax.nn.sigmoid(gates[:, 3 * hsz:4 * hsz])
        c_new = f_g * c_prev + i_g * g_g
        h_new = o_g * jnp.tanh(c_new)                    # f32
        h_tile_sc[tt] = h_new                            # clean (8,128) f32 tile store
        return h_new.astype(jnp.bfloat16), c_new

    h_fin, c_fin = lax.fori_loop(0, t_tile, step, (h_sc[...], c_sc[...]),
                                 unroll=math.gcd(t_tile, 8))
    h_sc[...] = h_fin
    c_sc[...] = c_fin
    h_out_ref[...] = h_tile_sc[...].astype(jnp.bfloat16)  # one bulk bf16 store per tile


# ---------------------------------------------------------------------------
# Stage C (parallel over T): output projection + log_softmax, batch-major.
# Writes straight into the (B, T, V) output -> no wrapper transpose of the
# largest array.
# ---------------------------------------------------------------------------
def _proj_logsoftmax_kernel(h_ref, w_out_ref, b_out_ref, out_ref):
    bsz, t_tile, hsz = h_ref.shape
    vsz = w_out_ref.shape[-1]
    h2 = h_ref[...].reshape(bsz * t_tile, hsz)           # bf16 rows
    logits = (jnp.dot(h2, w_out_ref[...], preferred_element_type=jnp.float32)
              + b_out_ref[...])                          # f32 (B*t_tile, V)
    m = jnp.max(logits, axis=-1, keepdims=True)
    lse = jnp.log(jnp.sum(jnp.exp(logits - m), axis=-1, keepdims=True)) + m
    out_ref[...] = (logits - lse).reshape(bsz, t_tile, vsz)


# ---------------------------------------------------------------------------
# Wrapper / glue
# ---------------------------------------------------------------------------
def _pack_params(params):
    """Repack PyTorch-layout weights: bf16 weights/table (MXU-native), f32 biases."""
    hsz = params["w_hh"].shape[1]
    vsz = params["w_out"].shape[0]
    emb_tbl = params["emb_table"].astype(jnp.bfloat16)                     # (V, H)
    w_ih = params["w_ih"]                                                  # (4H, 2H)
    w_emb = jnp.transpose(w_ih[:, :hsz]).astype(jnp.bfloat16)              # (H, 4H)
    w_h = (jnp.transpose(w_ih[:, hsz:])
           + jnp.transpose(params["w_hh"])).astype(jnp.bfloat16)           # (H, 4H)
    b = (params["b_ih"] + params["b_hh"]).astype(jnp.float32).reshape(1, 4 * hsz)
    w_out_t = jnp.transpose(params["w_out"]).astype(jnp.bfloat16)          # (H, V)
    b_out = params["b_out"].astype(jnp.float32).reshape(1, vsz)
    return emb_tbl, w_emb, w_h, b, w_out_t, b_out


def _largest_divisor_leq(n, cap):
    cap = int(max(1, min(n, cap)))
    for d in range(cap, 0, -1):
        if n % d == 0:
            return d
    return 1


def actor_forward(hidden, labels, params, *, max_len):
    """JAX/Pallas equivalent of Actor.forward(hidden, labels) with dropout=0.

    hidden: (h0, c0), each (rnn_layers=1, B, H);  labels: (B, max_len) int32
    returns: (B, max_len, vocab_size) float32 log-probabilities.
    """
    h0 = hidden[0][0]                                    # (B, H)
    c0 = hidden[1][0]                                    # (B, H)
    B, H = h0.shape
    V = params["w_out"].shape[0]
    T = max_len

    assert B % 8 == 0 and H % 128 == 0 and V % 128 == 0, (
        "kernel tiling assumes B % 8 == 0 and H, V multiples of 128")

    emb_tbl, w_emb, w_h, b, w_out_t, b_out = _pack_params(params)

    # Embedding gather (glue): token consumed at step t is BOS for t==0, else labels[:, t-1].
    # Gather + transpose done in bf16 -> half the HBM traffic of the old f32 path.
    tok = jnp.concatenate(
        [jnp.full((B, 1), BOS, dtype=labels.dtype), labels[:, :T - 1]], axis=1)
    emb_seq = jnp.transpose(jnp.take(emb_tbl, tok, axis=0), (1, 0, 2))    # (T, B, H) bf16

    # Time tiles: A/C sized for big lane-dense matmuls (bounded by VMEM block budget);
    # B sized so emb_proj/h tiles stay VMEM-resident -> at small T the grid collapses to (1,).
    t_tile_ac = _largest_divisor_leq(T, (6 << 20) // (2 * B * max(V, 4 * H) * 4))
    per_t_b = 2 * (B * 4 * H * 4) + 2 * (B * H * 2) + B * H * 4
    t_tile_b = _largest_divisor_leq(T, (8 << 20) // per_t_b)

    # Whole-array VMEM residency (single-buffered) for time-invariant operands.
    resident = pl.BlockSpec(memory_space=pltpu.MemorySpace.VMEM)
    VLIM = 32 * 1024 * 1024

    # ---- Stage A: hoisted input projection for all T steps (parallel) -------
    emb_proj = pl.pallas_call(
        _input_proj_kernel,
        out_shape=jax.ShapeDtypeStruct((T, B, 4 * H), jnp.float32),
        grid_spec=pltpu.PrefetchScalarGridSpec(
            num_scalar_prefetch=0,
            grid=(T // t_tile_ac,),
            in_specs=[
                pl.BlockSpec((t_tile_ac, B, H), lambda i: (i, 0, 0)),   # emb tile (bf16)
                resident,                                               # w_emb (H, 4H) bf16
                resident,                                               # b     (1, 4H) f32
            ],
            out_specs=pl.BlockSpec((t_tile_ac, B, 4 * H), lambda i: (i, 0, 0)),
        ),
        compiler_params=pltpu.CompilerParams(
            dimension_semantics=("parallel",), vmem_limit_bytes=VLIM),
    )(emb_seq, w_emb, b)

    # ---- Stage B: serial LSTM recurrence (grid collapses to 1 step at small T) ----
    h_seq = pl.pallas_call(
        _lstm_recurrence_kernel,
        out_shape=jax.ShapeDtypeStruct((T, B, H), jnp.bfloat16),
        grid_spec=pltpu.PrefetchScalarGridSpec(
            num_scalar_prefetch=0,
            grid=(T // t_tile_b,),
            in_specs=[
                pl.BlockSpec((t_tile_b, B, 4 * H), lambda i: (i, 0, 0)),  # emb_proj tile
                resident,                                                 # h0 (B, H) f32
                resident,                                                 # c0 (B, H) f32
                resident,                                                 # w_h (H, 4H) bf16
            ],
            out_specs=pl.BlockSpec((t_tile_b, B, H), lambda i: (i, 0, 0)),
            scratch_shapes=[pltpu.VMEM((B, H), jnp.bfloat16),             # h state (bf16)
                            pltpu.VMEM((B, H), jnp.float32),              # c state (f32)
                            pltpu.VMEM((t_tile_b, B, H), jnp.float32)],   # h tile staging
        ),
        compiler_params=pltpu.CompilerParams(
            dimension_semantics=("arbitrary",), vmem_limit_bytes=VLIM),
    )(emb_proj, h0, c0, w_h)

    # Tiny bf16 relayout (T,B,H)->(B,T,H) so Stage C is fully batch-major; this is
    # V/H * 2 smaller than the old (T,B,V) f32 output transpose it replaces.
    h_bm = jnp.transpose(h_seq, (1, 0, 2))               # (B, T, H) bf16

    # ---- Stage C: output projection + log_softmax, writes (B, T, V) directly ----
    out = pl.pallas_call(
        _proj_logsoftmax_kernel,
        out_shape=jax.ShapeDtypeStruct((B, T, V), jnp.float32),
        grid_spec=pltpu.PrefetchScalarGridSpec(
            num_scalar_prefetch=0,
            grid=(T // t_tile_ac,),
            in_specs=[
                pl.BlockSpec((B, t_tile_ac, H), lambda i: (0, i, 0)),   # h tile (bf16)
                resident,                                               # w_out (H, V) bf16
                resident,                                               # b_out (1, V) f32
            ],
            out_specs=pl.BlockSpec((B, t_tile_ac, V), lambda i: (0, i, 0)),
        ),
        compiler_params=pltpu.CompilerParams(
            dimension_semantics=("parallel",), vmem_limit_bytes=VLIM),
    )(h_bm, w_out_t, b_out)

    return out                                            # (B, T, V), PyTorch layout


def actor_forward_ref(hidden, labels, params, *, max_len):
    """Pure-JAX reference using the same bf16 weight packing (numerical check)."""
    h = hidden[0][0].astype(jnp.float32)
    c = hidden[1][0].astype(jnp.float32)
    B, H = h.shape
    emb_tbl, w_emb, w_h, b, w_out_t, b_out = _pack_params(params)
    tok = jnp.concatenate(
        [jnp.full((B, 1), BOS, dtype=labels.dtype), labels[:, :max_len - 1]], axis=1)
    emb_seq = jnp.take(emb_tbl, tok, axis=0)             # (B, T, H) bf16
    outs = []
    for t in range(max_len):
        emb = emb_seq[:, t, :]
        gates = ((jnp.dot(emb, w_emb, preferred_element_type=jnp.float32) + b)
                 + jnp.dot(h.astype(jnp.bfloat16), w_h,
                           preferred_element_type=jnp.float32))
        i_g = jax.nn.sigmoid(gates[:, 0 * H:1 * H])
        f_g = jax.nn.sigmoid(gates[:, 1 * H:2 * H])
        g_g = jnp.tanh(gates[:, 2 * H:3 * H])
        o_g = jax.nn.sigmoid(gates[:, 3 * H:4 * H])
        c = f_g * c + i_g * g_g
        h = o_g * jnp.tanh(c)
        logits = (jnp.dot(h.astype(jnp.bfloat16), w_out_t,
                          preferred_element_type=jnp.float32) + b_out)
        outs.append(jax.nn.log_softmax(logits, axis=-1))
    return jnp.stack(outs, axis=1)                        # (B, T, V)


def init_params(key, vocab_size, dec_hsz):
    """Deterministic parameter init mirroring the module's shapes."""
    H, V = dec_hsz, vocab_size
    stdv = 1.0 / (V ** 0.5)           # Actor._reset_parameters
    lstm_std = 1.0 / (H ** 0.5)       # nn.LSTM default init
    ks = jax.random.split(key, 7)

    emb_table = jax.random.uniform(ks[0], (V, H), jnp.float32, -stdv, stdv)
    emb_table = emb_table.at[PAD].set(0.0)        # padding_idx=PAD

    return {
        "emb_table": emb_table,
        "w_ih": jax.random.uniform(ks[1], (4 * H, 2 * H), jnp.float32, -lstm_std, lstm_std),
        "w_hh": jax.random.uniform(ks[2], (4 * H, H), jnp.float32, -lstm_std, lstm_std),
        "b_ih": jax.random.uniform(ks[3], (4 * H,), jnp.float32, -lstm_std, lstm_std),
        "b_hh": jax.random.uniform(ks[4], (4 * H,), jnp.float32, -lstm_std, lstm_std),
        "w_out": jax.random.uniform(ks[5], (V, H), jnp.float32, -stdv, stdv),
        "b_out": jax.random.uniform(ks[6], (V,), jnp.float32, -stdv, stdv),
    }


if __name__ == "__main__":
    vocab_size = 256
    dec_hsz = 128
    rnn_layers = 1       # forward's cat([emb, h], -1) is only shape-consistent for 1 layer
    bsz = 8
    max_len = 8

    key = jax.random.PRNGKey(0)
    kp, kh, kl = jax.random.split(key, 3)
    params = init_params(kp, vocab_size, dec_hsz)

    # hidden as produced by feed_enc: h = enc broadcast over layers, c = zeros
    enc = jax.random.normal(kh, (bsz, dec_hsz), jnp.float32)
    h0 = jnp.broadcast_to(enc[None], (rnn_layers, bsz, dec_hsz))
    c0 = jnp.zeros((rnn_layers, bsz, dec_hsz), jnp.float32)
    labels = jax.random.randint(kl, (bsz, max_len), 2, vocab_size, dtype=jnp.int32)

    fwd = jax.jit(functools.partial(actor_forward, max_len=max_len))
    out = jax.block_until_ready(fwd((h0, c0), labels, params))
    assert out.shape == (bsz, max_len, vocab_size)
    assert bool(jnp.all(jnp.isfinite(out)))

    ref = actor_forward_ref((h0, c0), labels, params, max_len=max_len)
    max_diff = float(jnp.max(jnp.abs(out - ref)))
    assert max_diff < 5e-2, f"kernel/reference mismatch: max|diff|={max_diff:.2e}"
    print("KERNEL_OK")
</pallas_src>

<mosaic_0001>
module attributes {stable_mosaic.version = 11 : i64} {
  func.func @_input_proj_kernel(%arg0: i32, %arg1: memref<8x8x128xbf16, #tpu.memory_space<vmem>>, %arg2: memref<128x512xbf16, #tpu.memory_space<vmem>>, %arg3: memref<1x512xf32, #tpu.memory_space<vmem>>, %arg4: memref<8x8x512xf32, #tpu.memory_space<vmem>>) attributes {dimension_semantics = [#tpu.dimension_semantics<parallel>], iteration_bounds = array<i64: 1>, scalar_prefetch = 0 : i64, scratch_operands = 0 : i64, tpu.core_type = #tpu.core_type<tc>, window_params = [{transform_indices = @transform_0, window_bounds = array<i64: 8, 8, 128>}, {pipeline_mode = #tpu.pipeline_mode<synchronous>, transform_indices = @transform_1, window_bounds = array<i64: 128, 512>}, {pipeline_mode = #tpu.pipeline_mode<synchronous>, transform_indices = @transform_2, window_bounds = array<i64: 1, 512>}, {transform_indices = @transform_3, window_bounds = array<i64: 8, 8, 512>}]} {
    %c0 = arith.constant 0 : index
    %c0_0 = arith.constant 0 : index
    %c0_1 = arith.constant 0 : index
    %0 = vector.load %arg1[%c0, %c0_0, %c0_1] : memref<8x8x128xbf16, #tpu.memory_space<vmem>>, vector<8x8x128xbf16>
    %1 = vector.shape_cast %0 : vector<8x8x128xbf16> to vector<64x128xbf16>
    %c0_2 = arith.constant 0 : index
    %c0_3 = arith.constant 0 : index
    %2 = vector.load %arg2[%c0_2, %c0_3] : memref<128x512xbf16, #tpu.memory_space<vmem>>, vector<128x512xbf16>
    %cst = arith.constant dense<0.000000e+00> : vector<64x512xf32>
    %3 = tpu.matmul %1, %2, %cst {dimension_numbers = #tpu.dot_dimension_numbers<[1], [0], [0], [1], [0, 0, 1, 1], [], []>} : vector<64x128xbf16>, vector<128x512xbf16>, vector<64x512xf32> -> vector<64x512xf32>
    %c0_4 = arith.constant 0 : index
    %c0_5 = arith.constant 0 : index
    %4 = vector.load %arg3[%c0_4, %c0_5] : memref<1x512xf32, #tpu.memory_space<vmem>>, vector<1x512xf32>
    %5 = vector.broadcast %4 : vector<1x512xf32> to vector<64x512xf32>
    %6 = arith.addf %3, %5 : vector<64x512xf32>
    %7 = vector.shape_cast %6 : vector<64x512xf32> to vector<8x8x512xf32>
    %c0_6 = arith.constant 0 : index
    %c0_7 = arith.constant 0 : index
    %c0_8 = arith.constant 0 : index
    %8 = vector.load %arg4[%c0_6, %c0_7, %c0_8] : memref<8x8x512xf32, #tpu.memory_space<vmem>>, vector<8x8x512xf32>
    tpu.vector_store %arg4[%c0_6, %c0_7, %c0_8], %7 {strides = array<i32>} : memref<8x8x512xf32, #tpu.memory_space<vmem>>, vector<8x8x512xf32>,
    return
  }
  func.func @transform_0(%arg0: i32) -> (i32, i32, i32) {
    %c0_i32 = arith.constant 0 : i32
    %c0_i32_0 = arith.constant 0 : i32
    %c0_i32_1 = arith.constant 0 : i32
    return %arg0, %c0_i32, %c0_i32_0 : i32, i32, i32
  }
  func.func @transform_1(%arg0: i32) -> (i32, i32) {
    %c0_i32 = arith.constant 0 : i32
    %c0_i32_0 = arith.constant 0 : i32
    %c0_i32_1 = arith.constant 0 : i32
    return %c0_i32, %c0_i32_0 : i32, i32
  }
  func.func @transform_2(%arg0: i32) -> (i32, i32) {
    %c0_i32 = arith.constant 0 : i32
    %c0_i32_0 = arith.constant 0 : i32
    %c0_i32_1 = arith.constant 0 : i32
    return %c0_i32, %c0_i32_0 : i32, i32
  }
  func.func @transform_3(%arg0: i32) -> (i32, i32, i32) {
    %c0_i32 = arith.constant 0 : i32
    %c0_i32_0 = arith.constant 0 : i32
    %c0_i32_1 = arith.constant 0 : i32
    return %arg0, %c0_i32, %c0_i32_0 : i32, i32, i32
  }
}

module attributes {stable_mosaic.version = 11 : i64} {
  func.func @_lstm_recurrence_kernel(%arg0: i32, %arg1: memref<8x8x512xf32, #tpu.memory_space<vmem>>, %arg2: memref<8x128xf32, #tpu.memory_space<vmem>>, %arg3: memref<8x128xf32, #tpu.memory_space<vmem>>, %arg4: memref<128x512xbf16, #tpu.memory_space<vmem>>, %arg5: memref<8x8x128xbf16, #tpu.memory_space<vmem>>, %arg6: memref<8x128xbf16, #tpu.memory_space<vmem>>, %arg7: memref<8x128xf32, #tpu.memory_space<vmem>>, %arg8: memref<8x8x128xf32, #tpu.memory_space<vmem>>) attributes {dimension_semantics = [#tpu.dimension_semantics<arbitrary>], iteration_bounds = array<i64: 1>, scalar_prefetch = 0 : i64, scratch_operands = 3 : i64, tpu.core_type = #tpu.core_type<tc>, window_params = [{transform_indices = @transform_0, window_bounds = array<i64: 8, 8, 512>}, {pipeline_mode = #tpu.pipeline_mode<synchronous>, transform_indices = @transform_1, window_bounds = array<i64: 8, 128>}, {pipeline_mode = #tpu.pipeline_mode<synchronous>, transform_indices = @transform_2, window_bounds = array<i64: 8, 128>}, {pipeline_mode = #tpu.pipeline_mode<synchronous>, transform_indices = @transform_3, window_bounds = array<i64: 128, 512>}, {transform_indices = @transform_4, window_bounds = array<i64: 8, 8, 128>}]} {
    %c0_i32 = arith.constant 0 : i32
    %0 = arith.cmpi eq, %arg0, %c0_i32 : i32
    %1 = arith.extui %0 : i1 to i32
    %c0_i32_0 = arith.constant 0 : i32
    %2 = arith.cmpi ne, %1, %c0_i32_0 : i32
    scf.if %2 {
      %c0_80 = arith.constant 0 : index
      %c0_81 = arith.constant 0 : index
      %291 = vector.load %arg2[%c0_80, %c0_81] : memref<8x128xf32, #tpu.memory_space<vmem>>, vector<8x128xf32>
      %292 = arith.truncf %291 : vector<8x128xf32> to vector<8x128xbf16>
      %c0_82 = arith.constant 0 : index
      %c0_83 = arith.constant 0 : index
      %293 = vector.load %arg6[%c0_82, %c0_83] : memref<8x128xbf16, #tpu.memory_space<vmem>>, vector<8x128xbf16>
      tpu.vector_store %arg6[%c0_82, %c0_83], %292 {strides = array<i32>} : memref<8x128xbf16, #tpu.memory_space<vmem>>, vector<8x128xbf16>,
      %c0_84 = arith.constant 0 : index
      %c0_85 = arith.constant 0 : index
      %294 = vector.load %arg3[%c0_84, %c0_85] : memref<8x128xf32, #tpu.memory_space<vmem>>, vector<8x128xf32>
      %c0_86 = arith.constant 0 : index
      %c0_87 = arith.constant 0 : index
      %295 = vector.load %arg7[%c0_86, %c0_87] : memref<8x128xf32, #tpu.memory_space<vmem>>, vector<8x128xf32>
      tpu.vector_store %arg7[%c0_86, %c0_87], %294 {strides = array<i32>} : memref<8x128xf32, #tpu.memory_space<vmem>>, vector<8x128xf32>,
    } else {
    }
    %c0 = arith.constant 0 : index
    %c0_1 = arith.constant 0 : index
    %3 = vector.load %arg4[%c0, %c0_1] : memref<128x512xbf16, #tpu.memory_space<vmem>>, vector<128x512xbf16>
    %c0_2 = arith.constant 0 : index
    %c0_3 = arith.constant 0 : index
    %4 = vector.load %arg6[%c0_2, %c0_3] : memref<8x128xbf16, #tpu.memory_space<vmem>>, vector<8x128xbf16>
    %c0_4 = arith.constant 0 : index
    %c0_5 = arith.constant 0 : index
    %5 = vector.load %arg7[%c0_4, %c0_5] : memref<8x128xf32, #tpu.memory_space<vmem>>, vector<8x128xf32>
    %c0_i32_6 = arith.constant 0 : i32
    %cst = arith.constant dense<0.000000e+00> : vector<8x512xf32>
    %6 = tpu.matmul %4, %3, %cst {dimension_numbers = #tpu.dot_dimension_numbers<[1], [0], [0], [1], [0, 0, 1, 1], [], []>} : vector<8x128xbf16>, vector<128x512xbf16>, vector<8x512xf32> -> vector<8x512xf32>
    %7 = arith.index_cast %c0_i32_6 : i32 to index
    %c0_7 = arith.constant 0 : index
    %c0_8 = arith.constant 0 : index
    %8 = vector.load %arg1[%7, %c0_7, %c0_8] : memref<8x8x512xf32, #tpu.memory_space<vmem>>, vector<1x8x512xf32>
    %9 = vector.shape_cast %8 : vector<1x8x512xf32> to vector<8x512xf32>
    %10 = arith.addf %6, %9 : vector<8x512xf32>
    %11 = vector.extract_strided_slice %10 {offsets = [0, 0], sizes = [8, 128], strides = [1, 1]} : vector<8x512xf32> to vector<8x128xf32>
    %12 = arith.negf %11 : vector<8x128xf32>
    %13 = math.exp %12 : vector<8x128xf32>
    %cst_9 = arith.constant 1.000000e+00 : f32
    %14 = vector.broadcast %cst_9 : f32 to vector<8x128xf32>
    %15 = arith.addf %14, %13 : vector<8x128xf32>
    %16 = arith.divf %14, %15 : vector<8x128xf32>
    %17 = vector.extract_strided_slice %10 {offsets = [0, 128], sizes = [8, 128], strides = [1, 1]} : vector<8x512xf32> to vector<8x128xf32>
    %18 = arith.negf %17 : vector<8x128xf32>
    %19 = math.exp %18 : vector<8x128xf32>
    %cst_10 = arith.constant 1.000000e+00 : f32
    %20 = vector.broadcast %cst_10 : f32 to vector<8x128xf32>
    %21 = arith.addf %20, %19 : vector<8x128xf32>
    %22 = arith.divf %20, %21 : vector<8x128xf32>
    %23 = vector.extract_strided_slice %10 {offsets = [0, 256], sizes = [8, 128], strides = [1, 1]} : vector<8x512xf32> to vector<8x128xf32>
    %24 = math.tanh %23 : vector<8x128xf32>
    %25 = vector.extract_strided_slice %10 {offsets = [0, 384], sizes = [8, 128], strides = [1, 1]} : vector<8x512xf32> to vector<8x128xf32>
    %26 = arith.negf %25 : vector<8x128xf32>
    %27 = math.exp %26 : vector<8x128xf32>
    %cst_11 = arith.constant 1.000000e+00 : f32
    %28 = vector.broadcast %cst_11 : f32 to vector<8x128xf32>
    %29 = arith.addf %28, %27 : vector<8x128xf32>
    %30 = arith.divf %28, %29 : vector<8x128xf32>
    %31 = arith.mulf %22, %5 : vector<8x128xf32>
    %32 = arith.mulf %16, %24 : vector<8x128xf32>
    %33 = arith.addf %31, %32 : vector<8x128xf32>
    %34 = math.tanh %33 : vector<8x128xf32>
    %35 = arith.mulf %30, %34 : vector<8x128xf32>
    %36 = arith.index_cast %c0_i32_6 : i32 to index
    %c0_12 = arith.constant 0 : index
    %c0_13 = arith.constant 0 : index
    %37 = vector.load %arg8[%36, %c0_12, %c0_13] : memref<8x8x128xf32, #tpu.memory_space<vmem>>, vector<1x8x128xf32>
    %38 = vector.shape_cast %37 : vector<1x8x128xf32> to vector<8x128xf32>
    %39 = vector.shape_cast %35 : vector<8x128xf32> to vector<1x8x128xf32>
    tpu.vector_store %arg8[%36, %c0_12, %c0_13], %39 {strides = array<i32>} : memref<8x8x128xf32, #tpu.memory_space<vmem>>, vector<1x8x128xf32>,
    %40 = arith.truncf %35 : vector<8x128xf32> to vector<8x128xbf16>
    %c1_i32 = arith.constant 1 : i32
    %cst_14 = arith.constant dense<0.000000e+00> : vector<8x512xf32>
    %41 = tpu.matmul %40, %3, %cst_14 {dimension_numbers = #tpu.dot_dimension_numbers<[1], [0], [0], [1], [0, 0, 1, 1], [], []>} : vector<8x128xbf16>, vector<128x512xbf16>, vector<8x512xf32> -> vector<8x512xf32>
    %42 = arith.index_cast %c1_i32 : i32 to index
    %c0_15 = arith.constant 0 : index
    %c0_16 = arith.constant 0 : index
    %43 = vector.load %arg1[%42, %c0_15, %c0_16] : memref<8x8x512xf32, #tpu.memory_space<vmem>>, vector<1x8x512xf32>
    %44 = vector.shape_cast %43 : vector<1x8x512xf32> to vector<8x512xf32>
    %45 = arith.addf %41, %44 : vector<8x512xf32>
    %46 = vector.extract_strided_slice %45 {offsets = [0, 0], sizes = [8, 128], strides = [1, 1]} : vector<8x512xf32> to vector<8x128xf32>
    %47 = arith.negf %46 : vector<8x128xf32>
    %48 = math.exp %47 : vector<8x128xf32>
    %cst_17 = arith.constant 1.000000e+00 : f32
    %49 = vector.broadcast %cst_17 : f32 to vector<8x128xf32>
    %50 = arith.addf %49, %48 : vector<8x128xf32>
    %51 = arith.divf %49, %50 : vector<8x128xf32>
    %52 = vector.extract_strided_slice %45 {offsets = [0, 128], sizes = [8, 128], strides = [1, 1]} : vector<8x512xf32> to vector<8x128xf32>
    %53 = arith.negf %52 : vector<8x128xf32>
    %54 = math.exp %53 : vector<8x128xf32>
    %cst_18 = arith.constant 1.000000e+00 : f32
    %55 = vector.broadcast %cst_18 : f32 to vector<8x128xf32>
    %56 = arith.addf %55, %54 : vector<8x128xf32>
    %57 = arith.divf %55, %56 : vector<8x128xf32>
    %58 = vector.extract_strided_slice %45 {offsets = [0, 256], sizes = [8, 128], strides = [1, 1]} : vector<8x512xf32> to vector<8x128xf32>
    %59 = math.tanh %58 : vector<8x128xf32>
    %60 = vector.extract_strided_slice %45 {offsets = [0, 384], sizes = [8, 128], strides = [1, 1]} : vector<8x512xf32> to vector<8x128xf32>
    %61 = arith.negf %60 : vector<8x128xf32>
    %62 = math.exp %61 : vector<8x128xf32>
    %cst_19 = arith.constant 1.000000e+00 : f32
    %63 = vector.broadcast %cst_19 : f32 to vector<8x128xf32>
    %64 = arith.addf %63, %62 : vector<8x128xf32>
    %65 = arith.divf %63, %64 : vector<8x128xf32>
    %66 = arith.mulf %57, %33 : vector<8x128xf32>
    %67 = arith.mulf %51, %59 : vector<8x128xf32>
    %68 = arith.addf %66, %67 : vector<8x128xf32>
    %69 = math.tanh %68 : vector<8x128xf32>
    %70 = arith.mulf %65, %69 : vector<8x128xf32>
    %71 = arith.index_cast %c1_i32 : i32 to index
    %c0_20 = arith.constant 0 : index
    %c0_21 = arith.constant 0 : index
    %72 = vector.load %arg8[%71, %c0_20, %c0_21] : memref<8x8x128xf32, #tpu.memory_space<vmem>>, vector<1x8x128xf32>
    %73 = vector.shape_cast %72 : vector<1x8x128xf32> to vector<8x128xf32>
    %74 = vector.shape_cast %70 : vector<8x128xf32> to vector<1x8x128xf32>
    tpu.vector_store %arg8[%71, %c0_20, %c0_21], %74 {strides = array<i32>} : memref<8x8x128xf32, #tpu.memory_space<vmem>>, vector<1x8x128xf32>,
    %75 = arith.truncf %70 : vector<8x128xf32> to vector<8x128xbf16>
    %c2_i32 = arith.constant 2 : i32
    %cst_22 = arith.constant dense<0.000000e+00> : vector<8x512xf32>
    %76 = tpu.matmul %75, %3, %cst_22 {dimension_numbers = #tpu.dot_dimension_numbers<[1], [0], [0], [1], [0, 0, 1, 1], [], []>} : vector<8x128xbf16>, vector<128x512xbf16>, vector<8x512xf32> -> vector<8x512xf32>
    %77 = arith.index_cast %c2_i32 : i32 to index
    %c0_23 = arith.constant 0 : index
    %c0_24 = arith.constant 0 : index
    %78 = vector.load %arg1[%77, %c0_23, %c0_24] : memref<8x8x512xf32, #tpu.memory_space<vmem>>, vector<1x8x512xf32>
    %79 = vector.shape_cast %78 : vector<1x8x512xf32> to vector<8x512xf32>
    %80 = arith.addf %76, %79 : vector<8x512xf32>
    %81 = vector.extract_strided_slice %80 {offsets = [0, 0], sizes = [8, 128], strides = [1, 1]} : vector<8x512xf32> to vector<8x128xf32>
    %82 = arith.negf %81 : vector<8x128xf32>
    %83 = math.exp %82 : vector<8x128xf32>
    %cst_25 = arith.constant 1.000000e+00 : f32
    %84 = vector.broadcast %cst_25 : f32 to vector<8x128xf32>
    %85 = arith.addf %84, %83 : vector<8x128xf32>
    %86 = arith.divf %84, %85 : vector<8x128xf32>
    %87 = vector.extract_strided_slice %80 {offsets = [0, 128], sizes = [8, 128], strides = [1, 1]} : vector<8x512xf32> to vector<8x128xf32>
    %88 = arith.negf %87 : vector<8x128xf32>
    %89 = math.exp %88 : vector<8x128xf32>
    %cst_26 = arith.constant 1.000000e+00 : f32
    %90 = vector.broadcast %cst_26 : f32 to vector<8x128xf32>
    %91 = arith.addf %90, %89 : vector<8x128xf32>
    %92 = arith.divf %90, %91 : vector<8x128xf32>
    %93 = vector.extract_strided_slice %80 {offsets = [0, 256], sizes = [8, 128], strides = [1, 1]} : vector<8x512xf32> to vector<8x128xf32>
    %94 = math.tanh %93 : vector<8x128xf32>
    %95 = vector.extract_strided_slice %80 {offsets = [0, 384], sizes = [8, 128], strides = [1, 1]} : vector<8x512xf32> to vector<8x128xf32>
    %96 = arith.negf %95 : vector<8x128xf32>
    %97 = math.exp %96 : vector<8x128xf32>
    %cst_27 = arith.constant 1.000000e+00 : f32
    %98 = vector.broadcast %cst_27 : f32 to vector<8x128xf32>
    %99 = arith.addf %98, %97 : vector<8x128xf32>
    %100 = arith.divf %98, %99 : vector<8x128xf32>
    %101 = arith.mulf %92, %68 : vector<8x128xf32>
    %102 = arith.mulf %86, %94 : vector<8x128xf32>
    %103 = arith.addf %101, %102 : vector<8x128xf32>
    %104 = math.tanh %103 : vector<8x128xf32>
    %105 = arith.mulf %100, %104 : vector<8x128xf32>
    %106 = arith.index_cast %c2_i32 : i32 to index
    %c0_28 = arith.constant 0 : index
    %c0_29 = arith.constant 0 : index
    %107 = vector.load %arg8[%106, %c0_28, %c0_29] : memref<8x8x128xf32, #tpu.memory_space<vmem>>, vector<1x8x128xf32>
    %108 = vector.shape_cast %107 : vector<1x8x128xf32> to vector<8x128xf32>
    %109 = vector.shape_cast %105 : vector<8x128xf32> to vector<1x8x128xf32>
    tpu.vector_store %arg8[%106, %c0_28, %c0_29], %109 {strides = array<i32>} : memref<8x8x128xf32, #tpu.memory_space<vmem>>, vector<1x8x128xf32>,
    %110 = arith.truncf %105 : vector<8x128xf32> to vector<8x128xbf16>
    %c3_i32 = arith.constant 3 : i32
    %cst_30 = arith.constant dense<0.000000e+00> : vector<8x512xf32>
    %111 = tpu.matmul %110, %3, %cst_30 {dimension_numbers = #tpu.dot_dimension_numbers<[1], [0], [0], [1], [0, 0, 1, 1], [], []>} : vector<8x128xbf16>, vector<128x512xbf16>, vector<8x512xf32> -> vector<8x512xf32>
    %112 = arith.index_cast %c3_i32 : i32 to index
    %c0_31 = arith.constant 0 : index
    %c0_32 = arith.constant 0 : index
    %113 = vector.load %arg1[%112, %c0_31, %c0_32] : memref<8x8x512xf32, #tpu.memory_space<vmem>>, vector<1x8x512xf32>
    %114 = vector.shape_cast %113 : vector<1x8x512xf32> to vector<8x512xf32>
    %115 = arith.addf %111, %114 : vector<8x512xf32>
    %116 = vector.extract_strided_slice %115 {offsets = [0, 0], sizes = [8, 128], strides = [1, 1]} : vector<8x512xf32> to vector<8x128xf32>
    %117 = arith.negf %116 : vector<8x128xf32>
    %118 = math.exp %117 : vector<8x128xf32>
    %cst_33 = arith.constant 1.000000e+00 : f32
    %119 = vector.broadcast %cst_33 : f32 to vector<8x128xf32>
    %120 = arith.addf %119, %118 : vector<8x128xf32>
    %121 = arith.divf %119, %120 : vector<8x128xf32>
    %122 = vector.extract_strided_slice %115 {offsets = [0, 128], sizes = [8, 128], strides = [1, 1]} : vector<8x512xf32> to vector<8x128xf32>
    %123 = arith.negf %122 : vector<8x128xf32>
    %124 = math.exp %123 : vector<8x128xf32>
    %cst_34 = arith.constant 1.000000e+00 : f32
    %125 = vector.broadcast %cst_34 : f32 to vector<8x128xf32>
    %126 = arith.addf %125, %124 : vector<8x128xf32>
    %127 = arith.divf %125, %126 : vector<8x128xf32>
    %128 = vector.extract_strided_slice %115 {offsets = [0, 256], sizes = [8, 128], strides = [1, 1]} : vector<8x512xf32> to vector<8x128xf32>
    %129 = math.tanh %128 : vector<8x128xf32>
    %130 = vector.extract_strided_slice %115 {offsets = [0, 384], sizes = [8, 128], strides = [1, 1]} : vector<8x512xf32> to vector<8x128xf32>
    %131 = arith.negf %130 : vector<8x128xf32>
    %132 = math.exp %131 : vector<8x128xf32>
    %cst_35 = arith.constant 1.000000e+00 : f32
    %133 = vector.broadcast %cst_35 : f32 to vector<8x128xf32>
    %134 = arith.addf %133, %132 : vector<8x128xf32>
    %135 = arith.divf %133, %134 : vector<8x128xf32>
    %136 = arith.mulf %127, %103 : vector<8x128xf32>
    %137 = arith.mulf %121, %129 : vector<8x128xf32>
    %138 = arith.addf %136, %137 : vector<8x128xf32>
    %139 = math.tanh %138 : vector<8x128xf32>
    %140 = arith.mulf %135, %139 : vector<8x128xf32>
    %141 = arith.index_cast %c3_i32 : i32 to index
    %c0_36 = arith.constant 0 : index
    %c0_37 = arith.constant 0 : index
    %142 = vector.load %arg8[%141, %c0_36, %c0_37] : memref<8x8x128xf32, #tpu.memory_space<vmem>>, vector<1x8x128xf32>
    %143 = vector.shape_cast %142 : vector<1x8x128xf32> to vector<8x128xf32>
    %144 = vector.shape_cast %140 : vector<8x128xf32> to vector<1x8x128xf32>
    tpu.vector_store %arg8[%141, %c0_36, %c0_37], %144 {strides = array<i32>} : memref<8x8x128xf32, #tpu.memory_space<vmem>>, vector<1x8x128xf32>,
    %145 = arith.truncf %140 : vector<8x128xf32> to vector<8x128xbf16>
    %c4_i32 = arith.constant 4 : i32
    %cst_38 = arith.constant dense<0.000000e+00> : vector<8x512xf32>
    %146 = tpu.matmul %145, %3, %cst_38 {dimension_numbers = #tpu.dot_dimension_numbers<[1], [0], [0], [1], [0, 0, 1, 1], [], []>} : vector<8x128xbf16>, vector<128x512xbf16>, vector<8x512xf32> -> vector<8x512xf32>
    %147 = arith.index_cast %c4_i32 : i32 to index
    %c0_39 = arith.constant 0 : index
    %c0_40 = arith.constant 0 : index
    %148 = vector.load %arg1[%147, %c0_39, %c0_40] : memref<8x8x512xf32, #tpu.memory_space<vmem>>, vector<1x8x512xf32>
    %149 = vector.shape_cast %148 : vector<1x8x512xf32> to vector<8x512xf32>
    %150 = arith.addf %146, %149 : vector<8x512xf32>
    %151 = vector.extract_strided_slice %150 {offsets = [0, 0], sizes = [8, 128], strides = [1, 1]} : vector<8x512xf32> to vector<8x128xf32>
    %152 = arith.negf %151 : vector<8x128xf32>
    %153 = math.exp %152 : vector<8x128xf32>
    %cst_41 = arith.constant 1.000000e+00 : f32
    %154 = vector.broadcast %cst_41 : f32 to vector<8x128xf32>
    %155 = arith.addf %154, %153 : vector<8x128xf32>
    %156 = arith.divf %154, %155 : vector<8x128xf32>
    %157 = vector.extract_strided_slice %150 {offsets = [0, 128], sizes = [8, 128], strides = [1, 1]} : vector<8x512xf32> to vector<8x128xf32>
    %158 = arith.negf %157 : vector<8x128xf32>
    %159 = math.exp %158 : vector<8x128xf32>
    %cst_42 = arith.constant 1.000000e+00 : f32
    %160 = vector.broadcast %cst_42 : f32 to vector<8x128xf32>
    %161 = arith.addf %160, %159 : vector<8x128xf32>
    %162 = arith.divf %160, %161 : vector<8x128xf32>
    %163 = vector.extract_strided_slice %150 {offsets = [0, 256], sizes = [8, 128], strides = [1, 1]} : vector<8x512xf32> to vector<8x128xf32>
    %164 = math.tanh %163 : vector<8x128xf32>
    %165 = vector.extract_strided_slice %150 {offsets = [0, 384], sizes = [8, 128], strides = [1, 1]} : vector<8x512xf32> to vector<8x128xf32>
    %166 = arith.negf %165 : vector<8x128xf32>
    %167 = math.exp %166 : vector<8x128xf32>
    %cst_43 = arith.constant 1.000000e+00 : f32
    %168 = vector.broadcast %cst_43 : f32 to vector<8x128xf32>
    %169 = arith.addf %168, %167 : vector<8x128xf32>
    %170 = arith.divf %168, %169 : vector<8x128xf32>
    %171 = arith.mulf %162, %138 : vector<8x128xf32>
    %172 = arith.mulf %156, %164 : vector<8x128xf32>
    %173 = arith.addf %171, %172 : vector<8x128xf32>
    %174 = math.tanh %173 : vector<8x128xf32>
    %175 = arith.mulf %170, %174 : vector<8x128xf32>
    %176 = arith.index_cast %c4_i32 : i32 to index
    %c0_44 = arith.constant 0 : index
    %c0_45 = arith.constant 0 : index
    %177 = vector.load %arg8[%176, %c0_44, %c0_45] : memref<8x8x128xf32, #tpu.memory_space<vmem>>, vector<1x8x128xf32>
    %178 = vector.shape_cast %177 : vector<1x8x128xf32> to vector<8x128xf32>
    %179 = vector.shape_cast %175 : vector<8x128xf32> to vector<1x8x128xf32>
    tpu.vector_store %arg8[%176, %c0_44, %c0_45], %179 {strides = array<i32>} : memref<8x8x128xf32, #tpu.memory_space<vmem>>, vector<1x8x128xf32>,
    %180 = arith.truncf %175 : vector<8x128xf32> to vector<8x128xbf16>
    %c5_i32 = arith.constant 5 : i32
    %cst_46 = arith.constant dense<0.000000e+00> : vector<8x512xf32>
    %181 = tpu.matmul %180, %3, %cst_46 {dimension_numbers = #tpu.dot_dimension_numbers<[1], [0], [0], [1], [0, 0, 1, 1], [], []>} : vector<8x128xbf16>, vector<128x512xbf16>, vector<8x512xf32> -> vector<8x512xf32>
    %182 = arith.index_cast %c5_i32 : i32 to index
    %c0_47 = arith.constant 0 : index
    %c0_48 = arith.constant 0 : index
    %183 = vector.load %arg1[%182, %c0_47, %c0_48] : memref<8x8x512xf32, #tpu.memory_space<vmem>>, vector<1x8x512xf32>
    %184 = vector.shape_cast %183 : vector<1x8x512xf32> to vector<8x512xf32>
    %185 = arith.addf %181, %184 : vector<8x512xf32>
    %186 = vector.extract_strided_slice %185 {offsets = [0, 0], sizes = [8, 128], strides = [1, 1]} : vector<8x512xf32> to vector<8x128xf32>
    %187 = arith.negf %186 : vector<8x128xf32>
    %188 = math.exp %187 : vector<8x128xf32>
    %cst_49 = arith.constant 1.000000e+00 : f32
    %189 = vector.broadcast %cst_49 : f32 to vector<8x128xf32>
    %190 = arith.addf %189, %188 : vector<8x128xf32>
    %191 = arith.divf %189, %190 : vector<8x128xf32>
    %192 = vector.extract_strided_slice %185 {offsets = [0, 128], sizes = [8, 128], strides = [1, 1]} : vector<8x512xf32> to vector<8x128xf32>
    %193 = arith.negf %192 : vector<8x128xf32>
    %194 = math.exp %193 : vector<8x128xf32>
    %cst_50 = arith.constant 1.000000e+00 : f32
    %195 = vector.broadcast %cst_50 : f32 to vector<8x128xf32>
    %196 = arith.addf %195, %194 : vector<8x128xf32>
    %197 = arith.divf %195, %196 : vector<8x128xf32>
    %198 = vector.extract_strided_slice %185 {offsets = [0, 256], sizes = [8, 128], strides = [1, 1]} : vector<8x512xf32> to vector<8x128xf32>
    %199 = math.tanh %198 : vector<8x128xf32>
    %200 = vector.extract_strided_slice %185 {offsets = [0, 384], sizes = [8, 128], strides = [1, 1]} : vector<8x512xf32> to vector<8x128xf32>
    %201 = arith.negf %200 : vector<8x128xf32>
    %202 = math.exp %201 : vector<8x128xf32>
    %cst_51 = arith.constant 1.000000e+00 : f32
    %203 = vector.broadcast %cst_51 : f32 to vector<8x128xf32>
    %204 = arith.addf %203, %202 : vector<8x128xf32>
    %205 = arith.divf %203, %204 : vector<8x128xf32>
    %206 = arith.mulf %197, %173 : vector<8x128xf32>
    %207 = arith.mulf %191, %199 : vector<8x128xf32>
    %208 = arith.addf %206, %207 : vector<8x128xf32>
    %209 = math.tanh %208 : vector<8x128xf32>
    %210 = arith.mulf %205, %209 : vector<8x128xf32>
    %211 = arith.index_cast %c5_i32 : i32 to index
    %c0_52 = arith.constant 0 : index
    %c0_53 = arith.constant 0 : index
    %212 = vector.load %arg8[%211, %c0_52, %c0_53] : memref<8x8x128xf32, #tpu.memory_space<vmem>>, vector<1x8x128xf32>
    %213 = vector.shape_cast %212 : vector<1x8x128xf32> to vector<8x128xf32>
    %214 = vector.shape_cast %210 : vector<8x128xf32> to vector<1x8x128xf32>
    tpu.vector_store %arg8[%211, %c0_52, %c0_53], %214 {strides = array<i32>} : memref<8x8x128xf32, #tpu.memory_space<vmem>>, vector<1x8x128xf32>,
    %215 = arith.truncf %210 : vector<8x128xf32> to vector<8x128xbf16>
    %c6_i32 = arith.constant 6 : i32
    %cst_54 = arith.constant dense<0.000000e+00> : vector<8x512xf32>
    %216 = tpu.matmul %215, %3, %cst_54 {dimension_numbers = #tpu.dot_dimension_numbers<[1], [0], [0], [1], [0, 0, 1, 1], [], []>} : vector<8x128xbf16>, vector<128x512xbf16>, vector<8x512xf32> -> vector<8x512xf32>
    %217 = arith.index_cast %c6_i32 : i32 to index
    %c0_55 = arith.constant 0 : index
    %c0_56 = arith.constant 0 : index
    %218 = vector.load %arg1[%217, %c0_55, %c0_56] : memref<8x8x512xf32, #tpu.memory_space<vmem>>, vector<1x8x512xf32>
    %219 = vector.shape_cast %218 : vector<1x8x512xf32> to vector<8x512xf32>
    %220 = arith.addf %216, %219 : vector<8x512xf32>
    %221 = vector.extract_strided_slice %220 {offsets = [0, 0], sizes = [8, 128], strides = [1, 1]} : vector<8x512xf32> to vector<8x128xf32>
    %222 = arith.negf %221 : vector<8x128xf32>
    %223 = math.exp %222 : vector<8x128xf32>
    %cst_57 = arith.constant 1.000000e+00 : f32
    %224 = vector.broadcast %cst_57 : f32 to vector<8x128xf32>
    %225 = arith.addf %224, %223 : vector<8x128xf32>
    %226 = arith.divf %224, %225 : vector<8x128xf32>
    %227 = vector.extract_strided_slice %220 {offsets = [0, 128], sizes = [8, 128], strides = [1, 1]} : vector<8x512xf32> to vector<8x128xf32>
    %228 = arith.negf %227 : vector<8x128xf32>
    %229 = math.exp %228 : vector<8x128xf32>
    %cst_58 = arith.constant 1.000000e+00 : f32
    %230 = vector.broadcast %cst_58 : f32 to vector<8x128xf32>
    %231 = arith.addf %230, %229 : vector<8x128xf32>
    %232 = arith.divf %230, %231 : vector<8x128xf32>
    %233 = vector.extract_strided_slice %220 {offsets = [0, 256], sizes = [8, 128], strides = [1, 1]} : vector<8x512xf32> to vector<8x128xf32>
    %234 = math.tanh %233 : vector<8x128xf32>
    %235 = vector.extract_strided_slice %220 {offsets = [0, 384], sizes = [8, 128], strides = [1, 1]} : vector<8x512xf32> to vector<8x128xf32>
    %236 = arith.negf %235 : vector<8x128xf32>
    %237 = math.exp %236 : vector<8x128xf32>
    %cst_59 = arith.constant 1.000000e+00 : f32
    %238 = vector.broadcast %cst_59 : f32 to vector<8x128xf32>
    %239 = arith.addf %238, %237 : vector<8x128xf32>
    %240 = arith.divf %238, %239 : vector<8x128xf32>
    %241 = arith.mulf %232, %208 : vector<8x128xf32>
    %242 = arith.mulf %226, %234 : vector<8x128xf32>
    %243 = arith.addf %241, %242 : vector<8x128xf32>
    %244 = math.tanh %243 : vector<8x128xf32>
    %245 = arith.mulf %240, %244 : vector<8x128xf32>
    %246 = arith.index_cast %c6_i32 : i32 to index
    %c0_60 = arith.constant 0 : index
    %c0_61 = arith.constant 0 : index
    %247 = vector.load %arg8[%246, %c0_60, %c0_61] : memref<8x8x128xf32, #tpu.memory_space<vmem>>, vector<1x8x128xf32>
    %248 = vector.shape_cast %247 : vector<1x8x128xf32> to vector<8x128xf32>
    %249 = vector.shape_cast %245 : vector<8x128xf32> to vector<1x8x128xf32>
    tpu.vector_store %arg8[%246, %c0_60, %c0_61], %249 {strides = array<i32>} : memref<8x8x128xf32, #tpu.memory_space<vmem>>, vector<1x8x128xf32>,
    %250 = arith.truncf %245 : vector<8x128xf32> to vector<8x128xbf16>
    %c7_i32 = arith.constant 7 : i32
    %cst_62 = arith.constant dense<0.000000e+00> : vector<8x512xf32>
    %251 = tpu.matmul %250, %3, %cst_62 {dimension_numbers = #tpu.dot_dimension_numbers<[1], [0], [0], [1], [0, 0, 1, 1], [], []>} : vector<8x128xbf16>, vector<128x512xbf16>, vector<8x512xf32> -> vector<8x512xf32>
    %252 = arith.index_cast %c7_i32 : i32 to index
    %c0_63 = arith.constant 0 : index
    %c0_64 = arith.constant 0 : index
    %253 = vector.load %arg1[%252, %c0_63, %c0_64] : memref<8x8x512xf32, #tpu.memory_space<vmem>>, vector<1x8x512xf32>
    %254 = vector.shape_cast %253 : vector<1x8x512xf32> to vector<8x512xf32>
    %255 = arith.addf %251, %254 : vector<8x512xf32>
    %256 = vector.extract_strided_slice %255 {offsets = [0, 0], sizes = [8, 128], strides = [1, 1]} : vector<8x512xf32> to vector<8x128xf32>
    %257 = arith.negf %256 : vector<8x128xf32>
    %258 = math.exp %257 : vector<8x128xf32>
    %cst_65 = arith.constant 1.000000e+00 : f32
    %259 = vector.broadcast %cst_65 : f32 to vector<8x128xf32>
    %260 = arith.addf %259, %258 : vector<8x128xf32>
    %261 = arith.divf %259, %260 : vector<8x128xf32>
    %262 = vector.extract_strided_slice %255 {offsets = [0, 128], sizes = [8, 128], strides = [1, 1]} : vector<8x512xf32> to vector<8x128xf32>
    %263 = arith.negf %262 : vector<8x128xf32>
    %264 = math.exp %263 : vector<8x128xf32>
    %cst_66 = arith.constant 1.000000e+00 : f32
    %265 = vector.broadcast %cst_66 : f32 to vector<8x128xf32>
    %266 = arith.addf %265, %264 : vector<8x128xf32>
    %267 = arith.divf %265, %266 : vector<8x128xf32>
    %268 = vector.extract_strided_slice %255 {offsets = [0, 256], sizes = [8, 128], strides = [1, 1]} : vector<8x512xf32> to vector<8x128xf32>
    %269 = math.tanh %268 : vector<8x128xf32>
    %270 = vector.extract_strided_slice %255 {offsets = [0, 384], sizes = [8, 128], strides = [1, 1]} : vector<8x512xf32> to vector<8x128xf32>
    %271 = arith.negf %270 : vector<8x128xf32>
    %272 = math.exp %271 : vector<8x128xf32>
    %cst_67 = arith.constant 1.000000e+00 : f32
    %273 = vector.broadcast %cst_67 : f32 to vector<8x128xf32>
    %274 = arith.addf %273, %272 : vector<8x128xf32>
    %275 = arith.divf %273, %274 : vector<8x128xf32>
    %276 = arith.mulf %267, %243 : vector<8x128xf32>
    %277 = arith.mulf %261, %269 : vector<8x128xf32>
    %278 = arith.addf %276, %277 : vector<8x128xf32>
    %279 = math.tanh %278 : vector<8x128xf32>
    %280 = arith.mulf %275, %279 : vector<8x128xf32>
    %281 = arith.index_cast %c7_i32 : i32 to index
    %c0_68 = arith.constant 0 : index
    %c0_69 = arith.constant 0 : index
    %282 = vector.load %arg8[%281, %c0_68, %c0_69] : memref<8x8x128xf32, #tpu.memory_space<vmem>>, vector<1x8x128xf32>
    %283 = vector.shape_cast %282 : vector<1x8x128xf32> to vector<8x128xf32>
    %284 = vector.shape_cast %280 : vector<8x128xf32> to vector<1x8x128xf32>
    tpu.vector_store %arg8[%281, %c0_68, %c0_69], %284 {strides = array<i32>} : memref<8x8x128xf32, #tpu.memory_space<vmem>>, vector<1x8x128xf32>,
    %285 = arith.truncf %280 : vector<8x128xf32> to vector<8x128xbf16>
    %c8_i32 = arith.constant 8 : i32
    %c0_70 = arith.constant 0 : index
    %c0_71 = arith.constant 0 : index
    %286 = vector.load %arg6[%c0_70, %c0_71] : memref<8x128xbf16, #tpu.memory_space<vmem>>, vector<8x128xbf16>
    tpu.vector_store %arg6[%c0_70, %c0_71], %285 {strides = array<i32>} : memref<8x128xbf16, #tpu.memory_space<vmem>>, vector<8x128xbf16>,
    %c0_72 = arith.constant 0 : index
    %c0_73 = arith.constant 0 : index
    %287 = vector.load %arg7[%c0_72, %c0_73] : memref<8x128xf32, #tpu.memory_space<vmem>>, vector<8x128xf32>
    tpu.vector_store %arg7[%c0_72, %c0_73], %278 {strides = array<i32>} : memref<8x128xf32, #tpu.memory_space<vmem>>, vector<8x128xf32>,
    %c0_74 = arith.constant 0 : index
    %c0_75 = arith.constant 0 : index
    %c0_76 = arith.constant 0 : index
    %288 = vector.load %arg8[%c0_74, %c0_75, %c0_76] : memref<8x8x128xf32, #tpu.memory_space<vmem>>, vector<8x8x128xf32>
    %289 = arith.truncf %288 : vector<8x8x128xf32> to vector<8x8x128xbf16>
    %c0_77 = arith.constant 0 : index
    %c0_78 = arith.constant 0 : index
    %c0_79 = arith.constant 0 : index
    %290 = vector.load %arg5[%c0_77, %c0_78, %c0_79] : memref<8x8x128xbf16, #tpu.memory_space<vmem>>, vector<8x8x128xbf16>
    tpu.vector_store %arg5[%c0_77, %c0_78, %c0_79], %289 {strides = array<i32>} : memref<8x8x128xbf16, #tpu.memory_space<vmem>>, vector<8x8x128xbf16>,
    return
  }
  func.func @transform_0(%arg0: i32) -> (i32, i32, i32) {
    %c0_i32 = arith.constant 0 : i32
    %c0_i32_0 = arith.constant 0 : i32
    %c0_i32_1 = arith.constant 0 : i32
    return %arg0, %c0_i32, %c0_i32_0 : i32, i32, i32
  }
  func.func @transform_1(%arg0: i32) -> (i32, i32) {
    %c0_i32 = arith.constant 0 : i32
    %c0_i32_0 = arith.constant 0 : i32
    %c0_i32_1 = arith.constant 0 : i32
    return %c0_i32, %c0_i32_0 : i32, i32
  }
  func.func @transform_2(%arg0: i32) -> (i32, i32) {
    %c0_i32 = arith.constant 0 : i32
    %c0_i32_0 = arith.constant 0 : i32
    %c0_i32_1 = arith.constant 0 : i32
    return %c0_i32, %c0_i32_0 : i32, i32
  }
  func.func @transform_3(%arg0: i32) -> (i32, i32) {
    %c0_i32 = arith.constant 0 : i32
    %c0_i32_0 = arith.constant 0 : i32
    %c0_i32_1 = arith.constant 0 : i32
    return %c0_i32, %c0_i32_0 : i32, i32
  }
  func.func @transform_4(%arg0: i32) -> (i32, i32, i32) {
    %c0_i32 = arith.constant 0 : i32
    %c0_i32_0 = arith.constant 0 : i32
    %c0_i32_1 = arith.constant 0 : i32
    return %arg0, %c0_i32, %c0_i32_0 : i32, i32, i32
  }
}

module attributes {stable_mosaic.version = 11 : i64} {
  func.func @_proj_logsoftmax_kernel(%arg0: i32, %arg1: memref<8x8x128xbf16, #tpu.memory_space<vmem>>, %arg2: memref<128x256xbf16, #tpu.memory_space<vmem>>, %arg3: memref<1x256xf32, #tpu.memory_space<vmem>>, %arg4: memref<8x8x256xf32, #tpu.memory_space<vmem>>) attributes {dimension_semantics = [#tpu.dimension_semantics<parallel>], iteration_bounds = array<i64: 1>, scalar_prefetch = 0 : i64, scratch_operands = 0 : i64, tpu.core_type = #tpu.core_type<tc>, window_params = [{transform_indices = @transform_0, window_bounds = array<i64: 8, 8, 128>}, {pipeline_mode = #tpu.pipeline_mode<synchronous>, transform_indices = @transform_1, window_bounds = array<i64: 128, 256>}, {pipeline_mode = #tpu.pipeline_mode<synchronous>, transform_indices = @transform_2, window_bounds = array<i64: 1, 256>}, {transform_indices = @transform_3, window_bounds = array<i64: 8, 8, 256>}]} {
    %c0 = arith.constant 0 : index
    %c0_0 = arith.constant 0 : index
    %c0_1 = arith.constant 0 : index
    %0 = vector.load %arg1[%c0, %c0_0, %c0_1] : memref<8x8x128xbf16, #tpu.memory_space<vmem>>, vector<8x8x128xbf16>
    %1 = vector.shape_cast %0 : vector<8x8x128xbf16> to vector<64x128xbf16>
    %c0_2 = arith.constant 0 : index
    %c0_3 = arith.constant 0 : index
    %2 = vector.load %arg2[%c0_2, %c0_3] : memref<128x256xbf16, #tpu.memory_space<vmem>>, vector<128x256xbf16>
    %cst = arith.constant dense<0.000000e+00> : vector<64x256xf32>
    %3 = tpu.matmul %1, %2, %cst {dimension_numbers = #tpu.dot_dimension_numbers<[1], [0], [0], [1], [0, 0, 1, 1], [], []>} : vector<64x128xbf16>, vector<128x256xbf16>, vector<64x256xf32> -> vector<64x256xf32>
    %c0_4 = arith.constant 0 : index
    %c0_5 = arith.constant 0 : index
    %4 = vector.load %arg3[%c0_4, %c0_5] : memref<1x256xf32, #tpu.memory_space<vmem>>, vector<1x256xf32>
    %5 = vector.broadcast %4 : vector<1x256xf32> to vector<64x256xf32>
    %6 = arith.addf %3, %5 : vector<64x256xf32>
    %cst_6 = arith.constant dense<0xFF800000> : vector<64xf32>
    %7 = vector.multi_reduction <maximumf>, %6, %cst_6 [1] : vector<64x256xf32> to vector<64xf32>
    %8 = vector.shape_cast %7 : vector<64xf32> to vector<64x1xf32>
    %9 = vector.broadcast %8 : vector<64x1xf32> to vector<64x256xf32>
    %10 = arith.subf %6, %9 : vector<64x256xf32>
    %11 = math.exp %10 : vector<64x256xf32>
    %cst_7 = arith.constant dense<0.000000e+00> : vector<64xf32>
    %12 = vector.multi_reduction <add>, %11, %cst_7 [1] : vector<64x256xf32> to vector<64xf32>
    %13 = vector.shape_cast %12 : vector<64xf32> to vector<64x1xf32>
    %14 = math.log %13 : vector<64x1xf32>
    %15 = arith.addf %14, %8 : vector<64x1xf32>
    %16 = vector.broadcast %15 : vector<64x1xf32> to vector<64x256xf32>
    %17 = arith.subf %6, %16 : vector<64x256xf32>
    %18 = vector.shape_cast %17 : vector<64x256xf32> to vector<8x8x256xf32>
    %c0_8 = arith.constant 0 : index
    %c0_9 = arith.constant 0 : index
    %c0_10 = arith.constant 0 : index
    %19 = vector.load %arg4[%c0_8, %c0_9, %c0_10] : memref<8x8x256xf32, #tpu.memory_space<vmem>>, vector<8x8x256xf32>
    tpu.vector_store %arg4[%c0_8, %c0_9, %c0_10], %18 {strides = array<i32>} : memref<8x8x256xf32, #tpu.memory_space<vmem>>, vector<8x8x256xf32>,
    return
  }
  func.func @transform_0(%arg0: i32) -> (i32, i32, i32) {
    %c0_i32 = arith.constant 0 : i32
    %c0_i32_0 = arith.constant 0 : i32
    %c0_i32_1 = arith.constant 0 : i32
    return %c0_i32, %arg0, %c0_i32_0 : i32, i32, i32
  }
  func.func @transform_1(%arg0: i32) -> (i32, i32) {
    %c0_i32 = arith.constant 0 : i32
    %c0_i32_0 = arith.constant 0 : i32
    %c0_i32_1 = arith.constant 0 : i32
    return %c0_i32, %c0_i32_0 : i32, i32
  }
  func.func @transform_2(%arg0: i32) -> (i32, i32) {
    %c0_i32 = arith.constant 0 : i32
    %c0_i32_0 = arith.constant 0 : i32
    %c0_i32_1 = arith.constant 0 : i32
    return %c0_i32, %c0_i32_0 : i32, i32
  }
  func.func @transform_3(%arg0: i32) -> (i32, i32, i32) {
    %c0_i32 = arith.constant 0 : i32
    %c0_i32_0 = arith.constant 0 : i32
    %c0_i32_1 = arith.constant 0 : i32
    return %c0_i32, %arg0, %c0_i32_0 : i32, i32, i32
  }
}

</mosaic_0001>

<bundles_post_ra>
// kernel: actor_forward.3
= control target key start
LH: loop header
LB: loop body
LE: loop exit
PB: predicated region body
PF: predicated region fallthrough
CT: control target
= control target key end

     0   :  { %s943_s1 = inlined_call_operand.vmem [shape: bf16[128,512], index: 1, kind: input, shape index: {}]   ;;  %s944_s0 = inlined_call_operand.vmem [shape: bf16[8,8,128], index: 0, kind: input, shape index: {}]   ;;  %s945_s2 = inlined_call_operand.vmem [shape: f32[1,512], index: 2, kind: input, shape index: {}]   ;;  %s946_s3 = inlined_call_operand.vmem [shape: f32[8,8,512], index: 3, kind: output, shape index: {}]  }
   0x1   :  { %v530_v0 = vld [vmem:[%s943_s1 + $0xe0] sm:$0xf]  ;;  %v578_v1 = vld [vmem:[%s943_s1 + $0xec] sm:$0xf0]  ;;  %v576_v2 = vld [vmem:[%s943_s1 + $0xe4] sm:$0xf] }
   0x2   :  { %v531_v3 = vor.u32 %v578_v1, %v530_v0  ;;  %v532_v4 = vld [vmem:[%s943_s1 + $0xf0] sm:$0xf0]  ;;  %v538_v5 = vld [vmem:[%s943_s1 + $0xe8] sm:$0xf]  ;;  %v579_v6 = vld [vmem:[%s943_s1 + $0xf4] sm:$0xf0] }
   0x3   :  { %v535_v7 = vor.u32 %v576_v2, %v532_v4  ;;  %v539_v8 = vor.u32 %v579_v6, %v538_v5  ;;  %v577_v9 = vld [vmem:[%s943_s1 + $0xec] sm:$0xf]  ;;  %v540_v10 = vld [vmem:[%s943_s1 + $0xf8] sm:$0xf0]  ;;  %v514_v11 = vld [vmem:[%s943_s1 + $0xc0] sm:$0xf] }
   0x4   :  { %248 = vmatpush.bf16.msra.mxu0 %v531_v3  ;;  %v543_v12 = vor.u32 %v577_v9, %v540_v10  ;;  %v574_v13 = vld [vmem:[%s943_s1 + $0xcc] sm:$0xf0]  ;;  %v572_v14 = vld [vmem:[%s943_s1 + $0xc4] sm:$0xf]  ;;  %v516_v15 = vld [vmem:[%s943_s1 + $0xd0] sm:$0xf0] }
   0x5   :  { %277 = vmatpush.bf16.msra.mxu1 %v535_v7  ;;  %306 = vmatpush.bf16.msra.mxu2 %v539_v8  ;;  %v515_v16 = vor.u32 %v574_v13, %v514_v11  ;;  %v519_v17 = vor.u32 %v572_v14, %v516_v15  ;;  %v522_v18 = vld [vmem:[%s943_s1 + $0xc8] sm:$0xf]  ;;  %v575_v19 = vld [vmem:[%s943_s1 + $0xd4] sm:$0xf0]  ;;  %v573_v20 = vld [vmem:[%s943_s1 + $0xcc] sm:$0xf] }
   0x6   :  { %335 = vmatpush.bf16.msra.mxu3 %v543_v12  ;;  %v523_v21 = vor.u32 %v575_v19, %v522_v18  ;;  %v524_v22 = vld [vmem:[%s943_s1 + $0xd8] sm:$0xf0]  ;;  %v498_v23 = vld [vmem:[%s943_s1 + $0xa0] sm:$0xf]  ;;  %v570_v24 = vld [vmem:[%s943_s1 + $0xac] sm:$0xf0] }
   0x7   :  { %v527_v25 = vor.u32 %v573_v20, %v524_v22  ;;  %v568_v26 = vld [vmem:[%s943_s1 + $0xa4] sm:$0xf]  ;;  %v500_v27 = vld [vmem:[%s943_s1 + $0xb0] sm:$0xf0]  ;;  %v506_v28 = vld [vmem:[%s943_s1 + $0xa8] sm:$0xf]  ;;  %v499_v29 = vor.u32 %v570_v24, %v498_v23 }
   0x8   :  { %249 = vmatpush.bf16.msra.mxu0 %v515_v16  ;;  %v571_v30 = vld [vmem:[%s943_s1 + $0xb4] sm:$0xf0]  ;;  %v569_v31 = vld [vmem:[%s943_s1 + $0xac] sm:$0xf]  ;;  %v508_v32 = vld [vmem:[%s943_s1 + $0xb8] sm:$0xf0]  ;;  %v503_v33 = vor.u32 %v568_v26, %v500_v27 }
   0x9   :  { %278 = vmatpush.bf16.msra.mxu1 %v519_v17  ;;  %307 = vmatpush.bf16.msra.mxu2 %v523_v21  ;;  %v507_v34 = vor.u32 %v571_v30, %v506_v28  ;;  %v482_v35 = vld [vmem:[%s943_s1 + $0x80] sm:$0xf]  ;;  %v566_v36 = vld [vmem:[%s943_s1 + $0x8c] sm:$0xf0]  ;;  %v564_v37 = vld [vmem:[%s943_s1 + $0x84] sm:$0xf]  ;;  %v511_v38 = vor.u32 %v569_v31, %v508_v32 }
   0xa   :  { %336 = vmatpush.bf16.msra.mxu3 %v527_v25  ;;  %v484_v39 = vld [vmem:[%s943_s1 + $0x90] sm:$0xf0]  ;;  %v490_v40 = vld [vmem:[%s943_s1 + $0x88] sm:$0xf]  ;;  %v567_v41 = vld [vmem:[%s943_s1 + $0x94] sm:$0xf0]  ;;  %v483_v44 = vor.u32 %v566_v36, %v482_v35 }
   0xb   :  { %v565_v42 = vld [vmem:[%s943_s1 + $0x8c] sm:$0xf]  ;;  %v492_v43 = vld [vmem:[%s943_s1 + $0x98] sm:$0xf0]  ;;  %v487_v45 = vor.u32 %v564_v37, %v484_v39  ;;  %v491_v46 = vor.u32 %v567_v41, %v490_v40  ;;  %v466_v47 = vld [vmem:[%s943_s1 + $0x60] sm:$0xf] }
   0xc   :  { %250 = vmatpush.bf16.msra.mxu0 %v499_v29  ;;  %v562_v48 = vld [vmem:[%s943_s1 + $0x6c] sm:$0xf0]  ;;  %v560_v49 = vld [vmem:[%s943_s1 + $0x64] sm:$0xf]  ;;  %v495_v50 = vor.u32 %v565_v42, %v492_v43  ;;  %v468_v51 = vld [vmem:[%s943_s1 + $0x70] sm:$0xf0] }
   0xd   :  { %279 = vmatpush.bf16.msra.mxu1 %v503_v33  ;;  %308 = vmatpush.bf16.msra.mxu2 %v507_v34  ;;  %v474_v52 = vld [vmem:[%s943_s1 + $0x68] sm:$0xf]  ;;  %v563_v53 = vld [vmem:[%s943_s1 + $0x74] sm:$0xf0]  ;;  %v561_v54 = vld [vmem:[%s943_s1 + $0x6c] sm:$0xf]  ;;  %v467_v56 = vor.u32 %v562_v48, %v466_v47  ;;  %v471_v57 = vor.u32 %v560_v49, %v468_v51 }
   0xe   :  { %337 = vmatpush.bf16.msra.mxu3 %v511_v38  ;;  %v476_v55 = vld [vmem:[%s943_s1 + $0x78] sm:$0xf0]  ;;  %v475_v58 = vor.u32 %v563_v53, %v474_v52  ;;  %v450_v59 = vld [vmem:[%s943_s1 + $0x40] sm:$0xf]  ;;  %v558_v60 = vld [vmem:[%s943_s1 + $0x4c] sm:$0xf0] }
   0xf   :  { %v556_v61 = vld [vmem:[%s943_s1 + $0x44] sm:$0xf]  ;;  %v479_v62 = vor.u32 %v561_v54, %v476_v55  ;;  %v452_v63 = vld [vmem:[%s943_s1 + $0x50] sm:$0xf0]  ;;  %v458_v0 = vld [vmem:[%s943_s1 + $0x48] sm:$0xf]  ;;  %v451_v4 = vor.u32 %v558_v60, %v450_v59 }
  0x10   :  { %251 = vmatpush.bf16.msra.mxu0 %v483_v44  ;;  %v559_v1 = vld [vmem:[%s943_s1 + $0x54] sm:$0xf0]  ;;  %v557_v2 = vld [vmem:[%s943_s1 + $0x4c] sm:$0xf]  ;;  %v460_v3 = vld [vmem:[%s943_s1 + $0x58] sm:$0xf0]  ;;  %v455_v5 = vor.u32 %v556_v61, %v452_v63 }
  0x11   :  { %280 = vmatpush.bf16.msra.mxu1 %v487_v45  ;;  %309 = vmatpush.bf16.msra.mxu2 %v491_v46  ;;  %v459_v6 = vor.u32 %v559_v1, %v458_v0  ;;  %v434_v7 = vld [vmem:[%s943_s1 + $0x20] sm:$0xf]  ;;  %v554_v8 = vld [vmem:[%s943_s1 + $0x2c] sm:$0xf0]  ;;  %v552_v9 = vld [vmem:[%s943_s1 + $0x24] sm:$0xf]  ;;  %v463_v10 = vor.u32 %v557_v2, %v460_v3 }
  0x12   :  { %338 = vmatpush.bf16.msra.mxu3 %v495_v50  ;;  %v436_v11 = vld [vmem:[%s943_s1 + $0x30] sm:$0xf0]  ;;  %v442_v12 = vld [vmem:[%s943_s1 + $0x28] sm:$0xf]  ;;  %v555_v13 = vld [vmem:[%s943_s1 + $0x34] sm:$0xf0]  ;;  %v435_v16 = vor.u32 %v554_v8, %v434_v7 }
  0x13   :  { %v553_v14 = vld [vmem:[%s943_s1 + $0x2c] sm:$0xf]  ;;  %v444_v15 = vld [vmem:[%s943_s1 + $0x38] sm:$0xf0]  ;;  %v439_v17 = vor.u32 %v552_v9, %v436_v11  ;;  %v443_v18 = vor.u32 %v555_v13, %v442_v12  ;;  %v418_v19 = vld [vmem:[%s943_s1] sm:$0xf] }
  0x14   :  { %252 = vmatpush.bf16.msra.mxu0 %v467_v56  ;;  %v550_v20 = vld [vmem:[%s943_s1 + $0xc] sm:$0xf0]  ;;  %v548_v21 = vld [vmem:[%s943_s1 + $0x4] sm:$0xf]  ;;  %v447_v22 = vor.u32 %v553_v14, %v444_v15  ;;  %v420_v23 = vld [vmem:[%s943_s1 + $0x10] sm:$0xf0] }
  0x15   :  { %281 = vmatpush.bf16.msra.mxu1 %v471_v57  ;;  %310 = vmatpush.bf16.msra.mxu2 %v475_v58  ;;  %v426_v24 = vld [vmem:[%s943_s1 + $0x8] sm:$0xf]  ;;  %v551_v25 = vld [vmem:[%s943_s1 + $0x14] sm:$0xf0]  ;;  %v549_v26 = vld [vmem:[%s943_s1 + $0xc] sm:$0xf]  ;;  %v419_v28 = vor.u32 %v550_v20, %v418_v19  ;;  %v423_v29 = vor.u32 %v548_v21, %v420_v23 }
  0x16   :  { %339 = vmatpush.bf16.msra.mxu3 %v479_v62  ;;  %v428_v27 = vld [vmem:[%s943_s1 + $0x18] sm:$0xf0]  ;;  %v427_v30 = vor.u32 %v551_v25, %v426_v24  ;;  %v544_v32 = vld [vmem:[%s944_s0] sm:$0xff]  ;;  %v545_v33 = vld [vmem:[%s944_s0 + $0x8] sm:$0xff] }
  0x17   :  { %v431_v31 = vor.u32 %v549_v26, %v428_v27  ;;  %v546_v34 = vld [vmem:[%s944_s0 + $0x10] sm:$0xff]  ;;  %v547_v35 = vld [vmem:[%s944_s0 + $0x18] sm:$0xff]  ;;  %v54_v36 = vld [vmem:[%s945_s2] sm:$0xf] }
  0x18   :  { %253 = vmatpush.bf16.msra.mxu0 %v451_v4  ;;  %v807_v37 = vperm.slane %v54_v36, 0  ;;  %v809_v38 = vperm.slane %v54_v36, 1  ;;  %v819_v43 = vperm.slane %v54_v36, 2  ;;  %v821_v44 = vperm.slane %v54_v36, 3 }
  0x19   :  { %282 = vmatpush.bf16.msra.mxu1 %v455_v5  ;;  %311 = vmatpush.bf16.msra.mxu2 %v459_v6 }
  0x1a   :  { %340 = vmatpush.bf16.msra.mxu3 %v463_v10 }
  0x1c   :  { %254 = vmatpush.bf16.msra.mxu0 %v435_v16 }
  0x1d   :  { %283 = vmatpush.bf16.msra.mxu1 %v439_v17  ;;  %312 = vmatpush.bf16.msra.mxu2 %v443_v18 }
  0x1e   :  { %341 = vmatpush.bf16.msra.mxu3 %v447_v22 }
  0x20   :  { %255 = vmatpush.bf16.msra.mxu0 %v419_v28 }
  0x21   :  { %284 = vmatpush.bf16.msra.mxu1 %v423_v29  ;;  %313 = vmatpush.bf16.msra.mxu2 %v427_v30 }
  0x22   :  { %342 = vmatpush.bf16.msra.mxu3 %v431_v31 }
  0x23   :  { %256 = vmatmul.bf16.vlgmr.msra.gmra.mxu0 %v544_v32 }
  0x24   :  { %285 = vmatmul.bf16.vlgmr.msra.gmra.mxu1 %v544_v32  ;;  %314 = vmatmul.bf16.vlgmr.msra.gmra.mxu2 %v544_v32 }
  0x25   :  { %343 = vmatmul.bf16.vlgmr.msra.gmra.mxu3 %v544_v32 }
  0x33   :  { %261 = vmatmul.bf16.gmra.mxu0 %v545_v33 }
  0x34   :  { %290 = vmatmul.bf16.gmra.mxu1 %v545_v33  ;;  %319 = vmatmul.bf16.gmra.mxu2 %v545_v33 }
  0x35   :  { %348 = vmatmul.bf16.gmra.mxu3 %v545_v33 }
  0x43   :  { %266 = vmatmul.bf16.gmra.mxu0 %v546_v34 }
  0x44   :  { %295 = vmatmul.bf16.gmra.mxu1 %v546_v34  ;;  %324 = vmatmul.bf16.gmra.mxu2 %v546_v34 }
  0x45   :  { %353 = vmatmul.bf16.gmra.mxu3 %v546_v34 }
  0x53   :  { %271 = vmatmul.bf16.gmra.mxu0 %v547_v35 }
  0x54   :  { %300 = vmatmul.bf16.gmra.mxu1 %v547_v35  ;;  %329 = vmatmul.bf16.gmra.mxu2 %v547_v35 }
  0x55   :  { %358 = vmatmul.bf16.gmra.mxu3 %v547_v35 }
  0xa0   :  { %v257_v39 = vpop.f32.mrf.mxu0 }
  0xa1   :  { %v258_v40 = vadd.f32 %v257_v39, %v807_v37  ;;  %v286_v41 = vpop.f32.mrf.mxu1 }
  0xa2   :  { %v287_v42 = vadd.f32 %v286_v41, %v809_v38 }
  0xa3   :  { %364 = vst [vmem:[%s946_s3] sm:$0xff] %v258_v40 }
  0xa4   :  { %365 = vst [vmem:[%s946_s3 + $0x8] sm:$0xff] %v287_v42 }
  0xa7   :  { %v315_v45 = vpop.f32.mrf.mxu2 }
  0xa8   :  { %v316_v46 = vadd.f32 %v315_v45, %v819_v43  ;;  %v344_v47 = vpop.f32.mrf.mxu3  ;;  %v259_v48 = vpop.f32.mrf.mxu0 }
  0xa9   :  { %v345_v49 = vadd.f32 %v344_v47, %v821_v44  ;;  %v260_v50 = vadd.f32 %v259_v48, %v807_v37  ;;  %v288_v51 = vpop.f32.mrf.mxu1 }
  0xaa   :  { %366 = vst [vmem:[%s946_s3 + $0x10] sm:$0xff] %v316_v46  ;;  %v289_v52 = vadd.f32 %v288_v51, %v809_v38 }
  0xab   :  { %367 = vst [vmem:[%s946_s3 + $0x18] sm:$0xff] %v345_v49 }
  0xac   :  { %368 = vst [vmem:[%s946_s3 + $0x20] sm:$0xff] %v260_v50 }
  0xad   :  { %369 = vst [vmem:[%s946_s3 + $0x28] sm:$0xff] %v289_v52 }
  0xaf   :  { %v317_v53 = vpop.f32.mrf.mxu2 }
  0xb0   :  { %v318_v54 = vadd.f32 %v317_v53, %v819_v43  ;;  %v346_v55 = vpop.f32.mrf.mxu3  ;;  %v262_v56 = vpop.f32.mrf.mxu0 }
  0xb1   :  { %v347_v57 = vadd.f32 %v346_v55, %v821_v44  ;;  %v263_v58 = vadd.f32 %v262_v56, %v807_v37  ;;  %v291_v59 = vpop.f32.mrf.mxu1 }
  0xb2   :  { %370 = vst [vmem:[%s946_s3 + $0x30] sm:$0xff] %v318_v54  ;;  %v292_v60 = vadd.f32 %v291_v59, %v809_v38 }
  0xb3   :  { %371 = vst [vmem:[%s946_s3 + $0x38] sm:$0xff] %v347_v57 }
  0xb4   :  { %372 = vst [vmem:[%s946_s3 + $0x40] sm:$0xff] %v263_v58 }
  0xb5   :  { %373 = vst [vmem:[%s946_s3 + $0x48] sm:$0xff] %v292_v60 }
  0xb7   :  { %v320_v61 = vpop.f32.mrf.mxu2 }
  0xb8   :  { %v321_v62 = vadd.f32 %v320_v61, %v819_v43  ;;  %v349_v63 = vpop.f32.mrf.mxu3  ;;  %v264_v0 = vpop.f32.mrf.mxu0 }
  0xb9   :  { %v350_v1 = vadd.f32 %v349_v63, %v821_v44  ;;  %v265_v2 = vadd.f32 %v264_v0, %v807_v37  ;;  %v293_v3 = vpop.f32.mrf.mxu1 }
  0xba   :  { %374 = vst [vmem:[%s946_s3 + $0x50] sm:$0xff] %v321_v62  ;;  %v294_v4 = vadd.f32 %v293_v3, %v809_v38 }
  0xbb   :  { %375 = vst [vmem:[%s946_s3 + $0x58] sm:$0xff] %v350_v1 }
  0xbc   :  { %376 = vst [vmem:[%s946_s3 + $0x60] sm:$0xff] %v265_v2 }
  0xbd   :  { %377 = vst [vmem:[%s946_s3 + $0x68] sm:$0xff] %v294_v4 }
  0xbf   :  { %v322_v5 = vpop.f32.mrf.mxu2 }
  0xc0   :  { %v323_v6 = vadd.f32 %v322_v5, %v819_v43  ;;  %v351_v7 = vpop.f32.mrf.mxu3  ;;  %v267_v8 = vpop.f32.mrf.mxu0 }
  0xc1   :  { %v352_v9 = vadd.f32 %v351_v7, %v821_v44  ;;  %v268_v10 = vadd.f32 %v267_v8, %v807_v37  ;;  %v296_v11 = vpop.f32.mrf.mxu1 }
  0xc2   :  { %378 = vst [vmem:[%s946_s3 + $0x70] sm:$0xff] %v323_v6  ;;  %v297_v12 = vadd.f32 %v296_v11, %v809_v38 }
  0xc3   :  { %379 = vst [vmem:[%s946_s3 + $0x78] sm:$0xff] %v352_v9 }
  0xc4   :  { %380 = vst [vmem:[%s946_s3 + $0x80] sm:$0xff] %v268_v10 }
  0xc5   :  { %381 = vst [vmem:[%s946_s3 + $0x88] sm:$0xff] %v297_v12 }
  0xc7   :  { %v325_v13 = vpop.f32.mrf.mxu2 }
  0xc8   :  { %v326_v14 = vadd.f32 %v325_v13, %v819_v43  ;;  %v354_v15 = vpop.f32.mrf.mxu3  ;;  %v269_v16 = vpop.f32.mrf.mxu0 }
  0xc9   :  { %v355_v17 = vadd.f32 %v354_v15, %v821_v44  ;;  %v270_v18 = vadd.f32 %v269_v16, %v807_v37  ;;  %v298_v19 = vpop.f32.mrf.mxu1 }
  0xca   :  { %382 = vst [vmem:[%s946_s3 + $0x90] sm:$0xff] %v326_v14  ;;  %v299_v20 = vadd.f32 %v298_v19, %v809_v38 }
  0xcb   :  { %383 = vst [vmem:[%s946_s3 + $0x98] sm:$0xff] %v355_v17 }
  0xcc   :  { %384 = vst [vmem:[%s946_s3 + $0xa0] sm:$0xff] %v270_v18 }
  0xcd   :  { %385 = vst [vmem:[%s946_s3 + $0xa8] sm:$0xff] %v299_v20 }
  0xcf   :  { %v327_v21 = vpop.f32.mrf.mxu2 }
  0xd0   :  { %v328_v22 = vadd.f32 %v327_v21, %v819_v43  ;;  %v356_v23 = vpop.f32.mrf.mxu3  ;;  %v272_v24 = vpop.f32.mrf.mxu0 }
  0xd1   :  { %v357_v25 = vadd.f32 %v356_v23, %v821_v44  ;;  %v273_v26 = vadd.f32 %v272_v24, %v807_v37  ;;  %v301_v27 = vpop.f32.mrf.mxu1 }
  0xd2   :  { %386 = vst [vmem:[%s946_s3 + $0xb0] sm:$0xff] %v328_v22  ;;  %v302_v28 = vadd.f32 %v301_v27, %v809_v38 }
  0xd3   :  { %387 = vst [vmem:[%s946_s3 + $0xb8] sm:$0xff] %v357_v25 }
  0xd4   :  { %388 = vst [vmem:[%s946_s3 + $0xc0] sm:$0xff] %v273_v26 }
  0xd5   :  { %389 = vst [vmem:[%s946_s3 + $0xc8] sm:$0xff] %v302_v28 }
  0xd7   :  { %v330_v29 = vpop.f32.mrf.mxu2 }
  0xd8   :  { %v331_v30 = vadd.f32 %v330_v29, %v819_v43  ;;  %v359_v31 = vpop.f32.mrf.mxu3  ;;  %v274_v32 = vpop.f32.mrf.mxu0 }
  0xd9   :  { %v360_v33 = vadd.f32 %v359_v31, %v821_v44  ;;  %v275_v34 = vadd.f32 %v274_v32, %v807_v37  ;;  %v303_v35 = vpop.f32.mrf.mxu1 }
  0xda   :  { %390 = vst [vmem:[%s946_s3 + $0xd0] sm:$0xff] %v331_v30  ;;  %v304_v36 = vadd.f32 %v303_v35, %v809_v38 }
  0xdb   :  { %391 = vst [vmem:[%s946_s3 + $0xd8] sm:$0xff] %v360_v33 }
  0xdc   :  { %392 = vst [vmem:[%s946_s3 + $0xe0] sm:$0xff] %v275_v34 }
  0xdd   :  { %393 = vst [vmem:[%s946_s3 + $0xe8] sm:$0xff] %v304_v36 }
  0xdf   :  { %v332_v37 = vpop.f32.mrf.mxu2 }
  0xe0   :  { %v333_v39 = vadd.f32 %v332_v37, %v819_v43  ;;  %v361_v40 = vpop.f32.mrf.mxu3 }
  0xe1   :  { %v362_v41 = vadd.f32 %v361_v40, %v821_v44 }
  0xe2   :  { %394 = vst [vmem:[%s946_s3 + $0xf0] sm:$0xff] %v333_v39 }
  0xe3   :  { %395 = vst [vmem:[%s946_s3 + $0xf8] sm:$0xff] %v362_v41 }

// kernel: actor_forward.5
= control target key start
LH: loop header
LB: loop body
LE: loop exit
PB: predicated region body
PF: predicated region fallthrough
CT: control target
= control target key end

     0   :  { %s827_s0 = inlined_call_operand.vmem [shape: bf16[8,8,128], index: 0, kind: input, shape index: {}]   ;;  %s828_s1 = inlined_call_operand.vmem [shape: bf16[128,256], index: 1, kind: input, shape index: {}]   ;;  %s829_s2 = inlined_call_operand.vmem [shape: f32[1,256], index: 2, kind: input, shape index: {}]   ;;  %s830_s3 = inlined_call_operand.hbm [shape: f32[8,8,256], index: 3, kind: output, shape index: {}]  }
   0x1   :  { %v451_v0 = vld [vmem:[%s828_s1 + $0x70] sm:$0xf]  ;;  %v476_v1 = vld [vmem:[%s828_s1 + $0x74] sm:$0xf0]  ;;  %v475_v2 = vld [vmem:[%s828_s1 + $0x74] sm:$0xf] }
   0x2   :  { %v452_v3 = vor.u32 %v476_v1, %v451_v0  ;;  %v453_v4 = vld [vmem:[%s828_s1 + $0x78] sm:$0xf0]  ;;  %v443_v5 = vld [vmem:[%s828_s1 + $0x60] sm:$0xf]  ;;  %v474_v6 = vld [vmem:[%s828_s1 + $0x64] sm:$0xf0] }
   0x3   :  { %v456_v7 = vor.u32 %v475_v2, %v453_v4  ;;  %v473_v8 = vld [vmem:[%s828_s1 + $0x64] sm:$0xf]  ;;  %v445_v9 = vld [vmem:[%s828_s1 + $0x68] sm:$0xf0]  ;;  %v444_v10 = vor.u32 %v474_v6, %v443_v5  ;;  %v435_v12 = vld [vmem:[%s828_s1 + $0x50] sm:$0xf] }
   0x4   :  { %149 = vmatpush.bf16.msra.mxu0 %v452_v3  ;;  %477 = vmatpush.bf16.msra.mxu2 %v452_v3  ;;  %v448_v11 = vor.u32 %v473_v8, %v445_v9  ;;  %v472_v13 = vld [vmem:[%s828_s1 + $0x54] sm:$0xf0]  ;;  %v471_v14 = vld [vmem:[%s828_s1 + $0x54] sm:$0xf]  ;;  %v437_v15 = vld [vmem:[%s828_s1 + $0x58] sm:$0xf0] }
   0x5   :  { %178 = vmatpush.bf16.msra.mxu1 %v456_v7  ;;  %485 = vmatpush.bf16.msra.mxu3 %v456_v7  ;;  %v436_v16 = vor.u32 %v472_v13, %v435_v12  ;;  %v440_v17 = vor.u32 %v471_v14, %v437_v15  ;;  %v427_v18 = vld [vmem:[%s828_s1 + $0x40] sm:$0xf]  ;;  %v470_v19 = vld [vmem:[%s828_s1 + $0x44] sm:$0xf0]  ;;  %v469_v20 = vld [vmem:[%s828_s1 + $0x44] sm:$0xf] }
   0x6   :  { %v429_v21 = vld [vmem:[%s828_s1 + $0x48] sm:$0xf0]  ;;  %v428_v22 = vor.u32 %v470_v19, %v427_v18 }
   0x8   :  { %150 = vmatpush.bf16.msra.mxu0 %v444_v10  ;;  %478 = vmatpush.bf16.msra.mxu2 %v444_v10 }
   0x9   :  { %179 = vmatpush.bf16.msra.mxu1 %v448_v11  ;;  %486 = vmatpush.bf16.msra.mxu3 %v448_v11 }
   0xc   :  { %151 = vmatpush.bf16.msra.mxu0 %v436_v16  ;;  %479 = vmatpush.bf16.msra.mxu2 %v436_v16 }
   0xd   :  { %8 = vsyncpa [#allocation3], 0  ;;  %180 = vmatpush.bf16.msra.mxu1 %v440_v17  ;;  %487 = vmatpush.bf16.msra.mxu3 %v440_v17  ;;  %v432_v23 = vor.u32 %v469_v20, %v429_v21  ;;  %v419_v24 = vld [vmem:[%s828_s1 + $0x30] sm:$0xf]  ;;  %v468_v25 = vld [vmem:[%s828_s1 + $0x34] sm:$0xf0] }
   0xe   :  { %v467_v26 = vld [vmem:[%s828_s1 + $0x34] sm:$0xf]  ;;  %v421_v27 = vld [vmem:[%s828_s1 + $0x38] sm:$0xf0]  ;;  %v420_v28 = vor.u32 %v468_v25, %v419_v24  ;;  %v411_v30 = vld [vmem:[%s828_s1 + $0x20] sm:$0xf] }
   0xf   :  { %v424_v29 = vor.u32 %v467_v26, %v421_v27  ;;  %v466_v31 = vld [vmem:[%s828_s1 + $0x24] sm:$0xf0]  ;;  %v465_v32 = vld [vmem:[%s828_s1 + $0x24] sm:$0xf]  ;;  %v413_v33 = vld [vmem:[%s828_s1 + $0x28] sm:$0xf0] }
  0x10   :  { %152 = vmatpush.bf16.msra.mxu0 %v428_v22  ;;  %480 = vmatpush.bf16.msra.mxu2 %v428_v22  ;;  %v412_v34 = vor.u32 %v466_v31, %v411_v30  ;;  %v416_v35 = vor.u32 %v465_v32, %v413_v33  ;;  %v403_v36 = vld [vmem:[%s828_s1 + $0x10] sm:$0xf]  ;;  %v464_v37 = vld [vmem:[%s828_s1 + $0x14] sm:$0xf0]  ;;  %v463_v38 = vld [vmem:[%s828_s1 + $0x14] sm:$0xf] }
  0x11   :  { %181 = vmatpush.bf16.msra.mxu1 %v432_v23  ;;  %488 = vmatpush.bf16.msra.mxu3 %v432_v23  ;;  %v405_v39 = vld [vmem:[%s828_s1 + $0x18] sm:$0xf0]  ;;  %v404_v40 = vor.u32 %v464_v37, %v403_v36  ;;  %v395_v42 = vld [vmem:[%s828_s1] sm:$0xf]  ;;  %v462_v43 = vld [vmem:[%s828_s1 + $0x4] sm:$0xf0] }
  0x12   :  { %v408_v41 = vor.u32 %v463_v38, %v405_v39  ;;  %v461_v44 = vld [vmem:[%s828_s1 + $0x4] sm:$0xf]  ;;  %v397_v45 = vld [vmem:[%s828_s1 + $0x8] sm:$0xf0]  ;;  %v396_v46 = vor.u32 %v462_v43, %v395_v42  ;;  %v459_v49 = vld [vmem:[%s827_s0 + $0x10] sm:$0xff]  ;;  %s365_s6 = sshll.u32 %s830_s3, 4  ;;  %s366_s6 = int_to_ptr.hbm [resolvable:$true] %s365_s6 }
  0x13   :  { %v400_v47 = vor.u32 %v461_v44, %v397_v45  ;;  %v457_v48 = vld [vmem:[%s827_s0] sm:$0xff]  ;;  %v458_v50 = vld [vmem:[%s827_s0 + $0x8] sm:$0xff]  ;;  %v460_v51 = vld [vmem:[%s827_s0 + $0x18] sm:$0xff]  ;;  %s570_s0 = smov [#allocation2]   ;;  %s571_s7 = smov 256  }
  0x14   :  { %153 = vmatpush.bf16.msra.mxu0 %v420_v28  ;;  %481 = vmatpush.bf16.msra.mxu2 %v420_v28  ;;  %v39_v52 = vld [vmem:[%s829_s2] sm:$0x3]  ;;  %s363_s2 = sshll.u32 %s570_s0, 4  ;;  %s572_s8 = smov 16   ;;  %s364_s2 = int_to_ptr.vmem [resolvable:$true] %s363_s2 }
  0x15   :  { %182 = vmatpush.bf16.msra.mxu1 %v424_v29  ;;  %489 = vmatpush.bf16.msra.mxu3 %v424_v29  ;;  %v41_v53 = vperm.slane %v39_v52, 0  ;;  %v42_v54 = vperm.slane %v39_v52, 1 }
  0x18   :  { %154 = vmatpush.bf16.msra.mxu0 %v412_v34  ;;  %482 = vmatpush.bf16.msra.mxu2 %v412_v34 }
  0x19   :  { %183 = vmatpush.bf16.msra.mxu1 %v416_v35  ;;  %490 = vmatpush.bf16.msra.mxu3 %v416_v35 }
  0x1c   :  { %155 = vmatpush.bf16.msra.mxu0 %v404_v40  ;;  %483 = vmatpush.bf16.msra.mxu2 %v404_v40 }
  0x1d   :  { %184 = vmatpush.bf16.msra.mxu1 %v408_v41  ;;  %491 = vmatpush.bf16.msra.mxu3 %v408_v41 }
  0x20   :  { %156 = vmatpush.bf16.msra.mxu0 %v396_v46  ;;  %484 = vmatpush.bf16.msra.mxu2 %v396_v46 }
  0x21   :  { %185 = vmatpush.bf16.msra.mxu1 %v400_v47  ;;  %492 = vmatpush.bf16.msra.mxu3 %v400_v47 }
  0x23   :  { %157 = vmatmul.bf16.vlgmr.msra.gmra.mxu0 %v457_v48  ;;  %167 = vmatmul.bf16.vlgmr.msra.gmra.mxu2 %v459_v49 }
  0x24   :  { %186 = vmatmul.bf16.vlgmr.msra.gmra.mxu1 %v457_v48  ;;  %196 = vmatmul.bf16.vlgmr.msra.gmra.mxu3 %v459_v49 }
  0x33   :  { %162 = vmatmul.bf16.gmra.mxu0 %v458_v50  ;;  %172 = vmatmul.bf16.gmra.mxu2 %v460_v51 }
  0x34   :  { %191 = vmatmul.bf16.gmra.mxu1 %v458_v50  ;;  %201 = vmatmul.bf16.gmra.mxu3 %v460_v51 }
  0xa0   :  { %v158_v55 = vpop.f32.mrf.mxu0 }
  0xa1   :  { %v704_v56 = vadd.f32 %v158_v55, %v41_v53  ;;  %v187_v57 = vpop.f32.mrf.mxu1 }
  0xa2   :  { %v706_v58 = vadd.f32 %v187_v57, %v42_v54 }
  0xa4   :  { %v207_v59 = vmax.f32 %v704_v56, %v706_v58 }
  0xa6   :  { %208 = vmax.xlane.f32.xlu0 %v207_v59  ;;  %v168_v60 = vpop.f32.mrf.mxu2 }
  0xa7   :  { %v710_v61 = vadd.f32 %v168_v60, %v41_v53  ;;  %v197_v62 = vpop.f32.mrf.mxu3 }
  0xa8   :  { %v712_v63 = vadd.f32 %v197_v62, %v42_v54  ;;  %v160_v0 = vpop.f32.mrf.mxu0 }
  0xa9   :  { %v714_v1 = vadd.f32 %v160_v0, %v41_v53  ;;  %v189_v2 = vpop.f32.mrf.mxu1 }
  0xaa   :  { %v716_v3 = vadd.f32 %v189_v2, %v42_v54  ;;  %v219_v4 = vmax.f32 %v710_v61, %v712_v63 }
  0xac   :  { %220 = vmax.xlane.f32.xlu2 %v219_v4  ;;  %v210_v5 = vmax.f32 %v714_v1, %v716_v3 }
  0xae   :  { %211 = vmax.xlane.f32.xlu0 %v210_v5  ;;  %v170_v6 = vpop.f32.mrf.mxu2 }
  0xaf   :  { %v722_v7 = vadd.f32 %v170_v6, %v41_v53  ;;  %v199_v8 = vpop.f32.mrf.mxu3 }
  0xb0   :  { %v724_v9 = vadd.f32 %v199_v8, %v42_v54  ;;  %v163_v10 = vpop.f32.mrf.mxu0 }
  0xb1   :  { %v726_v11 = vadd.f32 %v163_v10, %v41_v53  ;;  %v192_v12 = vpop.f32.mrf.mxu1 }
  0xb2   :  { %v728_v13 = vadd.f32 %v192_v12, %v42_v54  ;;  %v222_v14 = vmax.f32 %v722_v7, %v724_v9 }
  0xb4   :  { %223 = vmax.xlane.f32.xlu2 %v222_v14  ;;  %v213_v15 = vmax.f32 %v726_v11, %v728_v13 }
  0xb6   :  { %214 = vmax.xlane.f32.xlu1 %v213_v15  ;;  %v173_v16 = vpop.f32.mrf.mxu2 }
  0xb7   :  { %v734_v17 = vadd.f32 %v173_v16, %v41_v53  ;;  %v202_v18 = vpop.f32.mrf.mxu3 }
  0xb8   :  { %v736_v19 = vadd.f32 %v202_v18, %v42_v54  ;;  %v165_v20 = vpop.f32.mrf.mxu0 }
  0xb9   :  { %v738_v21 = vadd.f32 %v165_v20, %v41_v53  ;;  %v194_v22 = vpop.f32.mrf.mxu1 }
  0xba   :  { %v740_v23 = vadd.f32 %v194_v22, %v42_v54  ;;  %v225_v24 = vmax.f32 %v734_v17, %v736_v19 }
  0xbc   :  { %226 = vmax.xlane.f32.xlu0 %v225_v24  ;;  %v216_v25 = vmax.f32 %v738_v21, %v740_v23 }
  0xbe   :  { %217 = vmax.xlane.f32.xlu1 %v216_v25  ;;  %v175_v26 = vpop.f32.mrf.mxu2 }
  0xbf   :  { %v204_v27 = vpop.f32.mrf.mxu3  ;;  %v746_v28 = vadd.f32 %v175_v26, %v41_v53 }
  0xc0   :  { %v748_v29 = vadd.f32 %v204_v27, %v42_v54 }
  0xc2   :  { %v228_v30 = vmax.f32 %v746_v28, %v748_v29 }
  0xc6   :  { %229 = vmax.xlane.f32.xlu1 %v228_v30 }
 0x119   :  { %v752_v31 = vpop.xlane.xlu0 %208 }
 0x11a   :  { %v231_v32 = vsub.f32 %v704_v56, %v752_v31  ;;  %v232_v33 = vsub.f32 %v706_v58, %v752_v31 }
 0x11c   :  { %v247_v34 = vmul.f32 1.442695, %v231_v32  ;;  %v249_v35 = vmul.f32 1.442695, %v232_v33 }
 0x11e   :  { %496 = vpow2.f32 %v247_v34 }
 0x11f   :  { %498 = vpow2.f32 %v249_v35  ;;  %v758_v36 = vpop.xlane.xlu2 %220 }
 0x120   :  { %v239_v37 = vsub.f32 %v710_v61, %v758_v36  ;;  %v240_v38 = vsub.f32 %v712_v63, %v758_v36 }
 0x121   :  { %v764_v39 = vpop.xlane.xlu0 %211 }
 0x122   :  { %v263_v40 = vmul.f32 1.442695, %v239_v37  ;;  %v265_v41 = vmul.f32 1.442695, %v240_v38  ;;  %v233_v42 = vsub.f32 %v714_v1, %v764_v39  ;;  %v234_v43 = vsub.f32 %v716_v3, %v764_v39 }
 0x124   :  { %v497_v44 = vpop.eup %496  ;;  %500 = vpow2.f32 %v263_v40  ;;  %v251_v46 = vmul.f32 1.442695, %v233_v42  ;;  %v253_v48 = vmul.f32 1.442695, %v234_v43 }
 0x125   :  { %v499_v45 = vpop.eup %498  ;;  %502 = vpow2.f32 %v265_v41 }
 0x126   :  { %v279_v47 = vadd.f32 %v499_v45, %v497_v44  ;;  %504 = vpow2.f32 %v251_v46 }
 0x127   :  { %v770_v49 = vpop.xlane.xlu2 %223  ;;  %506 = vpow2.f32 %v253_v48 }
 0x128   :  { %280 = vadd.xlane.f32.xlu2 %v279_v47  ;;  %v241_v55 = vsub.f32 %v722_v7, %v770_v49  ;;  %v242_v62 = vsub.f32 %v724_v9, %v770_v49 }
 0x129   :  { %v772_v50 = vpop.xlane.xlu1 %214 }
 0x12a   :  { %v501_v51 = vpop.eup %500  ;;  %v235_v52 = vsub.f32 %v726_v11, %v772_v50  ;;  %v236_v53 = vsub.f32 %v728_v13, %v772_v50  ;;  %v267_v0 = vmul.f32 1.442695, %v241_v55  ;;  %v269_v5 = vmul.f32 1.442695, %v242_v62 }
 0x12b   :  { %v503_v54 = vpop.eup %502 }
 0x12c   :  { %v255_v57 = vmul.f32 1.442695, %v235_v52  ;;  %v257_v59 = vmul.f32 1.442695, %v236_v53  ;;  %v291_v60 = vadd.f32 %v503_v54, %v501_v51  ;;  %v505_v2 = vpop.eup %504 }
 0x12d   :  { %v507_v4 = vpop.eup %506 }
 0x12e   :  { %508 = vpow2.f32 %v255_v57  ;;  %292 = vadd.xlane.f32.xlu0 %v291_v60  ;;  %v282_v20 = vadd.f32 %v507_v4, %v505_v2 }
 0x12f   :  { %510 = vpow2.f32 %v257_v59  ;;  %v782_v6 = vpop.xlane.xlu0 %226 }
 0x130   :  { %512 = vpow2.f32 %v267_v0  ;;  %v243_v15 = vsub.f32 %v734_v17, %v782_v6  ;;  %v244_v24 = vsub.f32 %v736_v19, %v782_v6 }
 0x131   :  { %v784_v8 = vpop.xlane.xlu1 %217  ;;  %514 = vpow2.f32 %v269_v5 }
 0x132   :  { %v237_v10 = vsub.f32 %v738_v21, %v784_v8  ;;  %v238_v12 = vsub.f32 %v740_v23, %v784_v8  ;;  %v271_v26 = vmul.f32 1.442695, %v243_v15  ;;  %v273_v30 = vmul.f32 1.442695, %v244_v24 }
 0x134   :  { %v509_v14 = vpop.eup %508  ;;  %v259_v16 = vmul.f32 1.442695, %v237_v10  ;;  %v261_v18 = vmul.f32 1.442695, %v238_v12 }
 0x135   :  { %v511_v22 = vpop.eup %510 }
 0x136   :  { %516 = vpow2.f32 %v259_v16  ;;  %283 = vadd.xlane.f32.xlu0 %v282_v20  ;;  %v285_v25 = vadd.f32 %v511_v22, %v509_v14  ;;  %v513_v27 = vpop.eup %512 }
 0x137   :  { %518 = vpow2.f32 %v261_v18  ;;  %v515_v35 = vpop.eup %514 }
 0x138   :  { %286 = vadd.xlane.f32.xlu1 %v285_v25  ;;  %520 = vpow2.f32 %v271_v26  ;;  %v294_v42 = vadd.f32 %v515_v35, %v513_v27 }
 0x139   :  { %v794_v32 = vpop.xlane.xlu1 %229  ;;  %522 = vpow2.f32 %v273_v30 }
 0x13a   :  { %v245_v33 = vsub.f32 %v746_v28, %v794_v32  ;;  %v246_v34 = vsub.f32 %v748_v29, %v794_v32 }
 0x13c   :  { %v517_v37 = vpop.eup %516  ;;  %v275_v38 = vmul.f32 1.442695, %v245_v33  ;;  %v277_v40 = vmul.f32 1.442695, %v246_v34 }
 0x13d   :  { %v519_v41 = vpop.eup %518 }
 0x13e   :  { %524 = vpow2.f32 %v275_v38  ;;  %v288_v43 = vadd.f32 %v519_v41, %v517_v37  ;;  %v521_v44 = vpop.eup %520 }
 0x13f   :  { %526 = vpow2.f32 %v277_v40  ;;  %v523_v45 = vpop.eup %522 }
 0x140   :  { %295 = vadd.xlane.f32.xlu1 %v294_v42  ;;  %289 = vadd.xlane.f32.xlu2 %v288_v43  ;;  %v297_v51 = vadd.f32 %v523_v45, %v521_v44 }
 0x144   :  { %v525_v46 = vpop.eup %524 }
 0x145   :  { %v527_v47 = vpop.eup %526 }
 0x146   :  { %v300_v48 = vadd.f32 %v527_v47, %v525_v46 }
 0x148   :  { %301 = vadd.xlane.f32.xlu0 %v300_v48  ;;  %298 = vadd.xlane.f32.xlu2 %v297_v51 }
 0x19b   :  { %v281_v52 = vpop.xlane.xlu2 %280 }
 0x19c   :  { %528 = vlog2.f32 %v281_v52 }
 0x1a1   :  { %v293_v53 = vpop.xlane.xlu0 %292 }
 0x1a2   :  { %v529_v54 = vpop.eup %528  ;;  %530 = vlog2.f32 %v293_v53 }
 0x1a3   :  { %v304_v55 = vmul.f32 0.6931472, %v529_v54 }
 0x1a5   :  { %v319_v57 = vadd.f32 %v304_v55, %v752_v31 }
 0x1a7   :  { %v327_v59 = vsub.f32 %v704_v56, %v319_v57  ;;  %v328_v60 = vsub.f32 %v706_v58, %v319_v57 }
 0x1a8   :  { %v531_v62 = vpop.eup %530 }
 0x1a9   :  { %343 = vst [vmem:[#allocation2] sm:$0xff] %v327_v59  ;;  %v312_v0 = vmul.f32 0.6931472, %v531_v62  ;;  %v284_v2 = vpop.xlane.xlu0 %283 }
 0x1aa   :  { %344 = vst [vmem:[#allocation2 + $0x8] sm:$0xff] %v328_v60  ;;  %532 = vlog2.f32 %v284_v2 }
 0x1ab   :  { %v323_v4 = vadd.f32 %v312_v0, %v758_v36  ;;  %v287_v5 = vpop.xlane.xlu1 %286 }
 0x1ac   :  { %534 = vlog2.f32 %v287_v5 }
 0x1ad   :  { %v335_v10 = vsub.f32 %v710_v61, %v323_v4  ;;  %v336_v12 = vsub.f32 %v712_v63, %v323_v4 }
 0x1af   :  { %351 = vst [vmem:[#allocation2 + $0x40] sm:$0xff] %v335_v10 }
 0x1b0   :  { %v533_v31 = vpop.eup %532  ;;  %352 = vst [vmem:[#allocation2 + $0x48] sm:$0xff] %v336_v12 }
 0x1b1   :  { %v306_v56 = vmul.f32 0.6931472, %v533_v31 }
 0x1b2   :  { %v535_v14 = vpop.eup %534 }
 0x1b3   :  { %v320_v58 = vadd.f32 %v306_v56, %v764_v39  ;;  %v308_v15 = vmul.f32 0.6931472, %v535_v14  ;;  %v296_v16 = vpop.xlane.xlu1 %295  ;;  %v290_v18 = vpop.xlane.xlu2 %289 }
 0x1b4   :  { %536 = vlog2.f32 %v296_v16 }
 0x1b5   :  { %v329_v20 = vsub.f32 %v714_v1, %v320_v58  ;;  %v330_v36 = vsub.f32 %v716_v3, %v320_v58  ;;  %v321_v22 = vadd.f32 %v308_v15, %v772_v50  ;;  %538 = vlog2.f32 %v290_v18 }
 0x1b7   :  { %345 = vst [vmem:[#allocation2 + $0x10] sm:$0xff] %v329_v20  ;;  %v331_v61 = vsub.f32 %v726_v11, %v321_v22  ;;  %v332_v63 = vsub.f32 %v728_v13, %v321_v22 }
 0x1b8   :  { %346 = vst [vmem:[#allocation2 + $0x18] sm:$0xff] %v330_v36 }
 0x1b9   :  { %347 = vst [vmem:[#allocation2 + $0x20] sm:$0xff] %v331_v61 }
 0x1ba   :  { %v537_v24 = vpop.eup %536  ;;  %348 = vst [vmem:[#allocation2 + $0x28] sm:$0xff] %v332_v63 }
 0x1bb   :  { %v539_v39 = vpop.eup %538  ;;  %v314_v25 = vmul.f32 0.6931472, %v537_v24  ;;  %v299_v26 = vpop.xlane.xlu2 %298 }
 0x1bc   :  { %v302_v27 = vpop.xlane.xlu0 %301  ;;  %v310_v30 = vmul.f32 0.6931472, %v539_v39  ;;  %540 = vlog2.f32 %v299_v26 }
 0x1bd   :  { %v324_v1 = vadd.f32 %v314_v25, %v770_v49  ;;  %542 = vlog2.f32 %v302_v27 }
 0x1be   :  { %v322_v3 = vadd.f32 %v310_v30, %v784_v8 }
 0x1bf   :  { %v337_v50 = vsub.f32 %v722_v7, %v324_v1  ;;  %v338_v11 = vsub.f32 %v724_v9, %v324_v1 }
 0x1c0   :  { %v333_v13 = vsub.f32 %v738_v21, %v322_v3  ;;  %v334_v33 = vsub.f32 %v740_v23, %v322_v3 }
 0x1c1   :  { %353 = vst [vmem:[#allocation2 + $0x50] sm:$0xff] %v337_v50 }
 0x1c2   :  { %v541_v34 = vpop.eup %540  ;;  %354 = vst [vmem:[#allocation2 + $0x58] sm:$0xff] %v338_v11 }
 0x1c3   :  { %v543_v35 = vpop.eup %542  ;;  %349 = vst [vmem:[#allocation2 + $0x30] sm:$0xff] %v333_v13  ;;  %v316_v37 = vmul.f32 0.6931472, %v541_v34 }
 0x1c4   :  { %350 = vst [vmem:[#allocation2 + $0x38] sm:$0xff] %v334_v33  ;;  %v318_v38 = vmul.f32 0.6931472, %v543_v35 }
 0x1c5   :  { %v325_v49 = vadd.f32 %v316_v37, %v782_v6 }
 0x1c6   :  { %v326_v8 = vadd.f32 %v318_v38, %v794_v32 }
 0x1c7   :  { %v339_v7 = vsub.f32 %v734_v17, %v325_v49  ;;  %v340_v9 = vsub.f32 %v736_v19, %v325_v49 }
 0x1c8   :  { %v341_v21 = vsub.f32 %v746_v28, %v326_v8  ;;  %v342_v23 = vsub.f32 %v748_v29, %v326_v8 }
 0x1c9   :  { %355 = vst [vmem:[#allocation2 + $0x60] sm:$0xff] %v339_v7 }
 0x1ca   :  { %356 = vst [vmem:[#allocation2 + $0x68] sm:$0xff] %v340_v9 }
 0x1cb   :  { %357 = vst [vmem:[#allocation2 + $0x70] sm:$0xff] %v341_v21 }
 0x1cc   :  { %358 = vst [vmem:[#allocation2 + $0x78] sm:$0xff] %v342_v23 }
 0x1cd   :  { %371 = dma.vmem_to_hbm [thread:$0]  %s364_s2, 2048, %s366_s6, [#allocation3], %s571_s7, %s571_s7, %s572_s8  }
 0x1ce   :  { %568 = dma.done.wait [#allocation3], 2048  }
 0x1cf   :  { %569 = vsyncadd [#allocation3], 4294965248 }
 0x1d0   :  { %376 = vsyncpa [#allocation3], 1 }

// kernel: actor_forward.4
= control target key start
LH: loop header
LB: loop body
LE: loop exit
PB: predicated region body
PF: predicated region fallthrough
CT: control target
= control target key end

     0   :  { %s2294_s3 = inlined_call_operand.vmem [shape: bf16[128,512], index: 3, kind: input, shape index: {}]   ;;  %s2295_s1 = inlined_call_operand.vmem [shape: f32[8,128], index: 1, kind: input, shape index: {}]   ;;  %s2296_s0 = inlined_call_operand.vmem [shape: f32[8,8,512], index: 0, kind: input, shape index: {}]   ;;  %s2297_s2 = inlined_call_operand.vmem [shape: f32[8,128], index: 2, kind: input, shape index: {}]   ;;  %s2298_s4 = inlined_call_operand.vmem [shape: bf16[8,8,128], index: 4, kind: output, shape index: {}]  }
   0x1   :  { %v1346_v0 = vld [vmem:[%s2294_s3 + $0xe0] sm:$0xf]  ;;  %v1442_v1 = vld [vmem:[%s2294_s3 + $0xec] sm:$0xf0]  ;;  %v1440_v2 = vld [vmem:[%s2294_s3 + $0xe4] sm:$0xf] }
   0x2   :  { %v1629_v3 = vor.u32 %v1442_v1, %v1346_v0  ;;  %v1348_v4 = vld [vmem:[%s2294_s3 + $0xf0] sm:$0xf0]  ;;  %v1441_v5 = vld [vmem:[%s2294_s3 + $0xec] sm:$0xf]  ;;  %v1356_v6 = vld [vmem:[%s2294_s3 + $0xf8] sm:$0xf0] }
   0x3   :  { %v1640_v7 = vor.u32 %v1440_v2, %v1348_v4  ;;  %v1642_v8 = vor.u32 %v1441_v5, %v1356_v6  ;;  %v1330_v9 = vld [vmem:[%s2294_s3 + $0xc0] sm:$0xf]  ;;  %v1438_v10 = vld [vmem:[%s2294_s3 + $0xcc] sm:$0xf0]  ;;  %v1436_v11 = vld [vmem:[%s2294_s3 + $0xc4] sm:$0xf] }
   0x4   :  { %224 = vmatpush.bf16.msra.mxu0 %v1629_v3  ;;  %v1654_v12 = vor.u32 %v1438_v10, %v1330_v9  ;;  %v1332_v13 = vld [vmem:[%s2294_s3 + $0xd0] sm:$0xf0]  ;;  %v1437_v14 = vld [vmem:[%s2294_s3 + $0xcc] sm:$0xf]  ;;  %v1340_v15 = vld [vmem:[%s2294_s3 + $0xd8] sm:$0xf0] }
   0x5   :  { %237 = vmatpush.bf16.msra.mxu1 %v1640_v7  ;;  %263 = vmatpush.bf16.msra.mxu3 %v1642_v8  ;;  %v1667_v16 = vor.u32 %v1436_v11, %v1332_v13  ;;  %v1669_v17 = vor.u32 %v1437_v14, %v1340_v15  ;;  %v1354_v18 = vld [vmem:[%s2294_s3 + $0xe8] sm:$0xf]  ;;  %v1443_v19 = vld [vmem:[%s2294_s3 + $0xf4] sm:$0xf0]  ;;  %v1314_v20 = vld [vmem:[%s2294_s3 + $0xa0] sm:$0xf] }
   0x6   :  { %v1680_v21 = vor.u32 %v1443_v19, %v1354_v18  ;;  %v1434_v22 = vld [vmem:[%s2294_s3 + $0xac] sm:$0xf0]  ;;  %v1432_v23 = vld [vmem:[%s2294_s3 + $0xa4] sm:$0xf]  ;;  %v1316_v24 = vld [vmem:[%s2294_s3 + $0xb0] sm:$0xf0] }
   0x7   :  { %v1433_v25 = vld [vmem:[%s2294_s3 + $0xac] sm:$0xf]  ;;  %v1324_v26 = vld [vmem:[%s2294_s3 + $0xb8] sm:$0xf0]  ;;  %v1338_v27 = vld [vmem:[%s2294_s3 + $0xc8] sm:$0xf]  ;;  %v1702_v28 = vor.u32 %v1434_v22, %v1314_v20  ;;  %v1715_v32 = vor.u32 %v1432_v23, %v1316_v24 }
   0x8   :  { %225 = vmatpush.bf16.msra.mxu0 %v1654_v12  ;;  %250 = vmatpush.bf16.msra.mxu2 %v1680_v21  ;;  %v1439_v29 = vld [vmem:[%s2294_s3 + $0xd4] sm:$0xf0]  ;;  %v1298_v30 = vld [vmem:[%s2294_s3 + $0x80] sm:$0xf]  ;;  %v1430_v31 = vld [vmem:[%s2294_s3 + $0x8c] sm:$0xf0]  ;;  %v1717_v33 = vor.u32 %v1433_v25, %v1324_v26 }
   0x9   :  { %238 = vmatpush.bf16.msra.mxu1 %v1667_v16  ;;  %264 = vmatpush.bf16.msra.mxu3 %v1669_v17  ;;  %v1719_v34 = vor.u32 %v1439_v29, %v1338_v27  ;;  %v1428_v35 = vld [vmem:[%s2294_s3 + $0x84] sm:$0xf]  ;;  %v1300_v36 = vld [vmem:[%s2294_s3 + $0x90] sm:$0xf0]  ;;  %v1429_v37 = vld [vmem:[%s2294_s3 + $0x8c] sm:$0xf]  ;;  %v1741_v41 = vor.u32 %v1430_v31, %v1298_v30 }
   0xa   :  { %v1308_v38 = vld [vmem:[%s2294_s3 + $0x98] sm:$0xf0]  ;;  %v1322_v39 = vld [vmem:[%s2294_s3 + $0xa8] sm:$0xf]  ;;  %v1435_v40 = vld [vmem:[%s2294_s3 + $0xb4] sm:$0xf0]  ;;  %v1753_v45 = vor.u32 %v1428_v35, %v1300_v36 }
   0xb   :  { %v1743_v42 = vor.u32 %v1435_v40, %v1322_v39  ;;  %v1282_v43 = vld [vmem:[%s2294_s3 + $0x60] sm:$0xf]  ;;  %v1426_v44 = vld [vmem:[%s2294_s3 + $0x6c] sm:$0xf0]  ;;  %v1755_v46 = vor.u32 %v1429_v37, %v1308_v38  ;;  %v1424_v47 = vld [vmem:[%s2294_s3 + $0x64] sm:$0xf] }
   0xc   :  { %226 = vmatpush.bf16.msra.mxu0 %v1702_v28  ;;  %251 = vmatpush.bf16.msra.mxu2 %v1719_v34  ;;  %v1306_v48 = vld [vmem:[%s2294_s3 + $0x88] sm:$0xf]  ;;  %v1431_v49 = vld [vmem:[%s2294_s3 + $0x94] sm:$0xf0]  ;;  %v1284_v50 = vld [vmem:[%s2294_s3 + $0x70] sm:$0xf0]  ;;  %v1777_v53 = vor.u32 %v1426_v44, %v1282_v43 }
   0xd   :  { %239 = vmatpush.bf16.msra.mxu1 %v1715_v32  ;;  %265 = vmatpush.bf16.msra.mxu3 %v1717_v33  ;;  %v1425_v51 = vld [vmem:[%s2294_s3 + $0x6c] sm:$0xf]  ;;  %v1292_v52 = vld [vmem:[%s2294_s3 + $0x78] sm:$0xf0]  ;;  %v1779_v54 = vor.u32 %v1431_v49, %v1306_v48  ;;  %v1266_v55 = vld [vmem:[%s2294_s3 + $0x40] sm:$0xf]  ;;  %v1789_v57 = vor.u32 %v1424_v47, %v1284_v50 }
   0xe   :  { %v1422_v56 = vld [vmem:[%s2294_s3 + $0x4c] sm:$0xf0]  ;;  %v1791_v58 = vor.u32 %v1425_v51, %v1292_v52  ;;  %v1420_v59 = vld [vmem:[%s2294_s3 + $0x44] sm:$0xf]  ;;  %v1290_v60 = vld [vmem:[%s2294_s3 + $0x68] sm:$0xf] }
   0xf   :  { %v1427_v61 = vld [vmem:[%s2294_s3 + $0x74] sm:$0xf0]  ;;  %v1268_v62 = vld [vmem:[%s2294_s3 + $0x50] sm:$0xf0]  ;;  %v1421_v63 = vld [vmem:[%s2294_s3 + $0x4c] sm:$0xf]  ;;  %v1813_v1 = vor.u32 %v1422_v56, %v1266_v55 }
  0x10   :  { %227 = vmatpush.bf16.msra.mxu0 %v1741_v41  ;;  %252 = vmatpush.bf16.msra.mxu2 %v1743_v42  ;;  %v1276_v0 = vld [vmem:[%s2294_s3 + $0x58] sm:$0xf0]  ;;  %v1815_v2 = vor.u32 %v1427_v61, %v1290_v60  ;;  %v1250_v4 = vld [vmem:[%s2294_s3 + $0x20] sm:$0xf]  ;;  %v1418_v5 = vld [vmem:[%s2294_s3 + $0x2c] sm:$0xf0]  ;;  %v1828_v9 = vor.u32 %v1420_v59, %v1268_v62 }
  0x11   :  { %240 = vmatpush.bf16.msra.mxu1 %v1753_v45  ;;  %266 = vmatpush.bf16.msra.mxu3 %v1755_v46  ;;  %v1416_v6 = vld [vmem:[%s2294_s3 + $0x24] sm:$0xf]  ;;  %v1830_v10 = vor.u32 %v1421_v63, %v1276_v0  ;;  %v1274_v11 = vld [vmem:[%s2294_s3 + $0x48] sm:$0xf]  ;;  %v1423_v13 = vld [vmem:[%s2294_s3 + $0x54] sm:$0xf0]  ;;  %v1852_v22 = vor.u32 %v1418_v5, %v1250_v4 }
  0x12   :  { %v21_v14 = vld [vmem:[%s2295_s1] sm:$0xff]  ;;  %v1252_v15 = vld [vmem:[%s2294_s3 + $0x30] sm:$0xf0]  ;;  %v1417_v18 = vld [vmem:[%s2294_s3 + $0x2c] sm:$0xf]  ;;  %v1854_v23 = vor.u32 %v1423_v13, %v1274_v11 }
  0x13   :  { %v1260_v19 = vld [vmem:[%s2294_s3 + $0x38] sm:$0xf0]  ;;  %v22_v20 = vpack.c.bf16 %v21_v14, %v21_v14  ;;  %v1234_v24 = vld [vmem:[%s2294_s3] sm:$0xf]  ;;  %v1414_v25 = vld [vmem:[%s2294_s3 + $0xc] sm:$0xf0]  ;;  %v1864_v26 = vor.u32 %v1416_v6, %v1252_v15 }
  0x14   :  { %228 = vmatpush.bf16.msra.mxu0 %v1777_v53  ;;  %253 = vmatpush.bf16.msra.mxu2 %v1779_v54  ;;  %v1866_v27 = vor.u32 %v1417_v18, %v1260_v19  ;;  %v1412_v29 = vld [vmem:[%s2294_s3 + $0x4] sm:$0xf]  ;;  %v1258_v30 = vld [vmem:[%s2294_s3 + $0x28] sm:$0xf]  ;;  %v1419_v31 = vld [vmem:[%s2294_s3 + $0x34] sm:$0xf0]  ;;  %v1888_v38 = vor.u32 %v1414_v25, %v1234_v24 }
  0x15   :  { %241 = vmatpush.bf16.msra.mxu1 %v1789_v57  ;;  %267 = vmatpush.bf16.msra.mxu3 %v1791_v58  ;;  %23 = vst [vmem:[#allocation2] sm:$0xf] %v22_v20  ;;  %v1236_v35 = vld [vmem:[%s2294_s3 + $0x10] sm:$0xf0]  ;;  %v1413_v36 = vld [vmem:[%s2294_s3 + $0xc] sm:$0xf]  ;;  %v1890_v39 = vor.u32 %v1419_v31, %v1258_v30 }
  0x16   :  { %v1244_v37 = vld [vmem:[%s2294_s3 + $0x18] sm:$0xf0]  ;;  %v1894_v40 = vor.u32 %v1412_v29, %v1236_v35  ;;  %v1242_v44 = vld [vmem:[%s2294_s3 + $0x8] sm:$0xf]  ;;  %v1415_v47 = vld [vmem:[%s2294_s3 + $0x14] sm:$0xf0] }
  0x17   :  { %v1896_v43 = vor.u32 %v1413_v36, %v1244_v37  ;;  %v1908_v49 = vor.u32 %v1415_v47, %v1242_v44  ;;  %v60_v50 = vld [vmem:[%s2296_s0] sm:$0xff]  ;;  %v61_v51 = vld [vmem:[%s2296_s0 + $0x8] sm:$0xff]  ;;  %v63_v62 = vld [vmem:[%s2296_s0 + $0x18] sm:$0xff] }
  0x18   :  { %229 = vmatpush.bf16.msra.mxu0 %v1813_v1  ;;  %254 = vmatpush.bf16.msra.mxu2 %v1815_v2  ;;  %v62_v19 = vld [vmem:[%s2296_s0 + $0x10] sm:$0xff] }
  0x19   :  { %242 = vmatpush.bf16.msra.mxu1 %v1828_v9  ;;  %268 = vmatpush.bf16.msra.mxu3 %v1830_v10 }
  0x1c   :  { %230 = vmatpush.bf16.msra.mxu0 %v1852_v22  ;;  %255 = vmatpush.bf16.msra.mxu2 %v1854_v23  ;;  %v58_v48 = vld [vmem:[#allocation2] sm:$0xf] }
  0x1d   :  { %243 = vmatpush.bf16.msra.mxu1 %v1864_v26  ;;  %269 = vmatpush.bf16.msra.mxu3 %v1866_v27 }
  0x20   :  { %231 = vmatpush.bf16.msra.mxu0 %v1888_v38  ;;  %256 = vmatpush.bf16.msra.mxu2 %v1890_v39 }
  0x21   :  { %244 = vmatpush.bf16.msra.mxu1 %v1894_v40  ;;  %270 = vmatpush.bf16.msra.mxu3 %v1896_v43 }
  0x23   :  { %232 = vmatmul.bf16.vlgmr.msra.gmra.mxu0 %v58_v48 }
  0x24   :  { %346 = vmatpush.bf16.msrb.mxu0 %v1629_v3  ;;  %245 = vmatmul.bf16.vlgmr.msra.gmra.mxu1 %v58_v48 }
  0x25   :  { %359 = vmatpush.bf16.msrb.mxu1 %v1640_v7  ;;  %385 = vmatpush.bf16.msrb.mxu3 %v1642_v8 }
  0x26   :  { %271 = vmatmul.bf16.vlgmr.msra.gmra.mxu3 %v58_v48  ;;  %257 = vmatpush.bf16.msra.mxu2 %v1908_v49 }
  0x28   :  { %347 = vmatpush.bf16.msrb.mxu0 %v1654_v12 }
  0x29   :  { %360 = vmatpush.bf16.msrb.mxu1 %v1667_v16  ;;  %386 = vmatpush.bf16.msrb.mxu3 %v1669_v17 }
  0x2a   :  { %372 = vmatpush.bf16.msrb.mxu2 %v1680_v21 }
  0x2b   :  { %258 = vmatmul.bf16.vlgmr.msra.gmra.mxu2 %v58_v48 }
  0x2c   :  { %348 = vmatpush.bf16.msrb.mxu0 %v1702_v28 }
  0x2d   :  { %361 = vmatpush.bf16.msrb.mxu1 %v1715_v32  ;;  %387 = vmatpush.bf16.msrb.mxu3 %v1717_v33 }
  0x2e   :  { %373 = vmatpush.bf16.msrb.mxu2 %v1719_v34 }
  0x30   :  { %349 = vmatpush.bf16.msrb.mxu0 %v1741_v41 }
  0x31   :  { %362 = vmatpush.bf16.msrb.mxu1 %v1753_v45  ;;  %388 = vmatpush.bf16.msrb.mxu3 %v1755_v46 }
  0x32   :  { %374 = vmatpush.bf16.msrb.mxu2 %v1743_v42 }
  0x34   :  { %350 = vmatpush.bf16.msrb.mxu0 %v1777_v53 }
  0x35   :  { %363 = vmatpush.bf16.msrb.mxu1 %v1789_v57  ;;  %389 = vmatpush.bf16.msrb.mxu3 %v1791_v58 }
  0x36   :  { %375 = vmatpush.bf16.msrb.mxu2 %v1779_v54 }
  0x38   :  { %351 = vmatpush.bf16.msrb.mxu0 %v1813_v1 }
  0x39   :  { %364 = vmatpush.bf16.msrb.mxu1 %v1828_v9  ;;  %390 = vmatpush.bf16.msrb.mxu3 %v1830_v10 }
  0x3a   :  { %376 = vmatpush.bf16.msrb.mxu2 %v1815_v2 }
  0x3c   :  { %352 = vmatpush.bf16.msrb.mxu0 %v1852_v22 }
  0x3d   :  { %365 = vmatpush.bf16.msrb.mxu1 %v1864_v26  ;;  %391 = vmatpush.bf16.msrb.mxu3 %v1866_v27 }
  0x3e   :  { %377 = vmatpush.bf16.msrb.mxu2 %v1854_v23 }
  0x40   :  { %353 = vmatpush.bf16.msrb.mxu0 %v1888_v38 }
  0x41   :  { %366 = vmatpush.bf16.msrb.mxu1 %v1894_v40  ;;  %392 = vmatpush.bf16.msrb.mxu3 %v1896_v43 }
  0x42   :  { %378 = vmatpush.bf16.msrb.mxu2 %v1890_v39 }
  0x44   :  { %469 = vmatpush.bf16.msra.mxu0 %v1629_v3 }
  0x45   :  { %482 = vmatpush.bf16.msra.mxu1 %v1640_v7  ;;  %508 = vmatpush.bf16.msra.mxu3 %v1642_v8 }
  0x46   :  { %379 = vmatpush.bf16.msrb.mxu2 %v1908_v49 }
  0x48   :  { %470 = vmatpush.bf16.msra.mxu0 %v1654_v12 }
  0x49   :  { %483 = vmatpush.bf16.msra.mxu1 %v1667_v16  ;;  %509 = vmatpush.bf16.msra.mxu3 %v1669_v17 }
  0x4a   :  { %495 = vmatpush.bf16.msra.mxu2 %v1680_v21 }
  0x4c   :  { %471 = vmatpush.bf16.msra.mxu0 %v1702_v28 }
  0x4d   :  { %484 = vmatpush.bf16.msra.mxu1 %v1715_v32  ;;  %510 = vmatpush.bf16.msra.mxu3 %v1717_v33 }
  0x4e   :  { %496 = vmatpush.bf16.msra.mxu2 %v1719_v34 }
  0x50   :  { %472 = vmatpush.bf16.msra.mxu0 %v1741_v41 }
  0x51   :  { %485 = vmatpush.bf16.msra.mxu1 %v1753_v45  ;;  %511 = vmatpush.bf16.msra.mxu3 %v1755_v46 }
  0x52   :  { %497 = vmatpush.bf16.msra.mxu2 %v1743_v42 }
  0x54   :  { %473 = vmatpush.bf16.msra.mxu0 %v1777_v53 }
  0x55   :  { %486 = vmatpush.bf16.msra.mxu1 %v1789_v57  ;;  %512 = vmatpush.bf16.msra.mxu3 %v1791_v58 }
  0x56   :  { %498 = vmatpush.bf16.msra.mxu2 %v1779_v54 }
  0x58   :  { %474 = vmatpush.bf16.msra.mxu0 %v1813_v1 }
  0x59   :  { %487 = vmatpush.bf16.msra.mxu1 %v1828_v9  ;;  %513 = vmatpush.bf16.msra.mxu3 %v1830_v10 }
  0x5a   :  { %499 = vmatpush.bf16.msra.mxu2 %v1815_v2 }
  0x5c   :  { %475 = vmatpush.bf16.msra.mxu0 %v1852_v22 }
  0x5d   :  { %488 = vmatpush.bf16.msra.mxu1 %v1864_v26  ;;  %514 = vmatpush.bf16.msra.mxu3 %v1866_v27 }
  0x5e   :  { %500 = vmatpush.bf16.msra.mxu2 %v1854_v23 }
  0x60   :  { %476 = vmatpush.bf16.msra.mxu0 %v1888_v38 }
  0x61   :  { %489 = vmatpush.bf16.msra.mxu1 %v1894_v40  ;;  %515 = vmatpush.bf16.msra.mxu3 %v1896_v43 }
  0x62   :  { %501 = vmatpush.bf16.msra.mxu2 %v1890_v39 }
  0x66   :  { %502 = vmatpush.bf16.msra.mxu2 %v1908_v49 }
  0xa0   :  { %v233_v52 = vpop.f32.mrf.mxu0 }
  0xa1   :  { %v234_v55 = vadd.f32 %v233_v52, %v60_v50  ;;  %v246_v56 = vpop.f32.mrf.mxu1 }
  0xa2   :  { %v247_v59 = vadd.f32 %v246_v56, %v61_v51 }
  0xa3   :  { %v1360_v60 = vmul.f32 -1.442695, %v234_v55 }
  0xa4   :  { %v1361_v61 = vmul.f32 -1.442695, %v247_v59 }
  0xa5   :  { %1467 = vpow2.f32 %v1360_v60 }
  0xa6   :  { %1469 = vpow2.f32 %v1361_v61 }
  0xa8   :  { %v235_v4 = vpop.f32.mrf.mxu0 }
  0xa9   :  { %v272_v63 = vpop.f32.mrf.mxu3  ;;  %v248_v5 = vpop.f32.mrf.mxu1 }
  0xaa   :  { %v273_v0 = vadd.f32 %v272_v63, %v63_v62  ;;  %v24_v5 = vld [vmem:[%s2297_s2] sm:$0xff] }
  0xab   :  { %v1468_v11 = vpop.eup %1467 }
  0xac   :  { %v1362_v6 = vmul.f32 -1.442695, %v273_v0  ;;  %v1470_v14 = vpop.eup %1469  ;;  %v279_v15 = vadd.f32 1.0, %v1468_v11 }
  0xad   :  { %v298_v18 = vadd.f32 1.0, %v1470_v14 }
  0xae   :  { %v259_v13 = vpop.f32.mrf.mxu2  ;;  %1471 = vpow2.f32 %v1362_v6  ;;  %v291_v48 = vand.u32 2147483648, %v279_v15  ;;  %v289_v52 = vand.u32 2147483647, %v279_v15  ;;  %vm285_vm2 = vweird.f32 %v279_v15 }
  0xaf   :  { %1473 = vrcp.f32 %v279_v15  ;;  %v260_v25 = vadd.f32 %v259_v13, %v62_v19  ;;  %v310_v50 = vand.u32 2147483648, %v298_v18  ;;  %v308_v56 = vand.u32 2147483647, %v298_v18 }
  0xb0   :  { %1475 = vrcp.f32 %v298_v18  ;;  %vm304_vm3 = vweird.f32 %v298_v18  ;;  %v292_v63 = vor.u32 1.1754944e-38, %v291_v48  ;;  %vm290_vm6 = vcmp.eq.f32.partialorder %v289_v52, 8.507059e+37 }
  0xb1   :  { %v274_v20 = vpop.f32.mrf.mxu3  ;;  %v311_v4 = vor.u32 1.1754944e-38, %v310_v50  ;;  %vm309_vm7 = vcmp.eq.f32.partialorder %v308_v56, 8.507059e+37  ;;  %v1364_v50 = vld [vmem:[%s2296_s0 + $0x28] sm:$0xff] }
  0xb4   :  { %v1472_v24 = vpop.eup %1471 }
  0xb5   :  { %v318_v29 = vadd.f32 1.0, %v1472_v24  ;;  %v1474_v31 = vpop.eup %1473 }
  0xb6   :  { %v261_v30 = vpop.f32.mrf.mxu2  ;;  %v1476_v35 = vpop.eup %1475  ;;  %v281_v36 = vmul.f32 %v1474_v31, %v279_v15  ;;  %vm286_vm0 = vweird.f32 %v1474_v31 }
  0xb7   :  { %1477 = vrcp.f32 %v318_v29  ;;  %v300_v37 = vmul.f32 %v1476_v35, %v298_v18  ;;  %vm305_vm1 = vweird.f32 %v1476_v35  ;;  %vm287_vm4 = vmor %vm285_vm2, %vm286_vm0  ;;  %v330_v30 = vand.u32 2147483648, %v318_v29 }
  0xb8   :  { %1479 = vtanh.f32 %v260_v25  ;;  %v282_v44 = vsub.f32 1.0, %v281_v36  ;;  %vm306_vm5 = vmor %vm304_vm3, %vm305_vm1  ;;  %vm324_vm9 = vweird.f32 %v318_v29  ;;  %v328_v36 = vand.u32 2147483647, %v318_v29 }
  0xb9   :  { %v301_v47 = vsub.f32 1.0, %v300_v37  ;;  %v331_v37 = vor.u32 1.1754944e-38, %v330_v30 }
  0xba   :  { %v283_v51 = vmul.f32 %v1474_v31, %v282_v44  ;;  %vm329_vm11 = vcmp.eq.f32.partialorder %v328_v36, 8.507059e+37 }
  0xbb   :  { %v302_v55 = vmul.f32 %v1476_v35, %v301_v47 }
  0xbc   :  { %v284_v60 = vadd.f32 %v1474_v31, %v283_v51 }
  0xbd   :  { %v1478_v59 = vpop.eup %1477  ;;  %v303_v0 = vadd.f32 %v1476_v35, %v302_v55 }
  0xbe   :  { %v1480_v61 = vpop.eup %1479  ;;  %v320_v62 = vmul.f32 %v1478_v59, %v318_v29  ;;  %v288_v6 = vsel %vm287_vm4, %v1474_v31, %v284_v60  ;;  %vm325_vm8 = vweird.f32 %v1478_v59  ;;  %v1363_v29 = vld [vmem:[%s2296_s0 + $0x20] sm:$0xff] }
  0xbf   :  { %v293_v13 = vsel %vm290_vm6, %v292_v63, %v288_v6  ;;  %v307_v14 = vsel %vm306_vm5, %v1476_v35, %v303_v0  ;;  %vm326_vm10 = vmor %vm324_vm9, %vm325_vm8 }
  0xc0   :  { %v321_v11 = vsub.f32 1.0, %v320_v62  ;;  %v312_v19 = vsel %vm309_vm7, %v311_v4, %v307_v14  ;;  %v335_v15 = vmul.f32 %v1480_v61, %v293_v13  ;;  %v1366_v61 = vld [vmem:[%s2296_s0 + $0x38] sm:$0xff] }
  0xc1   :  { %v334_v18 = vmul.f32 %v312_v19, %v24_v5 }
  0xc2   :  { %v322_v20 = vmul.f32 %v1478_v59, %v321_v11 }
  0xc3   :  { %v1990_v24 = vadd.f32 %v335_v15, %v334_v18  ;;  %v1365_v18 = vld [vmem:[%s2296_s0 + $0x30] sm:$0xff] }
  0xc4   :  { %v323_v25 = vadd.f32 %v1478_v59, %v322_v20 }
  0xc5   :  { %1481 = vtanh.f32 %v1990_v24 }
  0xc6   :  { %v327_v31 = vsel %vm326_vm10, %v1478_v59, %v323_v25 }
  0xc7   :  { %v332_v35 = vsel %vm329_vm11, %v331_v37, %v327_v31 }
  0xcb   :  { %v1482_v44 = vpop.eup %1481 }
  0xcc   :  { %v1993_v47 = vmul.f32 %v1482_v44, %v332_v35 }
  0xce   :  { %v340_v48 = vpack.c.bf16 %v1993_v47, %v1993_v47 }
  0xd0   :  { %354 = vmatmul.bf16.vlgmr.msrb.gmra.mxu0 %v340_v48  ;;  %367 = vmatmul.bf16.vlgmr.msrb.gmra.mxu1 %v340_v48 }
  0xd1   :  { %380 = vmatmul.bf16.vlgmr.msrb.gmra.mxu2 %v340_v48  ;;  %393 = vmatmul.bf16.vlgmr.msrb.gmra.mxu3 %v340_v48 }
  0xd2   :  { %592 = vmatpush.bf16.msrb.mxu0 %v1629_v3  ;;  %605 = vmatpush.bf16.msrb.mxu1 %v1640_v7 }
  0xd3   :  { %618 = vmatpush.bf16.msrb.mxu2 %v1680_v21  ;;  %631 = vmatpush.bf16.msrb.mxu3 %v1642_v8 }
  0xd6   :  { %593 = vmatpush.bf16.msrb.mxu0 %v1654_v12  ;;  %606 = vmatpush.bf16.msrb.mxu1 %v1667_v16 }
  0xd7   :  { %619 = vmatpush.bf16.msrb.mxu2 %v1719_v34  ;;  %632 = vmatpush.bf16.msrb.mxu3 %v1669_v17 }
  0xda   :  { %594 = vmatpush.bf16.msrb.mxu0 %v1702_v28  ;;  %607 = vmatpush.bf16.msrb.mxu1 %v1715_v32 }
  0xdb   :  { %620 = vmatpush.bf16.msrb.mxu2 %v1743_v42  ;;  %633 = vmatpush.bf16.msrb.mxu3 %v1717_v33 }
  0xde   :  { %595 = vmatpush.bf16.msrb.mxu0 %v1741_v41  ;;  %608 = vmatpush.bf16.msrb.mxu1 %v1753_v45 }
  0xdf   :  { %621 = vmatpush.bf16.msrb.mxu2 %v1779_v54  ;;  %634 = vmatpush.bf16.msrb.mxu3 %v1755_v46 }
  0xe2   :  { %596 = vmatpush.bf16.msrb.mxu0 %v1777_v53  ;;  %609 = vmatpush.bf16.msrb.mxu1 %v1789_v57 }
  0xe3   :  { %622 = vmatpush.bf16.msrb.mxu2 %v1815_v2  ;;  %635 = vmatpush.bf16.msrb.mxu3 %v1791_v58 }
  0xe6   :  { %597 = vmatpush.bf16.msrb.mxu0 %v1813_v1  ;;  %610 = vmatpush.bf16.msrb.mxu1 %v1828_v9 }
  0xe7   :  { %623 = vmatpush.bf16.msrb.mxu2 %v1854_v23  ;;  %636 = vmatpush.bf16.msrb.mxu3 %v1830_v10 }
  0xea   :  { %598 = vmatpush.bf16.msrb.mxu0 %v1852_v22  ;;  %611 = vmatpush.bf16.msrb.mxu1 %v1864_v26 }
  0xeb   :  { %624 = vmatpush.bf16.msrb.mxu2 %v1890_v39  ;;  %637 = vmatpush.bf16.msrb.mxu3 %v1866_v27 }
  0xee   :  { %599 = vmatpush.bf16.msrb.mxu0 %v1888_v38  ;;  %612 = vmatpush.bf16.msrb.mxu1 %v1894_v40 }
  0xef   :  { %625 = vmatpush.bf16.msrb.mxu2 %v1908_v49  ;;  %638 = vmatpush.bf16.msrb.mxu3 %v1896_v43 }
 0x14d   :  { %v355_v51 = vpop.f32.mrf.mxu0  ;;  %v368_v52 = vpop.f32.mrf.mxu1 }
 0x14e   :  { %v356_v55 = vadd.f32 %v1363_v29, %v355_v51  ;;  %v369_v56 = vadd.f32 %v1364_v50, %v368_v52 }
 0x150   :  { %v1367_v59 = vmul.f32 -1.442695, %v356_v55  ;;  %v1368_v60 = vmul.f32 -1.442695, %v369_v56 }
 0x152   :  { %1483 = vpow2.f32 %v1367_v59 }
 0x153   :  { %1485 = vpow2.f32 %v1368_v60 }
 0x154   :  { %v381_v62 = vpop.f32.mrf.mxu2  ;;  %v394_v63 = vpop.f32.mrf.mxu3 }
 0x155   :  { %v395_v0 = vadd.f32 %v1366_v61, %v394_v63  ;;  %v357_v4 = vpop.f32.mrf.mxu0  ;;  %v370_v5 = vpop.f32.mrf.mxu1  ;;  %v382_v31 = vadd.f32 %v1365_v18, %v381_v62 }
 0x157   :  { %v1369_v6 = vmul.f32 -1.442695, %v395_v0 }
 0x158   :  { %v1484_v11 = vpop.eup %1483 }
 0x159   :  { %v1486_v13 = vpop.eup %1485  ;;  %v401_v14 = vadd.f32 1.0, %v1484_v11  ;;  %1487 = vpow2.f32 %v1369_v6 }
 0x15a   :  { %v420_v19 = vadd.f32 1.0, %v1486_v13 }
 0x15b   :  { %1489 = vrcp.f32 %v401_v14  ;;  %v413_v50 = vand.u32 2147483648, %v401_v14  ;;  %v411_v55 = vand.u32 2147483647, %v401_v14  ;;  %vm407_vm14 = vweird.f32 %v401_v14 }
 0x15c   :  { %1491 = vrcp.f32 %v420_v19  ;;  %v383_v15 = vpop.f32.mrf.mxu2  ;;  %v396_v20 = vpop.f32.mrf.mxu3  ;;  %v432_v51 = vand.u32 2147483648, %v420_v19  ;;  %v430_v59 = vand.u32 2147483647, %v420_v19  ;;  %vm426_vm15 = vweird.f32 %v420_v19 }
 0x15d   :  { %v414_v62 = vor.u32 1.1754944e-38, %v413_v50  ;;  %vm412_vm2 = vcmp.eq.f32.partialorder %v411_v55, 8.507059e+37 }
 0x15e   :  { %v433_v4 = vor.u32 1.1754944e-38, %v432_v51  ;;  %vm431_vm3 = vcmp.eq.f32.partialorder %v430_v59, 8.507059e+37 }
 0x15f   :  { %v1488_v25 = vpop.eup %1487 }
 0x160   :  { %v440_v30 = vadd.f32 1.0, %v1488_v25 }
 0x161   :  { %v1490_v36 = vpop.eup %1489 }
 0x162   :  { %v1492_v37 = vpop.eup %1491  ;;  %v403_v44 = vmul.f32 %v1490_v36, %v401_v14  ;;  %1493 = vrcp.f32 %v440_v30  ;;  %vm408_vm12 = vweird.f32 %v1490_v36  ;;  %vm446_vm5 = vweird.f32 %v440_v30 }
 0x163   :  { %v422_v35 = vmul.f32 %v1492_v37, %v420_v19  ;;  %1495 = vtanh.f32 %v382_v31  ;;  %vm427_vm13 = vweird.f32 %v1492_v37  ;;  %vm409_vm0 = vmor %vm407_vm14, %vm408_vm12 }
 0x164   :  { %v404_v48 = vsub.f32 1.0, %v403_v44  ;;  %vm428_vm1 = vmor %vm426_vm15, %vm427_vm13  ;;  %v452_v44 = vand.u32 2147483648, %v440_v30 }
 0x165   :  { %v423_v29 = vsub.f32 1.0, %v422_v35 }
 0x166   :  { %v405_v52 = vmul.f32 %v1490_v36, %v404_v48  ;;  %v453_v48 = vor.u32 1.1754944e-38, %v452_v44 }
 0x167   :  { %v424_v56 = vmul.f32 %v1492_v37, %v423_v29 }
 0x168   :  { %v1494_v60 = vpop.eup %1493  ;;  %v406_v61 = vadd.f32 %v1490_v36, %v405_v52 }
 0x169   :  { %v425_v63 = vadd.f32 %v1492_v37, %v424_v56  ;;  %v442_v0 = vmul.f32 %v1494_v60, %v440_v30  ;;  %v1496_v6 = vpop.eup %1495  ;;  %vm447_vm4 = vweird.f32 %v1494_v60 }
 0x16a   :  { %v410_v5 = vsel %vm409_vm0, %v1490_v36, %v406_v61  ;;  %v450_v36 = vand.u32 2147483647, %v440_v30  ;;  %vm448_vm6 = vmor %vm446_vm5, %vm447_vm4  ;;  %v1371_v30 = vld [vmem:[%s2296_s0 + $0x48] sm:$0xff] }
 0x16b   :  { %v415_v11 = vsel %vm412_vm2, %v414_v62, %v410_v5  ;;  %v429_v13 = vsel %vm428_vm1, %v1492_v37, %v425_v63  ;;  %v443_v15 = vsub.f32 1.0, %v442_v0  ;;  %v1373_v62 = vld [vmem:[%s2296_s0 + $0x58] sm:$0xff] }
 0x16c   :  { %v434_v20 = vsel %vm431_vm3, %v433_v4, %v429_v13  ;;  %v457_v18 = vmul.f32 %v1496_v6, %v415_v11  ;;  %vm451_vm7 = vcmp.eq.f32.partialorder %v450_v36, 8.507059e+37 }
 0x16d   :  { %v456_v25 = vmul.f32 %v434_v20, %v1990_v24  ;;  %v444_v31 = vmul.f32 %v1494_v60, %v443_v15 }
 0x16f   :  { %v2042_v14 = vadd.f32 %v457_v18, %v456_v25  ;;  %v445_v19 = vadd.f32 %v1494_v60, %v444_v31 }
 0x171   :  { %1497 = vtanh.f32 %v2042_v14  ;;  %v449_v35 = vsel %vm448_vm6, %v1494_v60, %v445_v19  ;;  %v1372_v19 = vld [vmem:[%s2296_s0 + $0x50] sm:$0xff] }
 0x172   :  { %v454_v29 = vsel %vm451_vm7, %v453_v48, %v449_v35 }
 0x177   :  { %v1498_v37 = vpop.eup %1497 }
 0x178   :  { %v460_v50 = vmul.f32 %v1498_v37, %v454_v29 }
 0x17a   :  { %v463_v51 = vpack.c.bf16 %v460_v50, %v460_v50  ;;  %v1447_v24 = vpack.c.bf16 %v460_v50, %v1993_v47  ;;  %v1370_v47 = vld [vmem:[%s2296_s0 + $0x40] sm:$0xff] }
 0x17c   :  { %477 = vmatmul.bf16.vlgmr.msra.gmra.mxu0 %v463_v51  ;;  %1448 = vst [vmem:[%s2298_s4] sm:$0xff] %v1447_v24   ;;  %490 = vmatmul.bf16.vlgmr.msra.gmra.mxu1 %v463_v51 }
 0x17d   :  { %503 = vmatmul.bf16.vlgmr.msra.gmra.mxu2 %v463_v51  ;;  %516 = vmatmul.bf16.vlgmr.msra.gmra.mxu3 %v463_v51 }
 0x17e   :  { %715 = vmatpush.bf16.msra.mxu0 %v1629_v3  ;;  %728 = vmatpush.bf16.msra.mxu1 %v1640_v7 }
 0x17f   :  { %741 = vmatpush.bf16.msra.mxu2 %v1680_v21  ;;  %754 = vmatpush.bf16.msra.mxu3 %v1642_v8 }
 0x182   :  { %716 = vmatpush.bf16.msra.mxu0 %v1654_v12  ;;  %729 = vmatpush.bf16.msra.mxu1 %v1667_v16 }
 0x183   :  { %742 = vmatpush.bf16.msra.mxu2 %v1719_v34  ;;  %755 = vmatpush.bf16.msra.mxu3 %v1669_v17 }
 0x186   :  { %717 = vmatpush.bf16.msra.mxu0 %v1702_v28  ;;  %730 = vmatpush.bf16.msra.mxu1 %v1715_v32 }
 0x187   :  { %743 = vmatpush.bf16.msra.mxu2 %v1743_v42  ;;  %756 = vmatpush.bf16.msra.mxu3 %v1717_v33 }
 0x18a   :  { %718 = vmatpush.bf16.msra.mxu0 %v1741_v41  ;;  %731 = vmatpush.bf16.msra.mxu1 %v1753_v45 }
 0x18b   :  { %744 = vmatpush.bf16.msra.mxu2 %v1779_v54  ;;  %757 = vmatpush.bf16.msra.mxu3 %v1755_v46 }
 0x18e   :  { %719 = vmatpush.bf16.msra.mxu0 %v1777_v53  ;;  %732 = vmatpush.bf16.msra.mxu1 %v1789_v57 }
 0x18f   :  { %745 = vmatpush.bf16.msra.mxu2 %v1815_v2  ;;  %758 = vmatpush.bf16.msra.mxu3 %v1791_v58 }
 0x192   :  { %720 = vmatpush.bf16.msra.mxu0 %v1813_v1  ;;  %733 = vmatpush.bf16.msra.mxu1 %v1828_v9 }
 0x193   :  { %746 = vmatpush.bf16.msra.mxu2 %v1854_v23  ;;  %759 = vmatpush.bf16.msra.mxu3 %v1830_v10 }
 0x196   :  { %721 = vmatpush.bf16.msra.mxu0 %v1852_v22  ;;  %734 = vmatpush.bf16.msra.mxu1 %v1864_v26 }
 0x197   :  { %747 = vmatpush.bf16.msra.mxu2 %v1890_v39  ;;  %760 = vmatpush.bf16.msra.mxu3 %v1866_v27 }
 0x19a   :  { %722 = vmatpush.bf16.msra.mxu0 %v1888_v38  ;;  %735 = vmatpush.bf16.msra.mxu1 %v1894_v40 }
 0x19b   :  { %748 = vmatpush.bf16.msra.mxu2 %v1908_v49  ;;  %761 = vmatpush.bf16.msra.mxu3 %v1896_v43 }
 0x1f9   :  { %v478_v52 = vpop.f32.mrf.mxu0  ;;  %v491_v55 = vpop.f32.mrf.mxu1 }
 0x1fa   :  { %v479_v56 = vadd.f32 %v1370_v47, %v478_v52  ;;  %v492_v59 = vadd.f32 %v1371_v30, %v491_v55 }
 0x1fc   :  { %v1374_v60 = vmul.f32 -1.442695, %v479_v56  ;;  %v1375_v61 = vmul.f32 -1.442695, %v492_v59 }
 0x1fe   :  { %1499 = vpow2.f32 %v1374_v60 }
 0x1ff   :  { %1501 = vpow2.f32 %v1375_v61 }
 0x200   :  { %v504_v63 = vpop.f32.mrf.mxu2  ;;  %v517_v0 = vpop.f32.mrf.mxu3 }
 0x201   :  { %v518_v4 = vadd.f32 %v1373_v62, %v517_v0  ;;  %v480_v5 = vpop.f32.mrf.mxu0  ;;  %v493_v6 = vpop.f32.mrf.mxu1  ;;  %v505_v48 = vadd.f32 %v1372_v19, %v504_v63 }
 0x203   :  { %v1376_v11 = vmul.f32 -1.442695, %v518_v4 }
 0x204   :  { %v1500_v13 = vpop.eup %1499 }
 0x205   :  { %v1502_v15 = vpop.eup %1501  ;;  %v524_v20 = vadd.f32 1.0, %v1500_v13  ;;  %1503 = vpow2.f32 %v1376_v11 }
 0x206   :  { %v543_v18 = vadd.f32 1.0, %v1502_v15 }
 0x207   :  { %1505 = vrcp.f32 %v524_v20  ;;  %v536_v47 = vand.u32 2147483648, %v524_v20  ;;  %v534_v55 = vand.u32 2147483647, %v524_v20  ;;  %vm530_vm10 = vweird.f32 %v524_v20 }
 0x208   :  { %1507 = vrcp.f32 %v543_v18  ;;  %v506_v25 = vpop.f32.mrf.mxu2  ;;  %v519_v31 = vpop.f32.mrf.mxu3  ;;  %v555_v30 = vand.u32 2147483648, %v543_v18  ;;  %v553_v59 = vand.u32 2147483647, %v543_v18  ;;  %vm549_vm11 = vweird.f32 %v543_v18 }
 0x209   :  { %v537_v62 = vor.u32 1.1754944e-38, %v536_v47  ;;  %vm535_vm14 = vcmp.eq.f32.partialorder %v534_v55, 8.507059e+37  ;;  %v1378_v47 = vld [vmem:[%s2296_s0 + $0x68] sm:$0xff] }
 0x20a   :  { %v556_v4 = vor.u32 1.1754944e-38, %v555_v30  ;;  %vm554_vm15 = vcmp.eq.f32.partialorder %v553_v59, 8.507059e+37 }
 0x20b   :  { %v1504_v44 = vpop.eup %1503 }
 0x20c   :  { %v563_v36 = vadd.f32 1.0, %v1504_v44 }
 0x20d   :  { %v1506_v35 = vpop.eup %1505 }
 0x20e   :  { %v1508_v37 = vpop.eup %1507  ;;  %v526_v29 = vmul.f32 %v1506_v35, %v524_v20  ;;  %1509 = vrcp.f32 %v563_v36  ;;  %vm531_vm8 = vweird.f32 %v1506_v35  ;;  %vm569_vm1 = vweird.f32 %v563_v36 }
 0x20f   :  { %v545_v50 = vmul.f32 %v1508_v37, %v543_v18  ;;  %1511 = vtanh.f32 %v505_v48  ;;  %vm550_vm9 = vweird.f32 %v1508_v37  ;;  %vm532_vm12 = vmor %vm530_vm10, %vm531_vm8  ;;  %v575_v48 = vand.u32 2147483648, %v563_v36 }
 0x210   :  { %v527_v51 = vsub.f32 1.0, %v526_v29  ;;  %vm551_vm13 = vmor %vm549_vm11, %vm550_vm9 }
 0x211   :  { %v546_v24 = vsub.f32 1.0, %v545_v50  ;;  %v576_v50 = vor.u32 1.1754944e-38, %v575_v48 }
 0x212   :  { %v528_v52 = vmul.f32 %v1506_v35, %v527_v51 }
 0x213   :  { %v547_v56 = vmul.f32 %v1508_v37, %v546_v24 }
 0x214   :  { %v1510_v60 = vpop.eup %1509  ;;  %v529_v61 = vadd.f32 %v1506_v35, %v528_v52 }
 0x215   :  { %v548_v63 = vadd.f32 %v1508_v37, %v547_v56  ;;  %v565_v0 = vmul.f32 %v1510_v60, %v563_v36  ;;  %v1512_v6 = vpop.eup %1511  ;;  %vm570_vm0 = vweird.f32 %v1510_v60 }
 0x216   :  { %v533_v5 = vsel %vm532_vm12, %v1506_v35, %v529_v61  ;;  %v573_v35 = vand.u32 2147483647, %v563_v36  ;;  %vm571_vm2 = vmor %vm569_vm1, %vm570_vm0  ;;  %v1377_v36 = vld [vmem:[%s2296_s0 + $0x60] sm:$0xff]  ;;  %v1380_v61 = vld [vmem:[%s2296_s0 + $0x78] sm:$0xff] }
 0x217   :  { %v538_v11 = vsel %vm535_vm14, %v537_v62, %v533_v5  ;;  %v552_v13 = vsel %vm551_vm13, %v1508_v37, %v548_v63  ;;  %v566_v15 = vsub.f32 1.0, %v565_v0 }
 0x218   :  { %v557_v25 = vsel %vm554_vm15, %v556_v4, %v552_v13  ;;  %v580_v31 = vmul.f32 %v1512_v6, %v538_v11  ;;  %vm574_vm3 = vcmp.eq.f32.partialorder %v573_v35, 8.507059e+37 }
 0x219   :  { %v579_v19 = vmul.f32 %v557_v25, %v2042_v14  ;;  %v567_v44 = vmul.f32 %v1510_v60, %v566_v15 }
 0x21b   :  { %v2094_v20 = vadd.f32 %v580_v31, %v579_v19  ;;  %v568_v18 = vadd.f32 %v1510_v60, %v567_v44  ;;  %v1379_v44 = vld [vmem:[%s2296_s0 + $0x70] sm:$0xff] }
 0x21d   :  { %1513 = vtanh.f32 %v2094_v20  ;;  %v572_v29 = vsel %vm571_vm2, %v1510_v60, %v568_v18 }
 0x21e   :  { %v577_v51 = vsel %vm574_vm3, %v576_v50, %v572_v29 }
 0x223   :  { %v1514_v37 = vpop.eup %1513 }
 0x224   :  { %v2097_v24 = vmul.f32 %v1514_v37, %v577_v51 }
 0x226   :  { %v586_v14 = vpack.c.bf16 %v2097_v24, %v2097_v24 }
 0x228   :  { %600 = vmatmul.bf16.vlgmr.msrb.gmra.mxu0 %v586_v14  ;;  %613 = vmatmul.bf16.vlgmr.msrb.gmra.mxu1 %v586_v14 }
 0x229   :  { %626 = vmatmul.bf16.vlgmr.msrb.gmra.mxu2 %v586_v14  ;;  %639 = vmatmul.bf16.vlgmr.msrb.gmra.mxu3 %v586_v14 }
 0x22a   :  { %838 = vmatpush.bf16.msrb.mxu0 %v1629_v3  ;;  %851 = vmatpush.bf16.msrb.mxu1 %v1640_v7 }
 0x22b   :  { %864 = vmatpush.bf16.msrb.mxu2 %v1680_v21  ;;  %877 = vmatpush.bf16.msrb.mxu3 %v1642_v8 }
 0x22e   :  { %839 = vmatpush.bf16.msrb.mxu0 %v1654_v12  ;;  %852 = vmatpush.bf16.msrb.mxu1 %v1667_v16 }
 0x22f   :  { %865 = vmatpush.bf16.msrb.mxu2 %v1719_v34  ;;  %878 = vmatpush.bf16.msrb.mxu3 %v1669_v17 }
 0x232   :  { %840 = vmatpush.bf16.msrb.mxu0 %v1702_v28  ;;  %853 = vmatpush.bf16.msrb.mxu1 %v1715_v32 }
 0x233   :  { %866 = vmatpush.bf16.msrb.mxu2 %v1743_v42  ;;  %879 = vmatpush.bf16.msrb.mxu3 %v1717_v33 }
 0x236   :  { %841 = vmatpush.bf16.msrb.mxu0 %v1741_v41  ;;  %854 = vmatpush.bf16.msrb.mxu1 %v1753_v45 }
 0x237   :  { %867 = vmatpush.bf16.msrb.mxu2 %v1779_v54  ;;  %880 = vmatpush.bf16.msrb.mxu3 %v1755_v46 }
 0x23a   :  { %842 = vmatpush.bf16.msrb.mxu0 %v1777_v53  ;;  %855 = vmatpush.bf16.msrb.mxu1 %v1789_v57 }
 0x23b   :  { %868 = vmatpush.bf16.msrb.mxu2 %v1815_v2  ;;  %881 = vmatpush.bf16.msrb.mxu3 %v1791_v58 }
 0x23e   :  { %843 = vmatpush.bf16.msrb.mxu0 %v1813_v1  ;;  %856 = vmatpush.bf16.msrb.mxu1 %v1828_v9 }
 0x23f   :  { %869 = vmatpush.bf16.msrb.mxu2 %v1854_v23  ;;  %882 = vmatpush.bf16.msrb.mxu3 %v1830_v10 }
 0x242   :  { %844 = vmatpush.bf16.msrb.mxu0 %v1852_v22  ;;  %857 = vmatpush.bf16.msrb.mxu1 %v1864_v26 }
 0x243   :  { %870 = vmatpush.bf16.msrb.mxu2 %v1890_v39  ;;  %883 = vmatpush.bf16.msrb.mxu3 %v1866_v27 }
 0x246   :  { %845 = vmatpush.bf16.msrb.mxu0 %v1888_v38  ;;  %858 = vmatpush.bf16.msrb.mxu1 %v1894_v40 }
 0x247   :  { %871 = vmatpush.bf16.msrb.mxu2 %v1908_v49  ;;  %884 = vmatpush.bf16.msrb.mxu3 %v1896_v43 }
 0x2a5   :  { %v601_v30 = vpop.f32.mrf.mxu0  ;;  %v614_v52 = vpop.f32.mrf.mxu1 }
 0x2a6   :  { %v602_v55 = vadd.f32 %v1377_v36, %v601_v30  ;;  %v615_v56 = vadd.f32 %v1378_v47, %v614_v52 }
 0x2a8   :  { %v1381_v59 = vmul.f32 -1.442695, %v602_v55  ;;  %v1382_v60 = vmul.f32 -1.442695, %v615_v56 }
 0x2aa   :  { %1515 = vpow2.f32 %v1381_v59 }
 0x2ab   :  { %1517 = vpow2.f32 %v1382_v60 }
 0x2ac   :  { %v627_v62 = vpop.f32.mrf.mxu2  ;;  %v640_v63 = vpop.f32.mrf.mxu3 }
 0x2ad   :  { %v641_v0 = vadd.f32 %v1380_v61, %v640_v63  ;;  %v603_v4 = vpop.f32.mrf.mxu0  ;;  %v616_v5 = vpop.f32.mrf.mxu1  ;;  %v628_v29 = vadd.f32 %v1379_v44, %v627_v62 }
 0x2af   :  { %v1383_v6 = vmul.f32 -1.442695, %v641_v0 }
 0x2b0   :  { %v1516_v11 = vpop.eup %1515 }
 0x2b1   :  { %v1518_v13 = vpop.eup %1517  ;;  %v647_v15 = vadd.f32 1.0, %v1516_v11  ;;  %1519 = vpow2.f32 %v1383_v6 }
 0x2b2   :  { %v666_v25 = vadd.f32 1.0, %v1518_v13 }
 0x2b3   :  { %1521 = vrcp.f32 %v647_v15  ;;  %v659_v47 = vand.u32 2147483648, %v647_v15  ;;  %v657_v55 = vand.u32 2147483647, %v647_v15  ;;  %vm653_vm6 = vweird.f32 %v647_v15 }
 0x2b4   :  { %1523 = vrcp.f32 %v666_v25  ;;  %v629_v31 = vpop.f32.mrf.mxu2  ;;  %v642_v19 = vpop.f32.mrf.mxu3  ;;  %v678_v30 = vand.u32 2147483648, %v666_v25  ;;  %v676_v59 = vand.u32 2147483647, %v666_v25  ;;  %vm672_vm7 = vweird.f32 %v666_v25 }
 0x2b5   :  { %v660_v62 = vor.u32 1.1754944e-38, %v659_v47  ;;  %vm658_vm10 = vcmp.eq.f32.partialorder %v657_v55, 8.507059e+37 }
 0x2b6   :  { %v679_v4 = vor.u32 1.1754944e-38, %v678_v30  ;;  %vm677_vm11 = vcmp.eq.f32.partialorder %v676_v59, 8.507059e+37 }
 0x2b7   :  { %v1520_v18 = vpop.eup %1519 }
 0x2b8   :  { %v686_v48 = vadd.f32 1.0, %v1520_v18 }
 0x2b9   :  { %v1522_v35 = vpop.eup %1521 }
 0x2ba   :  { %v1524_v50 = vpop.eup %1523  ;;  %v649_v37 = vmul.f32 %v1522_v35, %v647_v15  ;;  %1525 = vrcp.f32 %v686_v48  ;;  %vm654_vm4 = vweird.f32 %v1522_v35  ;;  %vm692_vm13 = vweird.f32 %v686_v48 }
 0x2bb   :  { %v668_v51 = vmul.f32 %v1524_v50, %v666_v25  ;;  %1527 = vtanh.f32 %v628_v29  ;;  %vm673_vm5 = vweird.f32 %v1524_v50  ;;  %vm655_vm8 = vmor %vm653_vm6, %vm654_vm4 }
 0x2bc   :  { %v650_v14 = vsub.f32 1.0, %v649_v37  ;;  %vm674_vm9 = vmor %vm672_vm7, %vm673_vm5  ;;  %v698_v37 = vand.u32 2147483648, %v686_v48 }
 0x2bd   :  { %v669_v36 = vsub.f32 1.0, %v668_v51 }
 0x2be   :  { %v651_v52 = vmul.f32 %v1522_v35, %v650_v14  ;;  %v699_v14 = vor.u32 1.1754944e-38, %v698_v37 }
 0x2bf   :  { %v670_v56 = vmul.f32 %v1524_v50, %v669_v36 }
 0x2c0   :  { %v1526_v60 = vpop.eup %1525  ;;  %v652_v61 = vadd.f32 %v1522_v35, %v651_v52 }
 0x2c1   :  { %v671_v63 = vadd.f32 %v1524_v50, %v670_v56  ;;  %v688_v0 = vmul.f32 %v1526_v60, %v686_v48  ;;  %v1528_v6 = vpop.eup %1527  ;;  %vm693_vm12 = vweird.f32 %v1526_v60 }
 0x2c2   :  { %v656_v5 = vsel %vm655_vm8, %v1522_v35, %v652_v61  ;;  %v696_v35 = vand.u32 2147483647, %v686_v48  ;;  %vm694_vm14 = vmor %vm692_vm13, %vm693_vm12  ;;  %v1385_v48 = vld [vmem:[%s2296_s0 + $0x88] sm:$0xff] }
 0x2c3   :  { %v661_v11 = vsel %vm658_vm10, %v660_v62, %v656_v5  ;;  %v675_v13 = vsel %vm674_vm9, %v1524_v50, %v671_v63  ;;  %v689_v31 = vsub.f32 1.0, %v688_v0  ;;  %v1387_v62 = vld [vmem:[%s2296_s0 + $0x98] sm:$0xff] }
 0x2c4   :  { %v680_v19 = vsel %vm677_vm11, %v679_v4, %v675_v13  ;;  %v703_v44 = vmul.f32 %v1528_v6, %v661_v11  ;;  %vm697_vm15 = vcmp.eq.f32.partialorder %v696_v35, 8.507059e+37 }
 0x2c5   :  { %v702_v18 = vmul.f32 %v680_v19, %v2094_v20  ;;  %v690_v29 = vmul.f32 %v1526_v60, %v689_v31 }
 0x2c7   :  { %v2146_v15 = vadd.f32 %v703_v44, %v702_v18  ;;  %v691_v25 = vadd.f32 %v1526_v60, %v690_v29 }
 0x2c9   :  { %1529 = vtanh.f32 %v2146_v15  ;;  %v695_v51 = vsel %vm694_vm14, %v1526_v60, %v691_v25  ;;  %v1386_v25 = vld [vmem:[%s2296_s0 + $0x90] sm:$0xff] }
 0x2ca   :  { %v700_v36 = vsel %vm697_vm15, %v699_v14, %v695_v51 }
 0x2cf   :  { %v1530_v50 = vpop.eup %1529 }
 0x2d0   :  { %v706_v47 = vmul.f32 %v1530_v50, %v700_v36 }
 0x2d2   :  { %v709_v30 = vpack.c.bf16 %v706_v47, %v706_v47  ;;  %v1452_v20 = vpack.c.bf16 %v706_v47, %v2097_v24  ;;  %v1384_v24 = vld [vmem:[%s2296_s0 + $0x80] sm:$0xff] }
 0x2d4   :  { %723 = vmatmul.bf16.vlgmr.msra.gmra.mxu0 %v709_v30  ;;  %1464 = vst [vmem:[%s2298_s4 + $0x8] sm:$0xff] %v1452_v20   ;;  %736 = vmatmul.bf16.vlgmr.msra.gmra.mxu1 %v709_v30 }
 0x2d5   :  { %749 = vmatmul.bf16.vlgmr.msra.gmra.mxu2 %v709_v30  ;;  %762 = vmatmul.bf16.vlgmr.msra.gmra.mxu3 %v709_v30 }
 0x2d6   :  { %961 = vmatpush.bf16.msra.mxu0 %v1629_v3  ;;  %974 = vmatpush.bf16.msra.mxu1 %v1640_v7 }
 0x2d7   :  { %987 = vmatpush.bf16.msra.mxu2 %v1680_v21  ;;  %1000 = vmatpush.bf16.msra.mxu3 %v1642_v8 }
 0x2da   :  { %962 = vmatpush.bf16.msra.mxu0 %v1654_v12  ;;  %975 = vmatpush.bf16.msra.mxu1 %v1667_v16 }
 0x2db   :  { %988 = vmatpush.bf16.msra.mxu2 %v1719_v34  ;;  %1001 = vmatpush.bf16.msra.mxu3 %v1669_v17 }
 0x2de   :  { %963 = vmatpush.bf16.msra.mxu0 %v1702_v28  ;;  %976 = vmatpush.bf16.msra.mxu1 %v1715_v32 }
 0x2df   :  { %989 = vmatpush.bf16.msra.mxu2 %v1743_v42  ;;  %1002 = vmatpush.bf16.msra.mxu3 %v1717_v33 }
 0x2e2   :  { %964 = vmatpush.bf16.msra.mxu0 %v1741_v41  ;;  %977 = vmatpush.bf16.msra.mxu1 %v1753_v45 }
 0x2e3   :  { %990 = vmatpush.bf16.msra.mxu2 %v1779_v54  ;;  %1003 = vmatpush.bf16.msra.mxu3 %v1755_v46 }
 0x2e6   :  { %965 = vmatpush.bf16.msra.mxu0 %v1777_v53  ;;  %978 = vmatpush.bf16.msra.mxu1 %v1789_v57 }
 0x2e7   :  { %991 = vmatpush.bf16.msra.mxu2 %v1815_v2  ;;  %1004 = vmatpush.bf16.msra.mxu3 %v1791_v58 }
 0x2ea   :  { %966 = vmatpush.bf16.msra.mxu0 %v1813_v1  ;;  %979 = vmatpush.bf16.msra.mxu1 %v1828_v9 }
 0x2eb   :  { %992 = vmatpush.bf16.msra.mxu2 %v1854_v23  ;;  %1005 = vmatpush.bf16.msra.mxu3 %v1830_v10 }
 0x2ee   :  { %967 = vmatpush.bf16.msra.mxu0 %v1852_v22  ;;  %980 = vmatpush.bf16.msra.mxu1 %v1864_v26 }
 0x2ef   :  { %993 = vmatpush.bf16.msra.mxu2 %v1890_v39  ;;  %1006 = vmatpush.bf16.msra.mxu3 %v1866_v27 }
 0x2f2   :  { %968 = vmatpush.bf16.msra.mxu0 %v1888_v38  ;;  %981 = vmatpush.bf16.msra.mxu1 %v1894_v40 }
 0x2f3   :  { %994 = vmatpush.bf16.msra.mxu2 %v1908_v49  ;;  %1007 = vmatpush.bf16.msra.mxu3 %v1896_v43 }
 0x351   :  { %v724_v52 = vpop.f32.mrf.mxu0  ;;  %v737_v55 = vpop.f32.mrf.mxu1 }
 0x352   :  { %v725_v56 = vadd.f32 %v1384_v24, %v724_v52  ;;  %v738_v59 = vadd.f32 %v1385_v48, %v737_v55 }
 0x354   :  { %v1388_v60 = vmul.f32 -1.442695, %v725_v56  ;;  %v1389_v61 = vmul.f32 -1.442695, %v738_v59 }
 0x356   :  { %1531 = vpow2.f32 %v1388_v60 }
 0x357   :  { %1533 = vpow2.f32 %v1389_v61 }
 0x358   :  { %v750_v63 = vpop.f32.mrf.mxu2  ;;  %v763_v0 = vpop.f32.mrf.mxu3 }
 0x359   :  { %v764_v4 = vadd.f32 %v1387_v62, %v763_v0  ;;  %v726_v5 = vpop.f32.mrf.mxu0  ;;  %v739_v6 = vpop.f32.mrf.mxu1  ;;  %v751_v14 = vadd.f32 %v1386_v25, %v750_v63 }
 0x35b   :  { %v1390_v11 = vmul.f32 -1.442695, %v764_v4 }
 0x35c   :  { %v1532_v13 = vpop.eup %1531 }
 0x35d   :  { %v1534_v31 = vpop.eup %1533  ;;  %v770_v19 = vadd.f32 1.0, %v1532_v13  ;;  %1535 = vpow2.f32 %v1390_v11 }
 0x35e   :  { %v789_v44 = vadd.f32 1.0, %v1534_v31 }
 0x35f   :  { %1537 = vrcp.f32 %v770_v19  ;;  %v782_v24 = vand.u32 2147483648, %v770_v19  ;;  %v780_v55 = vand.u32 2147483647, %v770_v19  ;;  %vm776_vm2 = vweird.f32 %v770_v19 }
 0x360   :  { %1539 = vrcp.f32 %v789_v44  ;;  %v752_v18 = vpop.f32.mrf.mxu2  ;;  %v765_v29 = vpop.f32.mrf.mxu3  ;;  %v801_v48 = vand.u32 2147483648, %v789_v44  ;;  %v799_v59 = vand.u32 2147483647, %v789_v44  ;;  %vm795_vm3 = vweird.f32 %v789_v44 }
 0x361   :  { %v783_v62 = vor.u32 1.1754944e-38, %v782_v24  ;;  %vm781_vm6 = vcmp.eq.f32.partialorder %v780_v55, 8.507059e+37 }
 0x362   :  { %v802_v4 = vor.u32 1.1754944e-38, %v801_v48  ;;  %vm800_vm7 = vcmp.eq.f32.partialorder %v799_v59, 8.507059e+37 }
 0x363   :  { %v1536_v37 = vpop.eup %1535 }
 0x364   :  { %v809_v35 = vadd.f32 1.0, %v1536_v37 }
 0x365   :  { %v1538_v51 = vpop.eup %1537 }
 0x366   :  { %v1540_v50 = vpop.eup %1539  ;;  %v772_v36 = vmul.f32 %v1538_v51, %v770_v19  ;;  %1541 = vrcp.f32 %v809_v35  ;;  %vm777_vm0 = vweird.f32 %v1538_v51  ;;  %vm815_vm9 = vweird.f32 %v809_v35 }
 0x367   :  { %v791_v47 = vmul.f32 %v1540_v50, %v789_v44  ;;  %1543 = vtanh.f32 %v751_v14  ;;  %vm796_vm1 = vweird.f32 %v1540_v50  ;;  %vm778_vm4 = vmor %vm776_vm2, %vm777_vm0  ;;  %v821_v14 = vand.u32 2147483648, %v809_v35 }
 0x368   :  { %v773_v30 = vsub.f32 1.0, %v772_v36  ;;  %vm797_vm5 = vmor %vm795_vm3, %vm796_vm1 }
 0x369   :  { %v792_v20 = vsub.f32 1.0, %v791_v47  ;;  %v822_v47 = vor.u32 1.1754944e-38, %v821_v14 }
 0x36a   :  { %v774_v52 = vmul.f32 %v1538_v51, %v773_v30 }
 0x36b   :  { %v793_v56 = vmul.f32 %v1540_v50, %v792_v20 }
 0x36c   :  { %v1542_v60 = vpop.eup %1541  ;;  %v775_v61 = vadd.f32 %v1538_v51, %v774_v52 }
 0x36d   :  { %v794_v63 = vadd.f32 %v1540_v50, %v793_v56  ;;  %v811_v0 = vmul.f32 %v1542_v60, %v809_v35  ;;  %v1544_v6 = vpop.eup %1543  ;;  %vm816_vm8 = vweird.f32 %v1542_v60 }
 0x36e   :  { %v779_v5 = vsel %vm778_vm4, %v1538_v51, %v775_v61  ;;  %v819_v51 = vand.u32 2147483647, %v809_v35  ;;  %vm817_vm10 = vmor %vm815_vm9, %vm816_vm8 }
 0x36f   :  { %v784_v11 = vsel %vm781_vm6, %v783_v62, %v779_v5  ;;  %v798_v13 = vsel %vm797_vm5, %v1540_v50, %v794_v63  ;;  %v812_v31 = vsub.f32 1.0, %v811_v0 }
 0x370   :  { %v803_v18 = vsel %vm800_vm7, %v802_v4, %v798_v13  ;;  %v826_v29 = vmul.f32 %v1544_v6, %v784_v11  ;;  %vm820_vm11 = vcmp.eq.f32.partialorder %v819_v51, 8.507059e+37 }
 0x371   :  { %v825_v25 = vmul.f32 %v803_v18, %v2146_v15  ;;  %v813_v37 = vmul.f32 %v1542_v60, %v812_v31 }
 0x373   :  { %v2198_v19 = vadd.f32 %v826_v29, %v825_v25  ;;  %v814_v44 = vadd.f32 %v1542_v60, %v813_v37 }
 0x375   :  { %1545 = vtanh.f32 %v2198_v19  ;;  %v818_v36 = vsel %vm817_vm10, %v1542_v60, %v814_v44 }
 0x376   :  { %v823_v30 = vsel %vm820_vm11, %v822_v47, %v818_v36 }
 0x37b   :  { %v1546_v50 = vpop.eup %1545 }
 0x37c   :  { %v2201_v20 = vmul.f32 %v1546_v50, %v823_v30 }
 0x37e   :  { %v832_v15 = vpack.c.bf16 %v2201_v20, %v2201_v20 }
 0x380   :  { %846 = vmatmul.bf16.vlgmr.msrb.gmra.mxu0 %v832_v15  ;;  %859 = vmatmul.bf16.vlgmr.msrb.gmra.mxu1 %v832_v15 }
 0x381   :  { %872 = vmatmul.bf16.vlgmr.msrb.gmra.mxu2 %v832_v15  ;;  %885 = vmatmul.bf16.vlgmr.msrb.gmra.mxu3 %v832_v15 }
 0x382   :  { %1084 = vmatpush.bf16.msrb.mxu0 %v1629_v3  ;;  %1097 = vmatpush.bf16.msrb.mxu1 %v1640_v7  ;;  %v1391_v3 = vld [vmem:[%s2296_s0 + $0xa0] sm:$0xff]  ;;  %v1392_v7 = vld [vmem:[%s2296_s0 + $0xa8] sm:$0xff] }
 0x383   :  { %1110 = vmatpush.bf16.msrb.mxu2 %v1680_v21  ;;  %1123 = vmatpush.bf16.msrb.mxu3 %v1642_v8 }
 0x386   :  { %1085 = vmatpush.bf16.msrb.mxu0 %v1654_v12  ;;  %1098 = vmatpush.bf16.msrb.mxu1 %v1667_v16 }
 0x387   :  { %1111 = vmatpush.bf16.msrb.mxu2 %v1719_v34  ;;  %1124 = vmatpush.bf16.msrb.mxu3 %v1669_v17 }
 0x38a   :  { %1086 = vmatpush.bf16.msrb.mxu0 %v1702_v28  ;;  %1099 = vmatpush.bf16.msrb.mxu1 %v1715_v32  ;;  %v1394_v32 = vld [vmem:[%s2296_s0 + $0xb8] sm:$0xff] }
 0x38b   :  { %1112 = vmatpush.bf16.msrb.mxu2 %v1743_v42  ;;  %1125 = vmatpush.bf16.msrb.mxu3 %v1717_v33 }
 0x38e   :  { %1087 = vmatpush.bf16.msrb.mxu0 %v1741_v41  ;;  %1100 = vmatpush.bf16.msrb.mxu1 %v1753_v45 }
 0x38f   :  { %1113 = vmatpush.bf16.msrb.mxu2 %v1779_v54  ;;  %1126 = vmatpush.bf16.msrb.mxu3 %v1755_v46 }
 0x392   :  { %1088 = vmatpush.bf16.msrb.mxu0 %v1777_v53  ;;  %1101 = vmatpush.bf16.msrb.mxu1 %v1789_v57 }
 0x393   :  { %1114 = vmatpush.bf16.msrb.mxu2 %v1815_v2  ;;  %1127 = vmatpush.bf16.msrb.mxu3 %v1791_v58 }
 0x396   :  { %1089 = vmatpush.bf16.msrb.mxu0 %v1813_v1  ;;  %1102 = vmatpush.bf16.msrb.mxu1 %v1828_v9  ;;  %v1393_v9 = vld [vmem:[%s2296_s0 + $0xb0] sm:$0xff] }
 0x397   :  { %1115 = vmatpush.bf16.msrb.mxu2 %v1854_v23  ;;  %1128 = vmatpush.bf16.msrb.mxu3 %v1830_v10 }
 0x39a   :  { %1090 = vmatpush.bf16.msrb.mxu0 %v1852_v22  ;;  %1103 = vmatpush.bf16.msrb.mxu1 %v1864_v26 }
 0x39b   :  { %1116 = vmatpush.bf16.msrb.mxu2 %v1890_v39  ;;  %1129 = vmatpush.bf16.msrb.mxu3 %v1866_v27 }
 0x39e   :  { %1091 = vmatpush.bf16.msrb.mxu0 %v1888_v38  ;;  %1104 = vmatpush.bf16.msrb.mxu1 %v1894_v40 }
 0x39f   :  { %1117 = vmatpush.bf16.msrb.mxu2 %v1908_v49  ;;  %1130 = vmatpush.bf16.msrb.mxu3 %v1896_v43 }
 0x3fd   :  { %v847_v8 = vpop.f32.mrf.mxu0  ;;  %v860_v12 = vpop.f32.mrf.mxu1 }
 0x3fe   :  { %v848_v16 = vadd.f32 %v1391_v3, %v847_v8  ;;  %v861_v17 = vadd.f32 %v1392_v7, %v860_v12  ;;  %v1398_v3 = vld [vmem:[%s2296_s0 + $0xc0] sm:$0xff]  ;;  %v1399_v7 = vld [vmem:[%s2296_s0 + $0xc8] sm:$0xff] }
 0x400   :  { %v1395_v21 = vmul.f32 -1.442695, %v848_v16  ;;  %v1396_v28 = vmul.f32 -1.442695, %v861_v17 }
 0x402   :  { %1547 = vpow2.f32 %v1395_v21 }
 0x403   :  { %1549 = vpow2.f32 %v1396_v28  ;;  %v1401_v28 = vld [vmem:[%s2296_s0 + $0xd8] sm:$0xff] }
 0x404   :  { %v873_v33 = vpop.f32.mrf.mxu2  ;;  %v886_v34 = vpop.f32.mrf.mxu3 }
 0x405   :  { %v887_v41 = vadd.f32 %v1394_v32, %v886_v34  ;;  %v849_v42 = vpop.f32.mrf.mxu0  ;;  %v862_v45 = vpop.f32.mrf.mxu1  ;;  %v874_v26 = vadd.f32 %v1393_v9, %v873_v33 }
 0x407   :  { %v1397_v46 = vmul.f32 -1.442695, %v887_v41 }
 0x408   :  { %v1548_v53 = vpop.eup %1547 }
 0x409   :  { %v1550_v54 = vpop.eup %1549  ;;  %v893_v57 = vadd.f32 1.0, %v1548_v53  ;;  %1551 = vpow2.f32 %v1397_v46 }
 0x40a   :  { %v912_v58 = vadd.f32 1.0, %v1550_v54 }
 0x40b   :  { %1553 = vrcp.f32 %v893_v57  ;;  %v905_v49 = vand.u32 2147483648, %v893_v57  ;;  %v903_v48 = vand.u32 2147483647, %v893_v57  ;;  %vm899_vm14 = vweird.f32 %v893_v57 }
 0x40c   :  { %1555 = vrcp.f32 %v912_v58  ;;  %v875_v1 = vpop.f32.mrf.mxu2  ;;  %v888_v2 = vpop.f32.mrf.mxu3  ;;  %v924_v35 = vand.u32 2147483648, %v912_v58  ;;  %v922_v55 = vand.u32 2147483647, %v912_v58  ;;  %vm918_vm15 = vweird.f32 %v912_v58 }
 0x40d   :  { %v906_v60 = vor.u32 1.1754944e-38, %v905_v49  ;;  %vm904_vm2 = vcmp.eq.f32.partialorder %v903_v48, 8.507059e+37  ;;  %v1400_v2 = vld [vmem:[%s2296_s0 + $0xd0] sm:$0xff] }
 0x40e   :  { %v925_v63 = vor.u32 1.1754944e-38, %v924_v35  ;;  %vm923_vm3 = vcmp.eq.f32.partialorder %v922_v55, 8.507059e+37 }
 0x40f   :  { %v1552_v10 = vpop.eup %1551 }
 0x410   :  { %v932_v22 = vadd.f32 1.0, %v1552_v10 }
 0x411   :  { %v1554_v23 = vpop.eup %1553 }
 0x412   :  { %v1556_v27 = vpop.eup %1555  ;;  %v895_v38 = vmul.f32 %v1554_v23, %v893_v57  ;;  %1557 = vrcp.f32 %v932_v22  ;;  %vm900_vm12 = vweird.f32 %v1554_v23  ;;  %v944_v44 = vand.u32 2147483648, %v932_v22 }
 0x413   :  { %v914_v39 = vmul.f32 %v1556_v27, %v912_v58  ;;  %1559 = vtanh.f32 %v874_v26  ;;  %vm919_vm13 = vweird.f32 %v1556_v27  ;;  %vm901_vm0 = vmor %vm899_vm14, %vm900_vm12  ;;  %vm938_vm5 = vweird.f32 %v932_v22 }
 0x414   :  { %v896_v40 = vsub.f32 1.0, %v895_v38  ;;  %vm920_vm1 = vmor %vm918_vm15, %vm919_vm13  ;;  %v942_v14 = vand.u32 2147483647, %v932_v22  ;;  %v945_v36 = vor.u32 1.1754944e-38, %v944_v44 }
 0x415   :  { %v915_v43 = vsub.f32 1.0, %v914_v39 }
 0x416   :  { %v897_v24 = vmul.f32 %v1554_v23, %v896_v40  ;;  %vm943_vm7 = vcmp.eq.f32.partialorder %v942_v14, 8.507059e+37 }
 0x417   :  { %v916_v52 = vmul.f32 %v1556_v27, %v915_v43 }
 0x418   :  { %v1558_v56 = vpop.eup %1557  ;;  %v898_v59 = vadd.f32 %v1554_v23, %v897_v24 }
 0x419   :  { %v917_v61 = vadd.f32 %v1556_v27, %v916_v52  ;;  %v934_v62 = vmul.f32 %v1558_v56, %v932_v22  ;;  %v1560_v4 = vpop.eup %1559  ;;  %vm939_vm4 = vweird.f32 %v1558_v56 }
 0x41a   :  { %v902_v0 = vsel %vm901_vm0, %v1554_v23, %v898_v59  ;;  %vm940_vm6 = vmor %vm938_vm5, %vm939_vm4 }
 0x41b   :  { %v907_v5 = vsel %vm904_vm2, %v906_v60, %v902_v0  ;;  %v921_v6 = vsel %vm920_vm1, %v1556_v27, %v917_v61  ;;  %v935_v11 = vsub.f32 1.0, %v934_v62 }
 0x41c   :  { %v926_v13 = vsel %vm923_vm3, %v925_v63, %v921_v6  ;;  %v949_v31 = vmul.f32 %v1560_v4, %v907_v5 }
 0x41d   :  { %v948_v18 = vmul.f32 %v926_v13, %v2198_v19  ;;  %v936_v29 = vmul.f32 %v1558_v56, %v935_v11 }
 0x41f   :  { %v2250_v25 = vadd.f32 %v949_v31, %v948_v18  ;;  %v937_v37 = vadd.f32 %v1558_v56, %v936_v29 }
 0x421   :  { %1561 = vtanh.f32 %v2250_v25  ;;  %v941_v51 = vsel %vm940_vm6, %v1558_v56, %v937_v37 }
 0x422   :  { %v946_v50 = vsel %vm943_vm7, %v945_v36, %v941_v51 }
 0x427   :  { %v1562_v47 = vpop.eup %1561 }
 0x428   :  { %v952_v30 = vmul.f32 %v1562_v47, %v946_v50 }
 0x42a   :  { %v955_v15 = vpack.c.bf16 %v952_v30, %v952_v30  ;;  %v1457_v19 = vpack.c.bf16 %v952_v30, %v2201_v20 }
 0x42c   :  { %969 = vmatmul.bf16.vlgmr.msra.gmra.mxu0 %v955_v15  ;;  %1465 = vst [vmem:[%s2298_s4 + $0x10] sm:$0xff] %v1457_v19   ;;  %982 = vmatmul.bf16.vlgmr.msra.gmra.mxu1 %v955_v15  ;;  %v1406_v19 = vld [vmem:[%s2296_s0 + $0xe8] sm:$0xff] }
 0x42d   :  { %995 = vmatmul.bf16.vlgmr.msra.gmra.mxu2 %v955_v15  ;;  %1008 = vmatmul.bf16.vlgmr.msra.gmra.mxu3 %v955_v15  ;;  %v1405_v15 = vld [vmem:[%s2296_s0 + $0xe0] sm:$0xff] }
 0x4a9   :  { %v970_v8 = vpop.f32.mrf.mxu0  ;;  %v983_v12 = vpop.f32.mrf.mxu1 }
 0x4aa   :  { %v971_v16 = vadd.f32 %v1398_v3, %v970_v8  ;;  %v984_v20 = vadd.f32 %v1399_v7, %v983_v12 }
 0x4ac   :  { %v1402_v17 = vmul.f32 -1.442695, %v971_v16  ;;  %v1403_v21 = vmul.f32 -1.442695, %v984_v20 }
 0x4ae   :  { %1563 = vpow2.f32 %v1402_v17  ;;  %v1408_v17 = vld [vmem:[%s2296_s0 + $0xf8] sm:$0xff] }
 0x4af   :  { %1565 = vpow2.f32 %v1403_v21 }
 0x4b0   :  { %v996_v32 = vpop.f32.mrf.mxu2  ;;  %v1009_v33 = vpop.f32.mrf.mxu3 }
 0x4b1   :  { %v1010_v34 = vadd.f32 %v1401_v28, %v1009_v33  ;;  %v972_v41 = vpop.f32.mrf.mxu0  ;;  %v985_v42 = vpop.f32.mrf.mxu1  ;;  %v997_v23 = vadd.f32 %v1400_v2, %v996_v32 }
 0x4b3   :  { %v1404_v45 = vmul.f32 -1.442695, %v1010_v34 }
 0x4b4   :  { %v1564_v46 = vpop.eup %1563 }
 0x4b5   :  { %v1566_v53 = vpop.eup %1565  ;;  %v1016_v54 = vadd.f32 1.0, %v1564_v46  ;;  %1567 = vpow2.f32 %v1404_v45 }
 0x4b6   :  { %v1035_v57 = vadd.f32 1.0, %v1566_v53 }
 0x4b7   :  { %1569 = vrcp.f32 %v1016_v54  ;;  %v1028_v43 = vand.u32 2147483648, %v1016_v54  ;;  %v1026_v24 = vand.u32 2147483647, %v1016_v54  ;;  %vm1022_vm10 = vweird.f32 %v1016_v54 }
 0x4b8   :  { %1571 = vrcp.f32 %v1035_v57  ;;  %v998_v58 = vpop.f32.mrf.mxu2  ;;  %v1011_v1 = vpop.f32.mrf.mxu3  ;;  %v1047_v49 = vand.u32 2147483648, %v1035_v57  ;;  %v1045_v52 = vand.u32 2147483647, %v1035_v57  ;;  %vm1041_vm11 = vweird.f32 %v1035_v57 }
 0x4b9   :  { %v1029_v59 = vor.u32 1.1754944e-38, %v1028_v43  ;;  %vm1027_vm14 = vcmp.eq.f32.partialorder %v1026_v24, 8.507059e+37  ;;  %v1407_v58 = vld [vmem:[%s2296_s0 + $0xf0] sm:$0xff] }
 0x4ba   :  { %v1048_v62 = vor.u32 1.1754944e-38, %v1047_v49  ;;  %vm1046_vm15 = vcmp.eq.f32.partialorder %v1045_v52, 8.507059e+37 }
 0x4bb   :  { %v1568_v9 = vpop.eup %1567 }
 0x4bc   :  { %v1055_v10 = vadd.f32 1.0, %v1568_v9 }
 0x4bd   :  { %v1570_v22 = vpop.eup %1569 }
 0x4be   :  { %v1572_v26 = vpop.eup %1571  ;;  %v1018_v27 = vmul.f32 %v1570_v22, %v1016_v54  ;;  %1573 = vrcp.f32 %v1055_v10  ;;  %vm1023_vm8 = vweird.f32 %v1570_v22  ;;  %v1067_v44 = vand.u32 2147483648, %v1055_v10 }
 0x4bf   :  { %v1037_v38 = vmul.f32 %v1572_v26, %v1035_v57  ;;  %1575 = vtanh.f32 %v997_v23  ;;  %vm1042_vm9 = vweird.f32 %v1572_v26  ;;  %vm1024_vm12 = vmor %vm1022_vm10, %vm1023_vm8  ;;  %vm1061_vm1 = vweird.f32 %v1055_v10 }
 0x4c0   :  { %v1019_v39 = vsub.f32 1.0, %v1018_v27  ;;  %vm1043_vm13 = vmor %vm1041_vm11, %vm1042_vm9  ;;  %v1065_v14 = vand.u32 2147483647, %v1055_v10  ;;  %v1068_v36 = vor.u32 1.1754944e-38, %v1067_v44 }
 0x4c1   :  { %v1038_v40 = vsub.f32 1.0, %v1037_v38 }
 0x4c2   :  { %v1020_v35 = vmul.f32 %v1570_v22, %v1019_v39  ;;  %vm1066_vm3 = vcmp.eq.f32.partialorder %v1065_v14, 8.507059e+37 }
 0x4c3   :  { %v1039_v48 = vmul.f32 %v1572_v26, %v1038_v40 }
 0x4c4   :  { %v1574_v55 = vpop.eup %1573  ;;  %v1021_v56 = vadd.f32 %v1570_v22, %v1020_v35 }
 0x4c5   :  { %v1040_v60 = vadd.f32 %v1572_v26, %v1039_v48  ;;  %v1057_v61 = vmul.f32 %v1574_v55, %v1055_v10  ;;  %v1576_v0 = vpop.eup %1575  ;;  %vm1062_vm0 = vweird.f32 %v1574_v55 }
 0x4c6   :  { %v1025_v63 = vsel %vm1024_vm12, %v1570_v22, %v1021_v56  ;;  %vm1063_vm2 = vmor %vm1061_vm1, %vm1062_vm0 }
 0x4c7   :  { %v1030_v4 = vsel %vm1027_vm14, %v1029_v59, %v1025_v63  ;;  %v1044_v5 = vsel %vm1043_vm13, %v1572_v26, %v1040_v60  ;;  %v1058_v6 = vsub.f32 1.0, %v1057_v61 }
 0x4c8   :  { %v1049_v11 = vsel %vm1046_vm15, %v1048_v62, %v1044_v5  ;;  %v1072_v13 = vmul.f32 %v1576_v0, %v1030_v4 }
 0x4c9   :  { %v1071_v31 = vmul.f32 %v1049_v11, %v2250_v25  ;;  %v1059_v18 = vmul.f32 %v1574_v55, %v1058_v6 }
 0x4cb   :  { %v2270_v29 = vadd.f32 %v1072_v13, %v1071_v31  ;;  %v1060_v37 = vadd.f32 %v1574_v55, %v1059_v18 }
 0x4cd   :  { %1577 = vtanh.f32 %v2270_v29  ;;  %v1064_v51 = vsel %vm1063_vm2, %v1574_v55, %v1060_v37 }
 0x4ce   :  { %v1069_v50 = vsel %vm1066_vm3, %v1068_v36, %v1064_v51 }
 0x4d3   :  { %v1578_v47 = vpop.eup %1577 }
 0x4d4   :  { %v2273_v30 = vmul.f32 %v1578_v47, %v1069_v50 }
 0x4d6   :  { %v1078_v25 = vpack.c.bf16 %v2273_v30, %v2273_v30 }
 0x4d8   :  { %1092 = vmatmul.bf16.vlgmr.msrb.gmra.mxu0 %v1078_v25  ;;  %1105 = vmatmul.bf16.vlgmr.msrb.gmra.mxu1 %v1078_v25 }
 0x4d9   :  { %1118 = vmatmul.bf16.vlgmr.msrb.gmra.mxu2 %v1078_v25  ;;  %1131 = vmatmul.bf16.vlgmr.msrb.gmra.mxu3 %v1078_v25 }
 0x555   :  { %v1093_v3 = vpop.f32.mrf.mxu0  ;;  %v1106_v7 = vpop.f32.mrf.mxu1 }
 0x556   :  { %v1094_v8 = vadd.f32 %v1405_v15, %v1093_v3  ;;  %v1107_v12 = vadd.f32 %v1406_v19, %v1106_v7 }
 0x558   :  { %v1409_v16 = vmul.f32 -1.442695, %v1094_v8  ;;  %v1410_v20 = vmul.f32 -1.442695, %v1107_v12 }
 0x55a   :  { %1579 = vpow2.f32 %v1409_v16 }
 0x55b   :  { %1581 = vpow2.f32 %v1410_v20 }
 0x55c   :  { %v1119_v21 = vpop.f32.mrf.mxu2  ;;  %v1132_v28 = vpop.f32.mrf.mxu3 }
 0x55d   :  { %v1133_v32 = vadd.f32 %v1408_v17, %v1132_v28  ;;  %v1095_v33 = vpop.f32.mrf.mxu0  ;;  %v1108_v34 = vpop.f32.mrf.mxu1  ;;  %v1120_v10 = vadd.f32 %v1407_v58, %v1119_v21 }
 0x55f   :  { %v1411_v41 = vmul.f32 -1.442695, %v1133_v32 }
 0x560   :  { %v1580_v42 = vpop.eup %1579 }
 0x561   :  { %v1582_v45 = vpop.eup %1581  ;;  %v1139_v46 = vadd.f32 1.0, %v1580_v42  ;;  %1583 = vpow2.f32 %v1411_v41 }
 0x562   :  { %v1158_v53 = vadd.f32 1.0, %v1582_v45 }
 0x563   :  { %1585 = vrcp.f32 %v1139_v46  ;;  %v1151_v39 = vand.u32 2147483648, %v1139_v46  ;;  %v1149_v49 = vand.u32 2147483647, %v1139_v46  ;;  %vm1145_vm6 = vweird.f32 %v1139_v46 }
 0x564   :  { %1587 = vrcp.f32 %v1158_v53  ;;  %v1121_v54 = vpop.f32.mrf.mxu2  ;;  %v1134_v57 = vpop.f32.mrf.mxu3  ;;  %v1170_v40 = vand.u32 2147483648, %v1158_v53  ;;  %v1168_v24 = vand.u32 2147483647, %v1158_v53  ;;  %vm1164_vm7 = vweird.f32 %v1158_v53 }
 0x565   :  { %v1152_v55 = vor.u32 1.1754944e-38, %v1151_v39  ;;  %vm1150_vm10 = vcmp.eq.f32.partialorder %v1149_v49, 8.507059e+37 }
 0x566   :  { %v1171_v60 = vor.u32 1.1754944e-38, %v1170_v40  ;;  %vm1169_vm11 = vcmp.eq.f32.partialorder %v1168_v24, 8.507059e+37 }
 0x567   :  { %v1584_v1 = vpop.eup %1583 }
 0x568   :  { %v1178_v2 = vadd.f32 1.0, %v1584_v1 }
 0x569   :  { %v1586_v9 = vpop.eup %1585 }
 0x56a   :  { %v1588_v22 = vpop.eup %1587  ;;  %v1141_v23 = vmul.f32 %v1586_v9, %v1139_v46  ;;  %1589 = vrcp.f32 %v1178_v2  ;;  %vm1146_vm4 = vweird.f32 %v1586_v9  ;;  %v1190_v37 = vand.u32 2147483648, %v1178_v2 }
 0x56b   :  { %v1160_v26 = vmul.f32 %v1588_v22, %v1158_v53  ;;  %1591 = vtanh.f32 %v1120_v10  ;;  %vm1165_vm5 = vweird.f32 %v1588_v22  ;;  %vm1147_vm8 = vmor %vm1145_vm6, %vm1146_vm4  ;;  %vm1184_vm13 = vweird.f32 %v1178_v2 }
 0x56c   :  { %v1142_v27 = vsub.f32 1.0, %v1141_v23  ;;  %vm1166_vm9 = vmor %vm1164_vm7, %vm1165_vm5  ;;  %v1188_v44 = vand.u32 2147483647, %v1178_v2  ;;  %v1191_v51 = vor.u32 1.1754944e-38, %v1190_v37 }
 0x56d   :  { %v1161_v38 = vsub.f32 1.0, %v1160_v26 }
 0x56e   :  { %v1143_v43 = vmul.f32 %v1586_v9, %v1142_v27  ;;  %vm1189_vm15 = vcmp.eq.f32.partialorder %v1188_v44, 8.507059e+37 }
 0x56f   :  { %v1162_v35 = vmul.f32 %v1588_v22, %v1161_v38 }
 0x570   :  { %v1590_v48 = vpop.eup %1589  ;;  %v1144_v52 = vadd.f32 %v1586_v9, %v1143_v43 }
 0x571   :  { %v1163_v56 = vadd.f32 %v1588_v22, %v1162_v35  ;;  %v1180_v59 = vmul.f32 %v1590_v48, %v1178_v2  ;;  %v1592_v62 = vpop.eup %1591  ;;  %vm1185_vm12 = vweird.f32 %v1590_v48 }
 0x572   :  { %v1148_v61 = vsel %vm1147_vm8, %v1586_v9, %v1144_v52  ;;  %vm1186_vm14 = vmor %vm1184_vm13, %vm1185_vm12 }
 0x573   :  { %v1153_v63 = vsel %vm1150_vm10, %v1152_v55, %v1148_v61  ;;  %v1167_v0 = vsel %vm1166_vm9, %v1588_v22, %v1163_v56  ;;  %v1181_v4 = vsub.f32 1.0, %v1180_v59 }
 0x574   :  { %v1172_v5 = vsel %vm1169_vm11, %v1171_v60, %v1167_v0  ;;  %v1195_v6 = vmul.f32 %v1592_v62, %v1153_v63 }
 0x575   :  { %v1194_v11 = vmul.f32 %v1172_v5, %v2270_v29  ;;  %v1182_v13 = vmul.f32 %v1590_v48, %v1181_v4 }
 0x577   :  { %v1196_v31 = vadd.f32 %v1195_v6, %v1194_v11  ;;  %v1183_v18 = vadd.f32 %v1590_v48, %v1182_v13 }
 0x579   :  { %1593 = vtanh.f32 %v1196_v31  ;;  %v1187_v14 = vsel %vm1186_vm14, %v1590_v48, %v1183_v18 }
 0x57a   :  { %v1192_v47 = vsel %vm1189_vm15, %v1191_v51, %v1187_v14 }
 0x57f   :  { %v1594_v36 = vpop.eup %1593 }
 0x580   :  { %v1198_v50 = vmul.f32 %v1594_v36, %v1192_v47 }
 0x582   :  { %v1201_v25 = vpack.c.bf16 %v1198_v50, %v1198_v50  ;;  %v1462_v15 = vpack.c.bf16 %v1198_v50, %v2273_v30 }
 0x584   :  { %1202 = vst [vmem:[#allocation2] sm:$0xf] %v1201_v25 }
 0x585   :  { %1466 = vst [vmem:[%s2298_s4 + $0x18] sm:$0xff] %v1462_v15  }

</bundles_post_ra>
